<compile_context>
chip_gen: v6e
topology: v6e:2x2x1
jax: 0.10.0
libtpu: 0.0.40
codegen_flags: <defaults>
</compile_context>

<pallas_src>
import functools

import jax
import jax.numpy as jnp
from jax.experimental import pallas as pl
from jax.experimental.pallas import tpu as pltpu

K = 3  # conv kernel size (size=3 in the module)


def _tap_deltas(Hp, Wp):
    """Flattened-index offsets of the 27 taps (kd, kh, kw), row-major order."""
    deltas = []
    for kd in range(K):
        for kh in range(K):
            for kw in range(K):
                deltas.append((kd - 1) * Hp * Wp + (kh - 1) * Wp + (kw - 1))
    return tuple(deltas)


# ----------------------------------------------------------------------------
# Fused Pallas kernel: conv1 + shortcut conv + conv2 + residual + ReLU
# ----------------------------------------------------------------------------
def se3_res_block_kernel(x_ref, w1sc_ref, s1sc_ref, b1sc_ref,
                         w2_ref, s2_ref, b2_ref, mask_ref,
                         o_ref, h_ext, px, ph, *,
                         C1, cin_pad, offset, p_pad, deltas):
    """One batch element per grid step, everything resident in VMEM.

    x_ref   : (1, cin_pad, pe)  bf16 zero-padded, flattened, margin-extended x
    w1sc_ref: (C1+Cout, 27*cin_pad) bf16 conv1 and shortcut weights, stacked
    w2_ref  : (Cout, 27*C1) bf16
    s*/b*   : per-output-channel affine (f32 column vectors)
    mask_ref: (1, p_pad) 1.0 at valid (non-halo, < P) padded positions
    o_ref   : (1, Cout, p_pad) f32 conv output over the full padded grid
              (halo / lane-pad positions hold garbage; wrapper slices them off)
    h_ext   : (C1, pe) bf16 scratch — intermediate activation with zero margins
    px, ph  : (27*cin_pad, p_pad) / (27*C1, p_pad) bf16 im2col patch scratch
    """
    # ---- im2col of x: one lane-offset slice per tap, stacked along sublanes -
    for t, d in enumerate(deltas):
        s = offset + d
        px[t * cin_pad:(t + 1) * cin_pad, :] = x_ref[0, :, s:s + p_pad]

    # ---- layer-1 conv and shortcut conv as ONE MXU matmul (bf16 in, f32 acc)
    y = jnp.dot(w1sc_ref[...], px[...], preferred_element_type=jnp.float32)
    y = y * s1sc_ref[...] + b1sc_ref[...]
    # scalar-capsule GatedBlock activation == ReLU; mask re-zeroes the halo and
    # the lane-padding so the next conv sees exact SAME-padding zeros.
    h = jnp.maximum(y[:C1, :], 0.0) * mask_ref[...]
    s_res = y[C1:, :]                      # shortcut GatedBlock: no activation

    # ---- place h in a zero-margined buffer (implicit SAME padding) ----------
    # Only zero the margin columns; the interior is overwritten right after.
    h_ext[:, :offset] = jnp.zeros((h_ext.shape[0], offset), h_ext.dtype)
    h_ext[:, offset + p_pad:] = jnp.zeros(
        (h_ext.shape[0], h_ext.shape[1] - offset - p_pad), h_ext.dtype)
    h_ext[:, offset:offset + p_pad] = h.astype(h_ext.dtype)

    # ---- im2col of h ---------------------------------------------------------
    for t, d in enumerate(deltas):
        s = offset + d
        ph[t * C1:(t + 1) * C1, :] = h_ext[:, s:s + p_pad]

    # ---- layer-2 conv + residual add + GatedActivation (scalar => ReLU) -----
    y2 = jnp.dot(w2_ref[...], ph[...], preferred_element_type=jnp.float32)
    y2 = y2 * s2_ref[...] + b2_ref[...]
    o_ref[0] = jnp.maximum(y2 + s_res, 0.0).astype(o_ref.dtype)


# ----------------------------------------------------------------------------
# Wrapper
# ----------------------------------------------------------------------------
def _w_to_mat(w, cpad, dtype):
    """(27, Cin, Cm) -> (Cm, 27*cpad), column index = tap*cpad + cin."""
    t, cin, cout = w.shape
    w = jnp.pad(w, ((0, 0), (0, cpad - cin), (0, 0)))
    return jnp.transpose(w, (2, 0, 1)).reshape(cout, t * cpad).astype(dtype)


def se3_gated_res_block(x_ncdhw, params):
    """SE3GatedResBlock.forward for scalar-only reprs.

    x_ncdhw: (N, Cin, D, H, W) as in PyTorch Conv3d.
    layers  : GatedBlock(Cin->C1, act=ReLU) -> GatedBlock(C1->Cout, act=None)
    shortcut: GatedBlock(Cin->Cout, act=None)   (in_repr != out_reprs[-1])
    out     : GatedActivation(layers(x) + shortcut(x)) == ReLU
    """
    N, Cin, D, H, W = x_ncdhw.shape
    C1 = params["w1"].shape[-1]
    Cout = params["w2"].shape[-1]
    Dp, Hp, Wp = D + 2, H + 2, W + 2
    P = Dp * Hp * Wp
    P_pad = ((P + 127) // 128) * 128                    # lane-dense volume extent
    cin_pad = ((Cin + 7) // 8) * 8                      # sublane-align channels
    margin = Hp * Wp + Wp + 1                           # max |tap offset|
    offset = ((margin + 127) // 128) * 128              # lane-aligned data start
    pe = ((offset + P_pad + margin + 127) // 128) * 128  # extended lane extent
    deltas = _tap_deltas(Hp, Wp)

    # Host-side (XLA) prep: pad channels to a sublane multiple, add the SAME
    # halo, flatten D/H/W into one lane-dense axis, add tap-shift margins, cast
    # MXU operands to bf16.
    xp = jnp.pad(x_ncdhw.astype(jnp.float32),
                 ((0, 0), (0, cin_pad - Cin), (1, 1), (1, 1), (1, 1)))
    x_ext = jnp.pad(xp.reshape(N, cin_pad, P),
                    ((0, 0), (0, 0), (offset, pe - offset - P))
                    ).astype(jnp.bfloat16)

    w1sc = jnp.concatenate([_w_to_mat(params["w1"], cin_pad, jnp.bfloat16),
                            _w_to_mat(params["wsc"], cin_pad, jnp.bfloat16)],
                           axis=0)
    w2 = _w_to_mat(params["w2"], C1, jnp.bfloat16)
    s1sc = jnp.concatenate([params["g1"], params["gsc"]]
                           ).reshape(C1 + Cout, 1).astype(jnp.float32)
    b1sc = jnp.concatenate([params["b1"], params["bsc"]]
                           ).reshape(C1 + Cout, 1).astype(jnp.float32)
    s2 = params["g2"].reshape(Cout, 1).astype(jnp.float32)
    b2 = params["b2"].reshape(Cout, 1).astype(jnp.float32)
    mask = jnp.pad(jnp.ones((D, H, W), jnp.float32),
                   ((1, 1), (1, 1), (1, 1))).reshape(1, P)
    mask = jnp.pad(mask, ((0, 0), (0, P_pad - P)))      # zero the lane padding

    kernel = functools.partial(se3_res_block_kernel, C1=C1, cin_pad=cin_pad,
                               offset=offset, p_pad=P_pad, deltas=deltas)

    flops = 2 * N * P_pad * (27 * cin_pad * (C1 + Cout) + 27 * C1 * Cout)
    bytes_accessed = (2 * (x_ext.size + w1sc.size + w2.size)
                      + 4 * (s1sc.size + b1sc.size + s2.size + b2.size
                             + mask.size + N * Cout * P_pad))

    out_flat = pl.pallas_call(
        kernel,
        out_shape=jax.ShapeDtypeStruct((N, Cout, P_pad), jnp.float32),
        grid_spec=pltpu.PrefetchScalarGridSpec(
            num_scalar_prefetch=0,
            grid=(N,),
            in_specs=[
                pl.BlockSpec((1, cin_pad, pe), lambda n: (n, 0, 0)),
                pl.BlockSpec((C1 + Cout, 27 * cin_pad), lambda n: (0, 0)),
                pl.BlockSpec((C1 + Cout, 1), lambda n: (0, 0)),
                pl.BlockSpec((C1 + Cout, 1), lambda n: (0, 0)),
                pl.BlockSpec((Cout, 27 * C1), lambda n: (0, 0)),
                pl.BlockSpec((Cout, 1), lambda n: (0, 0)),
                pl.BlockSpec((Cout, 1), lambda n: (0, 0)),
                pl.BlockSpec((1, P_pad), lambda n: (0, 0)),
            ],
            out_specs=pl.BlockSpec((1, Cout, P_pad), lambda n: (n, 0, 0)),
            scratch_shapes=[
                pltpu.VMEM((C1, pe), jnp.bfloat16),             # h with margins
                pltpu.VMEM((27 * cin_pad, P_pad), jnp.bfloat16),  # im2col(x)
                pltpu.VMEM((27 * C1, P_pad), jnp.bfloat16),       # im2col(h)
            ],
        ),
        compiler_params=pltpu.CompilerParams(
            dimension_semantics=("parallel",),
            vmem_limit_bytes=32 * 1024 * 1024),
        cost_estimate=pl.CostEstimate(flops=flops, transcendentals=0,
                                      bytes_accessed=bytes_accessed),
    )(x_ext, w1sc, s1sc, b1sc, w2, s2, b2, mask)

    # Drop the lane padding and halo positions (they hold garbage), return NCDHW.
    out = out_flat[:, :, :P].reshape(N, Cout, Dp, Hp, Wp)
    return out[:, :, 1:1 + D, 1:1 + H, 1:1 + W]


# ----------------------------------------------------------------------------
# Pure-JAX reference (for correctness check)
# ----------------------------------------------------------------------------
def _round_bf16(a):
    return a.astype(jnp.bfloat16).astype(jnp.float32)


def _conv3d_ref(x, w, scale, bias):
    Cin, Cout = w.shape[-2], w.shape[-1]
    w5 = w.reshape(K, K, K, Cin, Cout)
    y = jax.lax.conv_general_dilated(
        x, w5, window_strides=(1, 1, 1), padding="SAME",
        dimension_numbers=("NDHWC", "DHWIO", "NDHWC"),
        precision=jax.lax.Precision.HIGHEST)
    return y * scale.reshape(1, 1, 1, 1, Cout) + bias.reshape(1, 1, 1, 1, Cout)


def se3_gated_res_block_ref(x_ncdhw, params, mxu_round=False):
    """mxu_round=True mirrors the kernel's bf16 MXU inputs (f32 accumulation)."""
    r = _round_bf16 if mxu_round else (lambda a: a)
    x = jnp.transpose(x_ncdhw, (0, 2, 3, 4, 1))
    h = jnp.maximum(
        _conv3d_ref(r(x), r(params["w1"]), params["g1"], params["b1"]), 0.0)
    h2 = _conv3d_ref(r(h), r(params["w2"]), params["g2"], params["b2"])
    s = _conv3d_ref(r(x), r(params["wsc"]), params["gsc"], params["bsc"])
    out = jnp.maximum(h2 + s, 0.0)
    return jnp.transpose(out, (0, 4, 1, 2, 3))


# ----------------------------------------------------------------------------
# Main
# ----------------------------------------------------------------------------
if __name__ == "__main__":
    # in_repr = 4 scalar capsules, out_reprs = [8, 8] scalar capsules, size=3,
    # stride=1  ->  shortcut is a GatedBlock projection (4 != 8).
    N, Cin, D, H, W = 2, 4, 8, 8, 8
    C1, Cout = 8, 8

    key = jax.random.PRNGKey(0)
    kx, k1, k2, ks, kb = jax.random.split(key, 5)

    x = jax.random.normal(kx, (N, Cin, D, H, W), jnp.float32)

    def init_conv(k, cin, cout):
        fan_in = cin * K * K * K
        return jax.random.normal(k, (K * K * K, cin, cout),
                                 jnp.float32) * (1.0 / jnp.sqrt(fan_in))

    params = {
        "w1": init_conv(k1, Cin, C1),
        "g1": 1.0 + 0.05 * jnp.arange(C1, dtype=jnp.float32),
        "b1": 0.01 * jnp.arange(C1, dtype=jnp.float32),
        "w2": init_conv(k2, C1, Cout),
        "g2": 1.0 - 0.03 * jnp.arange(Cout, dtype=jnp.float32),
        "b2": -0.02 * jnp.arange(Cout, dtype=jnp.float32),
        "wsc": init_conv(ks, Cin, Cout),
        "gsc": 1.0 + 0.02 * jnp.arange(Cout, dtype=jnp.float32),
        "bsc": 0.005 * jnp.arange(Cout, dtype=jnp.float32),
    }

    out = jax.block_until_ready(se3_gated_res_block(x, params))
    assert out.shape == (N, Cout, D, H, W), out.shape

    # Tight check against a reference that mirrors the kernel's bf16 MXU inputs
    # (f32 accumulation), plus a loose sanity check against full-f32 semantics.
    ref_bf16 = jax.block_until_ready(
        se3_gated_res_block_ref(x, params, mxu_round=True))
    ref_f32 = jax.block_until_ready(
        se3_gated_res_block_ref(x, params, mxu_round=False))
    assert jnp.allclose(out, ref_bf16, atol=1e-3, rtol=1e-3), (
        float(jnp.max(jnp.abs(out - ref_bf16))))
    assert jnp.allclose(out, ref_f32, atol=1e-1, rtol=5e-2), (
        float(jnp.max(jnp.abs(out - ref_f32))))

    print("KERNEL_OK")
</pallas_src>

<mosaic_0001>
module attributes {stable_mosaic.version = 11 : i64} {
  func.func @se3_res_block_kernel(%arg0: i32, %arg1: memref<1x8x1280xbf16, #tpu.memory_space<vmem>>, %arg2: memref<16x216xbf16, #tpu.memory_space<vmem>>, %arg3: memref<16x1xf32, #tpu.memory_space<vmem>>, %arg4: memref<16x1xf32, #tpu.memory_space<vmem>>, %arg5: memref<8x216xbf16, #tpu.memory_space<vmem>>, %arg6: memref<8x1xf32, #tpu.memory_space<vmem>>, %arg7: memref<8x1xf32, #tpu.memory_space<vmem>>, %arg8: memref<1x1024xf32, #tpu.memory_space<vmem>>, %arg9: memref<1x8x1024xf32, #tpu.memory_space<vmem>>, %arg10: memref<8x1280xbf16, #tpu.memory_space<vmem>>, %arg11: memref<216x1024xbf16, #tpu.memory_space<vmem>>, %arg12: memref<216x1024xbf16, #tpu.memory_space<vmem>>) attributes {dimension_semantics = [#tpu.dimension_semantics<parallel>], iteration_bounds = array<i64: 2>, scalar_prefetch = 0 : i64, scratch_operands = 3 : i64, tpu.core_type = #tpu.core_type<tc>, window_params = [{transform_indices = @transform_0, window_bounds = array<i64: 1, 8, 1280>}, {pipeline_mode = #tpu.pipeline_mode<synchronous>, transform_indices = @transform_1, window_bounds = array<i64: 16, 216>}, {pipeline_mode = #tpu.pipeline_mode<synchronous>, transform_indices = @transform_2, window_bounds = array<i64: 16, 1>}, {pipeline_mode = #tpu.pipeline_mode<synchronous>, transform_indices = @transform_3, window_bounds = array<i64: 16, 1>}, {pipeline_mode = #tpu.pipeline_mode<synchronous>, transform_indices = @transform_4, window_bounds = array<i64: 8, 216>}, {pipeline_mode = #tpu.pipeline_mode<synchronous>, transform_indices = @transform_5, window_bounds = array<i64: 8, 1>}, {pipeline_mode = #tpu.pipeline_mode<synchronous>, transform_indices = @transform_6, window_bounds = array<i64: 8, 1>}, {pipeline_mode = #tpu.pipeline_mode<synchronous>, transform_indices = @transform_7, window_bounds = array<i64: 1, 1024>}, {transform_indices = @transform_8, window_bounds = array<i64: 1, 8, 1024>}]} {
    %c0 = arith.constant 0 : index
    %c0_0 = arith.constant 0 : index
    %c17 = arith.constant 17 : index
    %0 = vector.load %arg1[%c0, %c0_0, %c17] : memref<1x8x1280xbf16, #tpu.memory_space<vmem>>, vector<1x8x1024xbf16>
    %1 = vector.shape_cast %0 : vector<1x8x1024xbf16> to vector<8x1024xbf16>
    %c0_1 = arith.constant 0 : index
    %c0_2 = arith.constant 0 : index
    %2 = vector.load %arg11[%c0_1, %c0_2] : memref<216x1024xbf16, #tpu.memory_space<vmem>>, vector<8x1024xbf16>
    tpu.vector_store %arg11[%c0_1, %c0_2], %1 {strides = array<i32>} : memref<216x1024xbf16, #tpu.memory_space<vmem>>, vector<8x1024xbf16>,
    %c0_3 = arith.constant 0 : index
    %c0_4 = arith.constant 0 : index
    %c18 = arith.constant 18 : index
    %3 = vector.load %arg1[%c0_3, %c0_4, %c18] : memref<1x8x1280xbf16, #tpu.memory_space<vmem>>, vector<1x8x1024xbf16>
    %4 = vector.shape_cast %3 : vector<1x8x1024xbf16> to vector<8x1024xbf16>
    %c8 = arith.constant 8 : index
    %c0_5 = arith.constant 0 : index
    %5 = vector.load %arg11[%c8, %c0_5] : memref<216x1024xbf16, #tpu.memory_space<vmem>>, vector<8x1024xbf16>
    tpu.vector_store %arg11[%c8, %c0_5], %4 {strides = array<i32>} : memref<216x1024xbf16, #tpu.memory_space<vmem>>, vector<8x1024xbf16>,
    %c0_6 = arith.constant 0 : index
    %c0_7 = arith.constant 0 : index
    %c19 = arith.constant 19 : index
    %6 = vector.load %arg1[%c0_6, %c0_7, %c19] : memref<1x8x1280xbf16, #tpu.memory_space<vmem>>, vector<1x8x1024xbf16>
    %7 = vector.shape_cast %6 : vector<1x8x1024xbf16> to vector<8x1024xbf16>
    %c16 = arith.constant 16 : index
    %c0_8 = arith.constant 0 : index
    %8 = vector.load %arg11[%c16, %c0_8] : memref<216x1024xbf16, #tpu.memory_space<vmem>>, vector<8x1024xbf16>
    tpu.vector_store %arg11[%c16, %c0_8], %7 {strides = array<i32>} : memref<216x1024xbf16, #tpu.memory_space<vmem>>, vector<8x1024xbf16>,
    %c0_9 = arith.constant 0 : index
    %c0_10 = arith.constant 0 : index
    %c27 = arith.constant 27 : index
    %9 = vector.load %arg1[%c0_9, %c0_10, %c27] : memref<1x8x1280xbf16, #tpu.memory_space<vmem>>, vector<1x8x1024xbf16>
    %10 = vector.shape_cast %9 : vector<1x8x1024xbf16> to vector<8x1024xbf16>
    %c24 = arith.constant 24 : index
    %c0_11 = arith.constant 0 : index
    %11 = vector.load %arg11[%c24, %c0_11] : memref<216x1024xbf16, #tpu.memory_space<vmem>>, vector<8x1024xbf16>
    tpu.vector_store %arg11[%c24, %c0_11], %10 {strides = array<i32>} : memref<216x1024xbf16, #tpu.memory_space<vmem>>, vector<8x1024xbf16>,
    %c0_12 = arith.constant 0 : index
    %c0_13 = arith.constant 0 : index
    %c28 = arith.constant 28 : index
    %12 = vector.load %arg1[%c0_12, %c0_13, %c28] : memref<1x8x1280xbf16, #tpu.memory_space<vmem>>, vector<1x8x1024xbf16>
    %13 = vector.shape_cast %12 : vector<1x8x1024xbf16> to vector<8x1024xbf16>
    %c32 = arith.constant 32 : index
    %c0_14 = arith.constant 0 : index
    %14 = vector.load %arg11[%c32, %c0_14] : memref<216x1024xbf16, #tpu.memory_space<vmem>>, vector<8x1024xbf16>
    tpu.vector_store %arg11[%c32, %c0_14], %13 {strides = array<i32>} : memref<216x1024xbf16, #tpu.memory_space<vmem>>, vector<8x1024xbf16>,
    %c0_15 = arith.constant 0 : index
    %c0_16 = arith.constant 0 : index
    %c29 = arith.constant 29 : index
    %15 = vector.load %arg1[%c0_15, %c0_16, %c29] : memref<1x8x1280xbf16, #tpu.memory_space<vmem>>, vector<1x8x1024xbf16>
    %16 = vector.shape_cast %15 : vector<1x8x1024xbf16> to vector<8x1024xbf16>
    %c40 = arith.constant 40 : index
    %c0_17 = arith.constant 0 : index
    %17 = vector.load %arg11[%c40, %c0_17] : memref<216x1024xbf16, #tpu.memory_space<vmem>>, vector<8x1024xbf16>
    tpu.vector_store %arg11[%c40, %c0_17], %16 {strides = array<i32>} : memref<216x1024xbf16, #tpu.memory_space<vmem>>, vector<8x1024xbf16>,
    %c0_18 = arith.constant 0 : index
    %c0_19 = arith.constant 0 : index
    %c37 = arith.constant 37 : index
    %18 = vector.load %arg1[%c0_18, %c0_19, %c37] : memref<1x8x1280xbf16, #tpu.memory_space<vmem>>, vector<1x8x1024xbf16>
    %19 = vector.shape_cast %18 : vector<1x8x1024xbf16> to vector<8x1024xbf16>
    %c48 = arith.constant 48 : index
    %c0_20 = arith.constant 0 : index
    %20 = vector.load %arg11[%c48, %c0_20] : memref<216x1024xbf16, #tpu.memory_space<vmem>>, vector<8x1024xbf16>
    tpu.vector_store %arg11[%c48, %c0_20], %19 {strides = array<i32>} : memref<216x1024xbf16, #tpu.memory_space<vmem>>, vector<8x1024xbf16>,
    %c0_21 = arith.constant 0 : index
    %c0_22 = arith.constant 0 : index
    %c38 = arith.constant 38 : index
    %21 = vector.load %arg1[%c0_21, %c0_22, %c38] : memref<1x8x1280xbf16, #tpu.memory_space<vmem>>, vector<1x8x1024xbf16>
    %22 = vector.shape_cast %21 : vector<1x8x1024xbf16> to vector<8x1024xbf16>
    %c56 = arith.constant 56 : index
    %c0_23 = arith.constant 0 : index
    %23 = vector.load %arg11[%c56, %c0_23] : memref<216x1024xbf16, #tpu.memory_space<vmem>>, vector<8x1024xbf16>
    tpu.vector_store %arg11[%c56, %c0_23], %22 {strides = array<i32>} : memref<216x1024xbf16, #tpu.memory_space<vmem>>, vector<8x1024xbf16>,
    %c0_24 = arith.constant 0 : index
    %c0_25 = arith.constant 0 : index
    %c39 = arith.constant 39 : index
    %24 = vector.load %arg1[%c0_24, %c0_25, %c39] : memref<1x8x1280xbf16, #tpu.memory_space<vmem>>, vector<1x8x1024xbf16>
    %25 = vector.shape_cast %24 : vector<1x8x1024xbf16> to vector<8x1024xbf16>
    %c64 = arith.constant 64 : index
    %c0_26 = arith.constant 0 : index
    %26 = vector.load %arg11[%c64, %c0_26] : memref<216x1024xbf16, #tpu.memory_space<vmem>>, vector<8x1024xbf16>
    tpu.vector_store %arg11[%c64, %c0_26], %25 {strides = array<i32>} : memref<216x1024xbf16, #tpu.memory_space<vmem>>, vector<8x1024xbf16>,
    %c0_27 = arith.constant 0 : index
    %c0_28 = arith.constant 0 : index
    %c117 = arith.constant 117 : index
    %27 = vector.load %arg1[%c0_27, %c0_28, %c117] : memref<1x8x1280xbf16, #tpu.memory_space<vmem>>, vector<1x8x1024xbf16>
    %28 = vector.shape_cast %27 : vector<1x8x1024xbf16> to vector<8x1024xbf16>
    %c72 = arith.constant 72 : index
    %c0_29 = arith.constant 0 : index
    %29 = vector.load %arg11[%c72, %c0_29] : memref<216x1024xbf16, #tpu.memory_space<vmem>>, vector<8x1024xbf16>
    tpu.vector_store %arg11[%c72, %c0_29], %28 {strides = array<i32>} : memref<216x1024xbf16, #tpu.memory_space<vmem>>, vector<8x1024xbf16>,
    %c0_30 = arith.constant 0 : index
    %c0_31 = arith.constant 0 : index
    %c118 = arith.constant 118 : index
    %30 = vector.load %arg1[%c0_30, %c0_31, %c118] : memref<1x8x1280xbf16, #tpu.memory_space<vmem>>, vector<1x8x1024xbf16>
    %31 = vector.shape_cast %30 : vector<1x8x1024xbf16> to vector<8x1024xbf16>
    %c80 = arith.constant 80 : index
    %c0_32 = arith.constant 0 : index
    %32 = vector.load %arg11[%c80, %c0_32] : memref<216x1024xbf16, #tpu.memory_space<vmem>>, vector<8x1024xbf16>
    tpu.vector_store %arg11[%c80, %c0_32], %31 {strides = array<i32>} : memref<216x1024xbf16, #tpu.memory_space<vmem>>, vector<8x1024xbf16>,
    %c0_33 = arith.constant 0 : index
    %c0_34 = arith.constant 0 : index
    %c119 = arith.constant 119 : index
    %33 = vector.load %arg1[%c0_33, %c0_34, %c119] : memref<1x8x1280xbf16, #tpu.memory_space<vmem>>, vector<1x8x1024xbf16>
    %34 = vector.shape_cast %33 : vector<1x8x1024xbf16> to vector<8x1024xbf16>
    %c88 = arith.constant 88 : index
    %c0_35 = arith.constant 0 : index
    %35 = vector.load %arg11[%c88, %c0_35] : memref<216x1024xbf16, #tpu.memory_space<vmem>>, vector<8x1024xbf16>
    tpu.vector_store %arg11[%c88, %c0_35], %34 {strides = array<i32>} : memref<216x1024xbf16, #tpu.memory_space<vmem>>, vector<8x1024xbf16>,
    %c0_36 = arith.constant 0 : index
    %c0_37 = arith.constant 0 : index
    %c127 = arith.constant 127 : index
    %36 = vector.load %arg1[%c0_36, %c0_37, %c127] : memref<1x8x1280xbf16, #tpu.memory_space<vmem>>, vector<1x8x1024xbf16>
    %37 = vector.shape_cast %36 : vector<1x8x1024xbf16> to vector<8x1024xbf16>
    %c96 = arith.constant 96 : index
    %c0_38 = arith.constant 0 : index
    %38 = vector.load %arg11[%c96, %c0_38] : memref<216x1024xbf16, #tpu.memory_space<vmem>>, vector<8x1024xbf16>
    tpu.vector_store %arg11[%c96, %c0_38], %37 {strides = array<i32>} : memref<216x1024xbf16, #tpu.memory_space<vmem>>, vector<8x1024xbf16>,
    %c0_39 = arith.constant 0 : index
    %c0_40 = arith.constant 0 : index
    %c128 = arith.constant 128 : index
    %39 = vector.load %arg1[%c0_39, %c0_40, %c128] : memref<1x8x1280xbf16, #tpu.memory_space<vmem>>, vector<1x8x1024xbf16>
    %40 = vector.shape_cast %39 : vector<1x8x1024xbf16> to vector<8x1024xbf16>
    %c104 = arith.constant 104 : index
    %c0_41 = arith.constant 0 : index
    %41 = vector.load %arg11[%c104, %c0_41] : memref<216x1024xbf16, #tpu.memory_space<vmem>>, vector<8x1024xbf16>
    tpu.vector_store %arg11[%c104, %c0_41], %40 {strides = array<i32>} : memref<216x1024xbf16, #tpu.memory_space<vmem>>, vector<8x1024xbf16>,
    %c0_42 = arith.constant 0 : index
    %c0_43 = arith.constant 0 : index
    %c129 = arith.constant 129 : index
    %42 = vector.load %arg1[%c0_42, %c0_43, %c129] : memref<1x8x1280xbf16, #tpu.memory_space<vmem>>, vector<1x8x1024xbf16>
    %43 = vector.shape_cast %42 : vector<1x8x1024xbf16> to vector<8x1024xbf16>
    %c112 = arith.constant 112 : index
    %c0_44 = arith.constant 0 : index
    %44 = vector.load %arg11[%c112, %c0_44] : memref<216x1024xbf16, #tpu.memory_space<vmem>>, vector<8x1024xbf16>
    tpu.vector_store %arg11[%c112, %c0_44], %43 {strides = array<i32>} : memref<216x1024xbf16, #tpu.memory_space<vmem>>, vector<8x1024xbf16>,
    %c0_45 = arith.constant 0 : index
    %c0_46 = arith.constant 0 : index
    %c137 = arith.constant 137 : index
    %45 = vector.load %arg1[%c0_45, %c0_46, %c137] : memref<1x8x1280xbf16, #tpu.memory_space<vmem>>, vector<1x8x1024xbf16>
    %46 = vector.shape_cast %45 : vector<1x8x1024xbf16> to vector<8x1024xbf16>
    %c120 = arith.constant 120 : index
    %c0_47 = arith.constant 0 : index
    %47 = vector.load %arg11[%c120, %c0_47] : memref<216x1024xbf16, #tpu.memory_space<vmem>>, vector<8x1024xbf16>
    tpu.vector_store %arg11[%c120, %c0_47], %46 {strides = array<i32>} : memref<216x1024xbf16, #tpu.memory_space<vmem>>, vector<8x1024xbf16>,
    %c0_48 = arith.constant 0 : index
    %c0_49 = arith.constant 0 : index
    %c138 = arith.constant 138 : index
    %48 = vector.load %arg1[%c0_48, %c0_49, %c138] : memref<1x8x1280xbf16, #tpu.memory_space<vmem>>, vector<1x8x1024xbf16>
    %49 = vector.shape_cast %48 : vector<1x8x1024xbf16> to vector<8x1024xbf16>
    %c128_50 = arith.constant 128 : index
    %c0_51 = arith.constant 0 : index
    %50 = vector.load %arg11[%c128_50, %c0_51] : memref<216x1024xbf16, #tpu.memory_space<vmem>>, vector<8x1024xbf16>
    tpu.vector_store %arg11[%c128_50, %c0_51], %49 {strides = array<i32>} : memref<216x1024xbf16, #tpu.memory_space<vmem>>, vector<8x1024xbf16>,
    %c0_52 = arith.constant 0 : index
    %c0_53 = arith.constant 0 : index
    %c139 = arith.constant 139 : index
    %51 = vector.load %arg1[%c0_52, %c0_53, %c139] : memref<1x8x1280xbf16, #tpu.memory_space<vmem>>, vector<1x8x1024xbf16>
    %52 = vector.shape_cast %51 : vector<1x8x1024xbf16> to vector<8x1024xbf16>
    %c136 = arith.constant 136 : index
    %c0_54 = arith.constant 0 : index
    %53 = vector.load %arg11[%c136, %c0_54] : memref<216x1024xbf16, #tpu.memory_space<vmem>>, vector<8x1024xbf16>
    tpu.vector_store %arg11[%c136, %c0_54], %52 {strides = array<i32>} : memref<216x1024xbf16, #tpu.memory_space<vmem>>, vector<8x1024xbf16>,
    %c0_55 = arith.constant 0 : index
    %c0_56 = arith.constant 0 : index
    %c217 = arith.constant 217 : index
    %54 = vector.load %arg1[%c0_55, %c0_56, %c217] : memref<1x8x1280xbf16, #tpu.memory_space<vmem>>, vector<1x8x1024xbf16>
    %55 = vector.shape_cast %54 : vector<1x8x1024xbf16> to vector<8x1024xbf16>
    %c144 = arith.constant 144 : index
    %c0_57 = arith.constant 0 : index
    %56 = vector.load %arg11[%c144, %c0_57] : memref<216x1024xbf16, #tpu.memory_space<vmem>>, vector<8x1024xbf16>
    tpu.vector_store %arg11[%c144, %c0_57], %55 {strides = array<i32>} : memref<216x1024xbf16, #tpu.memory_space<vmem>>, vector<8x1024xbf16>,
    %c0_58 = arith.constant 0 : index
    %c0_59 = arith.constant 0 : index
    %c218 = arith.constant 218 : index
    %57 = vector.load %arg1[%c0_58, %c0_59, %c218] : memref<1x8x1280xbf16, #tpu.memory_space<vmem>>, vector<1x8x1024xbf16>
    %58 = vector.shape_cast %57 : vector<1x8x1024xbf16> to vector<8x1024xbf16>
    %c152 = arith.constant 152 : index
    %c0_60 = arith.constant 0 : index
    %59 = vector.load %arg11[%c152, %c0_60] : memref<216x1024xbf16, #tpu.memory_space<vmem>>, vector<8x1024xbf16>
    tpu.vector_store %arg11[%c152, %c0_60], %58 {strides = array<i32>} : memref<216x1024xbf16, #tpu.memory_space<vmem>>, vector<8x1024xbf16>,
    %c0_61 = arith.constant 0 : index
    %c0_62 = arith.constant 0 : index
    %c219 = arith.constant 219 : index
    %60 = vector.load %arg1[%c0_61, %c0_62, %c219] : memref<1x8x1280xbf16, #tpu.memory_space<vmem>>, vector<1x8x1024xbf16>
    %61 = vector.shape_cast %60 : vector<1x8x1024xbf16> to vector<8x1024xbf16>
    %c160 = arith.constant 160 : index
    %c0_63 = arith.constant 0 : index
    %62 = vector.load %arg11[%c160, %c0_63] : memref<216x1024xbf16, #tpu.memory_space<vmem>>, vector<8x1024xbf16>
    tpu.vector_store %arg11[%c160, %c0_63], %61 {strides = array<i32>} : memref<216x1024xbf16, #tpu.memory_space<vmem>>, vector<8x1024xbf16>,
    %c0_64 = arith.constant 0 : index
    %c0_65 = arith.constant 0 : index
    %c227 = arith.constant 227 : index
    %63 = vector.load %arg1[%c0_64, %c0_65, %c227] : memref<1x8x1280xbf16, #tpu.memory_space<vmem>>, vector<1x8x1024xbf16>
    %64 = vector.shape_cast %63 : vector<1x8x1024xbf16> to vector<8x1024xbf16>
    %c168 = arith.constant 168 : index
    %c0_66 = arith.constant 0 : index
    %65 = vector.load %arg11[%c168, %c0_66] : memref<216x1024xbf16, #tpu.memory_space<vmem>>, vector<8x1024xbf16>
    tpu.vector_store %arg11[%c168, %c0_66], %64 {strides = array<i32>} : memref<216x1024xbf16, #tpu.memory_space<vmem>>, vector<8x1024xbf16>,
    %c0_67 = arith.constant 0 : index
    %c0_68 = arith.constant 0 : index
    %c228 = arith.constant 228 : index
    %66 = vector.load %arg1[%c0_67, %c0_68, %c228] : memref<1x8x1280xbf16, #tpu.memory_space<vmem>>, vector<1x8x1024xbf16>
    %67 = vector.shape_cast %66 : vector<1x8x1024xbf16> to vector<8x1024xbf16>
    %c176 = arith.constant 176 : index
    %c0_69 = arith.constant 0 : index
    %68 = vector.load %arg11[%c176, %c0_69] : memref<216x1024xbf16, #tpu.memory_space<vmem>>, vector<8x1024xbf16>
    tpu.vector_store %arg11[%c176, %c0_69], %67 {strides = array<i32>} : memref<216x1024xbf16, #tpu.memory_space<vmem>>, vector<8x1024xbf16>,
    %c0_70 = arith.constant 0 : index
    %c0_71 = arith.constant 0 : index
    %c229 = arith.constant 229 : index
    %69 = vector.load %arg1[%c0_70, %c0_71, %c229] : memref<1x8x1280xbf16, #tpu.memory_space<vmem>>, vector<1x8x1024xbf16>
    %70 = vector.shape_cast %69 : vector<1x8x1024xbf16> to vector<8x1024xbf16>
    %c184 = arith.constant 184 : index
    %c0_72 = arith.constant 0 : index
    %71 = vector.load %arg11[%c184, %c0_72] : memref<216x1024xbf16, #tpu.memory_space<vmem>>, vector<8x1024xbf16>
    tpu.vector_store %arg11[%c184, %c0_72], %70 {strides = array<i32>} : memref<216x1024xbf16, #tpu.memory_space<vmem>>, vector<8x1024xbf16>,
    %c0_73 = arith.constant 0 : index
    %c0_74 = arith.constant 0 : index
    %c237 = arith.constant 237 : index
    %72 = vector.load %arg1[%c0_73, %c0_74, %c237] : memref<1x8x1280xbf16, #tpu.memory_space<vmem>>, vector<1x8x1024xbf16>
    %73 = vector.shape_cast %72 : vector<1x8x1024xbf16> to vector<8x1024xbf16>
    %c192 = arith.constant 192 : index
    %c0_75 = arith.constant 0 : index
    %74 = vector.load %arg11[%c192, %c0_75] : memref<216x1024xbf16, #tpu.memory_space<vmem>>, vector<8x1024xbf16>
    tpu.vector_store %arg11[%c192, %c0_75], %73 {strides = array<i32>} : memref<216x1024xbf16, #tpu.memory_space<vmem>>, vector<8x1024xbf16>,
    %c0_76 = arith.constant 0 : index
    %c0_77 = arith.constant 0 : index
    %c238 = arith.constant 238 : index
    %75 = vector.load %arg1[%c0_76, %c0_77, %c238] : memref<1x8x1280xbf16, #tpu.memory_space<vmem>>, vector<1x8x1024xbf16>
    %76 = vector.shape_cast %75 : vector<1x8x1024xbf16> to vector<8x1024xbf16>
    %c200 = arith.constant 200 : index
    %c0_78 = arith.constant 0 : index
    %77 = vector.load %arg11[%c200, %c0_78] : memref<216x1024xbf16, #tpu.memory_space<vmem>>, vector<8x1024xbf16>
    tpu.vector_store %arg11[%c200, %c0_78], %76 {strides = array<i32>} : memref<216x1024xbf16, #tpu.memory_space<vmem>>, vector<8x1024xbf16>,
    %c0_79 = arith.constant 0 : index
    %c0_80 = arith.constant 0 : index
    %c239 = arith.constant 239 : index
    %78 = vector.load %arg1[%c0_79, %c0_80, %c239] : memref<1x8x1280xbf16, #tpu.memory_space<vmem>>, vector<1x8x1024xbf16>
    %79 = vector.shape_cast %78 : vector<1x8x1024xbf16> to vector<8x1024xbf16>
    %c208 = arith.constant 208 : index
    %c0_81 = arith.constant 0 : index
    %80 = vector.load %arg11[%c208, %c0_81] : memref<216x1024xbf16, #tpu.memory_space<vmem>>, vector<8x1024xbf16>
    tpu.vector_store %arg11[%c208, %c0_81], %79 {strides = array<i32>} : memref<216x1024xbf16, #tpu.memory_space<vmem>>, vector<8x1024xbf16>,
    %c0_82 = arith.constant 0 : index
    %c0_83 = arith.constant 0 : index
    %81 = vector.load %arg2[%c0_82, %c0_83] : memref<16x216xbf16, #tpu.memory_space<vmem>>, vector<16x216xbf16>
    %c0_84 = arith.constant 0 : index
    %c0_85 = arith.constant 0 : index
    %82 = vector.load %arg11[%c0_84, %c0_85] : memref<216x1024xbf16, #tpu.memory_space<vmem>>, vector<216x1024xbf16>
    %cst = arith.constant dense<0.000000e+00> : vector<16x1024xf32>
    %83 = tpu.matmul %81, %82, %cst {dimension_numbers = #tpu.dot_dimension_numbers<[1], [0], [0], [1], [0, 0, 1, 1], [], []>} : vector<16x216xbf16>, vector<216x1024xbf16>, vector<16x1024xf32> -> vector<16x1024xf32>
    %c0_86 = arith.constant 0 : index
    %c0_87 = arith.constant 0 : index
    %84 = vector.load %arg3[%c0_86, %c0_87] : memref<16x1xf32, #tpu.memory_space<vmem>>, vector<16x1xf32>
    %85 = vector.broadcast %84 : vector<16x1xf32> to vector<16x1024xf32>
    %86 = arith.mulf %83, %85 : vector<16x1024xf32>
    %c0_88 = arith.constant 0 : index
    %c0_89 = arith.constant 0 : index
    %87 = vector.load %arg4[%c0_88, %c0_89] : memref<16x1xf32, #tpu.memory_space<vmem>>, vector<16x1xf32>
    %88 = vector.broadcast %87 : vector<16x1xf32> to vector<16x1024xf32>
    %89 = arith.addf %86, %88 : vector<16x1024xf32>
    %90 = vector.extract_strided_slice %89 {offsets = [0, 0], sizes = [8, 1024], strides = [1, 1]} : vector<16x1024xf32> to vector<8x1024xf32>
    %cst_90 = arith.constant 0.000000e+00 : f32
    %91 = vector.broadcast %cst_90 : f32 to vector<8x1024xf32>
    %92 = arith.maximumf %90, %91 : vector<8x1024xf32>
    %c0_91 = arith.constant 0 : index
    %c0_92 = arith.constant 0 : index
    %93 = vector.load %arg8[%c0_91, %c0_92] : memref<1x1024xf32, #tpu.memory_space<vmem>>, vector<1x1024xf32>
    %94 = vector.broadcast %93 : vector<1x1024xf32> to vector<8x1024xf32>
    %95 = arith.mulf %92, %94 : vector<8x1024xf32>
    %96 = vector.extract_strided_slice %89 {offsets = [8, 0], sizes = [8, 1024], strides = [1, 1]} : vector<16x1024xf32> to vector<8x1024xf32>
    %cst_93 = arith.constant 0.000000e+00 : bf16
    %97 = vector.broadcast %cst_93 : bf16 to vector<8x128xbf16>
    %c0_94 = arith.constant 0 : index
    %c0_95 = arith.constant 0 : index
    %98 = vector.load %arg10[%c0_94, %c0_95] : memref<8x1280xbf16, #tpu.memory_space<vmem>>, vector<8x128xbf16>
    tpu.vector_store %arg10[%c0_94, %c0_95], %97 {strides = array<i32>} : memref<8x1280xbf16, #tpu.memory_space<vmem>>, vector<8x128xbf16>,
    %cst_96 = arith.constant 0.000000e+00 : bf16
    %99 = vector.broadcast %cst_96 : bf16 to vector<8x128xbf16>
    %c0_97 = arith.constant 0 : index
    %c1152 = arith.constant 1152 : index
    %100 = vector.load %arg10[%c0_97, %c1152] : memref<8x1280xbf16, #tpu.memory_space<vmem>>, vector<8x128xbf16>
    tpu.vector_store %arg10[%c0_97, %c1152], %99 {strides = array<i32>} : memref<8x1280xbf16, #tpu.memory_space<vmem>>, vector<8x128xbf16>,
    %101 = arith.truncf %95 : vector<8x1024xf32> to vector<8x1024xbf16>
    %c0_98 = arith.constant 0 : index
    %c128_99 = arith.constant 128 : index
    %102 = vector.load %arg10[%c0_98, %c128_99] : memref<8x1280xbf16, #tpu.memory_space<vmem>>, vector<8x1024xbf16>
    tpu.vector_store %arg10[%c0_98, %c128_99], %101 {strides = array<i32>} : memref<8x1280xbf16, #tpu.memory_space<vmem>>, vector<8x1024xbf16>,
    %c0_100 = arith.constant 0 : index
    %c17_101 = arith.constant 17 : index
    %103 = vector.load %arg10[%c0_100, %c17_101] : memref<8x1280xbf16, #tpu.memory_space<vmem>>, vector<8x1024xbf16>
    %c0_102 = arith.constant 0 : index
    %c0_103 = arith.constant 0 : index
    %104 = vector.load %arg12[%c0_102, %c0_103] : memref<216x1024xbf16, #tpu.memory_space<vmem>>, vector<8x1024xbf16>
    tpu.vector_store %arg12[%c0_102, %c0_103], %103 {strides = array<i32>} : memref<216x1024xbf16, #tpu.memory_space<vmem>>, vector<8x1024xbf16>,
    %c0_104 = arith.constant 0 : index
    %c18_105 = arith.constant 18 : index
    %105 = vector.load %arg10[%c0_104, %c18_105] : memref<8x1280xbf16, #tpu.memory_space<vmem>>, vector<8x1024xbf16>
    %c8_106 = arith.constant 8 : index
    %c0_107 = arith.constant 0 : index
    %106 = vector.load %arg12[%c8_106, %c0_107] : memref<216x1024xbf16, #tpu.memory_space<vmem>>, vector<8x1024xbf16>
    tpu.vector_store %arg12[%c8_106, %c0_107], %105 {strides = array<i32>} : memref<216x1024xbf16, #tpu.memory_space<vmem>>, vector<8x1024xbf16>,
    %c0_108 = arith.constant 0 : index
    %c19_109 = arith.constant 19 : index
    %107 = vector.load %arg10[%c0_108, %c19_109] : memref<8x1280xbf16, #tpu.memory_space<vmem>>, vector<8x1024xbf16>
    %c16_110 = arith.constant 16 : index
    %c0_111 = arith.constant 0 : index
    %108 = vector.load %arg12[%c16_110, %c0_111] : memref<216x1024xbf16, #tpu.memory_space<vmem>>, vector<8x1024xbf16>
    tpu.vector_store %arg12[%c16_110, %c0_111], %107 {strides = array<i32>} : memref<216x1024xbf16, #tpu.memory_space<vmem>>, vector<8x1024xbf16>,
    %c0_112 = arith.constant 0 : index
    %c27_113 = arith.constant 27 : index
    %109 = vector.load %arg10[%c0_112, %c27_113] : memref<8x1280xbf16, #tpu.memory_space<vmem>>, vector<8x1024xbf16>
    %c24_114 = arith.constant 24 : index
    %c0_115 = arith.constant 0 : index
    %110 = vector.load %arg12[%c24_114, %c0_115] : memref<216x1024xbf16, #tpu.memory_space<vmem>>, vector<8x1024xbf16>
    tpu.vector_store %arg12[%c24_114, %c0_115], %109 {strides = array<i32>} : memref<216x1024xbf16, #tpu.memory_space<vmem>>, vector<8x1024xbf16>,
    %c0_116 = arith.constant 0 : index
    %c28_117 = arith.constant 28 : index
    %111 = vector.load %arg10[%c0_116, %c28_117] : memref<8x1280xbf16, #tpu.memory_space<vmem>>, vector<8x1024xbf16>
    %c32_118 = arith.constant 32 : index
    %c0_119 = arith.constant 0 : index
    %112 = vector.load %arg12[%c32_118, %c0_119] : memref<216x1024xbf16, #tpu.memory_space<vmem>>, vector<8x1024xbf16>
    tpu.vector_store %arg12[%c32_118, %c0_119], %111 {strides = array<i32>} : memref<216x1024xbf16, #tpu.memory_space<vmem>>, vector<8x1024xbf16>,
    %c0_120 = arith.constant 0 : index
    %c29_121 = arith.constant 29 : index
    %113 = vector.load %arg10[%c0_120, %c29_121] : memref<8x1280xbf16, #tpu.memory_space<vmem>>, vector<8x1024xbf16>
    %c40_122 = arith.constant 40 : index
    %c0_123 = arith.constant 0 : index
    %114 = vector.load %arg12[%c40_122, %c0_123] : memref<216x1024xbf16, #tpu.memory_space<vmem>>, vector<8x1024xbf16>
    tpu.vector_store %arg12[%c40_122, %c0_123], %113 {strides = array<i32>} : memref<216x1024xbf16, #tpu.memory_space<vmem>>, vector<8x1024xbf16>,
    %c0_124 = arith.constant 0 : index
    %c37_125 = arith.constant 37 : index
    %115 = vector.load %arg10[%c0_124, %c37_125] : memref<8x1280xbf16, #tpu.memory_space<vmem>>, vector<8x1024xbf16>
    %c48_126 = arith.constant 48 : index
    %c0_127 = arith.constant 0 : index
    %116 = vector.load %arg12[%c48_126, %c0_127] : memref<216x1024xbf16, #tpu.memory_space<vmem>>, vector<8x1024xbf16>
    tpu.vector_store %arg12[%c48_126, %c0_127], %115 {strides = array<i32>} : memref<216x1024xbf16, #tpu.memory_space<vmem>>, vector<8x1024xbf16>,
    %c0_128 = arith.constant 0 : index
    %c38_129 = arith.constant 38 : index
    %117 = vector.load %arg10[%c0_128, %c38_129] : memref<8x1280xbf16, #tpu.memory_space<vmem>>, vector<8x1024xbf16>
    %c56_130 = arith.constant 56 : index
    %c0_131 = arith.constant 0 : index
    %118 = vector.load %arg12[%c56_130, %c0_131] : memref<216x1024xbf16, #tpu.memory_space<vmem>>, vector<8x1024xbf16>
    tpu.vector_store %arg12[%c56_130, %c0_131], %117 {strides = array<i32>} : memref<216x1024xbf16, #tpu.memory_space<vmem>>, vector<8x1024xbf16>,
    %c0_132 = arith.constant 0 : index
    %c39_133 = arith.constant 39 : index
    %119 = vector.load %arg10[%c0_132, %c39_133] : memref<8x1280xbf16, #tpu.memory_space<vmem>>, vector<8x1024xbf16>
    %c64_134 = arith.constant 64 : index
    %c0_135 = arith.constant 0 : index
    %120 = vector.load %arg12[%c64_134, %c0_135] : memref<216x1024xbf16, #tpu.memory_space<vmem>>, vector<8x1024xbf16>
    tpu.vector_store %arg12[%c64_134, %c0_135], %119 {strides = array<i32>} : memref<216x1024xbf16, #tpu.memory_space<vmem>>, vector<8x1024xbf16>,
    %c0_136 = arith.constant 0 : index
    %c117_137 = arith.constant 117 : index
    %121 = vector.load %arg10[%c0_136, %c117_137] : memref<8x1280xbf16, #tpu.memory_space<vmem>>, vector<8x1024xbf16>
    %c72_138 = arith.constant 72 : index
    %c0_139 = arith.constant 0 : index
    %122 = vector.load %arg12[%c72_138, %c0_139] : memref<216x1024xbf16, #tpu.memory_space<vmem>>, vector<8x1024xbf16>
    tpu.vector_store %arg12[%c72_138, %c0_139], %121 {strides = array<i32>} : memref<216x1024xbf16, #tpu.memory_space<vmem>>, vector<8x1024xbf16>,
    %c0_140 = arith.constant 0 : index
    %c118_141 = arith.constant 118 : index
    %123 = vector.load %arg10[%c0_140, %c118_141] : memref<8x1280xbf16, #tpu.memory_space<vmem>>, vector<8x1024xbf16>
    %c80_142 = arith.constant 80 : index
    %c0_143 = arith.constant 0 : index
    %124 = vector.load %arg12[%c80_142, %c0_143] : memref<216x1024xbf16, #tpu.memory_space<vmem>>, vector<8x1024xbf16>
    tpu.vector_store %arg12[%c80_142, %c0_143], %123 {strides = array<i32>} : memref<216x1024xbf16, #tpu.memory_space<vmem>>, vector<8x1024xbf16>,
    %c0_144 = arith.constant 0 : index
    %c119_145 = arith.constant 119 : index
    %125 = vector.load %arg10[%c0_144, %c119_145] : memref<8x1280xbf16, #tpu.memory_space<vmem>>, vector<8x1024xbf16>
    %c88_146 = arith.constant 88 : index
    %c0_147 = arith.constant 0 : index
    %126 = vector.load %arg12[%c88_146, %c0_147] : memref<216x1024xbf16, #tpu.memory_space<vmem>>, vector<8x1024xbf16>
    tpu.vector_store %arg12[%c88_146, %c0_147], %125 {strides = array<i32>} : memref<216x1024xbf16, #tpu.memory_space<vmem>>, vector<8x1024xbf16>,
    %c0_148 = arith.constant 0 : index
    %c127_149 = arith.constant 127 : index
    %127 = vector.load %arg10[%c0_148, %c127_149] : memref<8x1280xbf16, #tpu.memory_space<vmem>>, vector<8x1024xbf16>
    %c96_150 = arith.constant 96 : index
    %c0_151 = arith.constant 0 : index
    %128 = vector.load %arg12[%c96_150, %c0_151] : memref<216x1024xbf16, #tpu.memory_space<vmem>>, vector<8x1024xbf16>
    tpu.vector_store %arg12[%c96_150, %c0_151], %127 {strides = array<i32>} : memref<216x1024xbf16, #tpu.memory_space<vmem>>, vector<8x1024xbf16>,
    %c0_152 = arith.constant 0 : index
    %c128_153 = arith.constant 128 : index
    %129 = vector.load %arg10[%c0_152, %c128_153] : memref<8x1280xbf16, #tpu.memory_space<vmem>>, vector<8x1024xbf16>
    %c104_154 = arith.constant 104 : index
    %c0_155 = arith.constant 0 : index
    %130 = vector.load %arg12[%c104_154, %c0_155] : memref<216x1024xbf16, #tpu.memory_space<vmem>>, vector<8x1024xbf16>
    tpu.vector_store %arg12[%c104_154, %c0_155], %129 {strides = array<i32>} : memref<216x1024xbf16, #tpu.memory_space<vmem>>, vector<8x1024xbf16>,
    %c0_156 = arith.constant 0 : index
    %c129_157 = arith.constant 129 : index
    %131 = vector.load %arg10[%c0_156, %c129_157] : memref<8x1280xbf16, #tpu.memory_space<vmem>>, vector<8x1024xbf16>
    %c112_158 = arith.constant 112 : index
    %c0_159 = arith.constant 0 : index
    %132 = vector.load %arg12[%c112_158, %c0_159] : memref<216x1024xbf16, #tpu.memory_space<vmem>>, vector<8x1024xbf16>
    tpu.vector_store %arg12[%c112_158, %c0_159], %131 {strides = array<i32>} : memref<216x1024xbf16, #tpu.memory_space<vmem>>, vector<8x1024xbf16>,
    %c0_160 = arith.constant 0 : index
    %c137_161 = arith.constant 137 : index
    %133 = vector.load %arg10[%c0_160, %c137_161] : memref<8x1280xbf16, #tpu.memory_space<vmem>>, vector<8x1024xbf16>
    %c120_162 = arith.constant 120 : index
    %c0_163 = arith.constant 0 : index
    %134 = vector.load %arg12[%c120_162, %c0_163] : memref<216x1024xbf16, #tpu.memory_space<vmem>>, vector<8x1024xbf16>
    tpu.vector_store %arg12[%c120_162, %c0_163], %133 {strides = array<i32>} : memref<216x1024xbf16, #tpu.memory_space<vmem>>, vector<8x1024xbf16>,
    %c0_164 = arith.constant 0 : index
    %c138_165 = arith.constant 138 : index
    %135 = vector.load %arg10[%c0_164, %c138_165] : memref<8x1280xbf16, #tpu.memory_space<vmem>>, vector<8x1024xbf16>
    %c128_166 = arith.constant 128 : index
    %c0_167 = arith.constant 0 : index
    %136 = vector.load %arg12[%c128_166, %c0_167] : memref<216x1024xbf16, #tpu.memory_space<vmem>>, vector<8x1024xbf16>
    tpu.vector_store %arg12[%c128_166, %c0_167], %135 {strides = array<i32>} : memref<216x1024xbf16, #tpu.memory_space<vmem>>, vector<8x1024xbf16>,
    %c0_168 = arith.constant 0 : index
    %c139_169 = arith.constant 139 : index
    %137 = vector.load %arg10[%c0_168, %c139_169] : memref<8x1280xbf16, #tpu.memory_space<vmem>>, vector<8x1024xbf16>
    %c136_170 = arith.constant 136 : index
    %c0_171 = arith.constant 0 : index
    %138 = vector.load %arg12[%c136_170, %c0_171] : memref<216x1024xbf16, #tpu.memory_space<vmem>>, vector<8x1024xbf16>
    tpu.vector_store %arg12[%c136_170, %c0_171], %137 {strides = array<i32>} : memref<216x1024xbf16, #tpu.memory_space<vmem>>, vector<8x1024xbf16>,
    %c0_172 = arith.constant 0 : index
    %c217_173 = arith.constant 217 : index
    %139 = vector.load %arg10[%c0_172, %c217_173] : memref<8x1280xbf16, #tpu.memory_space<vmem>>, vector<8x1024xbf16>
    %c144_174 = arith.constant 144 : index
    %c0_175 = arith.constant 0 : index
    %140 = vector.load %arg12[%c144_174, %c0_175] : memref<216x1024xbf16, #tpu.memory_space<vmem>>, vector<8x1024xbf16>
    tpu.vector_store %arg12[%c144_174, %c0_175], %139 {strides = array<i32>} : memref<216x1024xbf16, #tpu.memory_space<vmem>>, vector<8x1024xbf16>,
    %c0_176 = arith.constant 0 : index
    %c218_177 = arith.constant 218 : index
    %141 = vector.load %arg10[%c0_176, %c218_177] : memref<8x1280xbf16, #tpu.memory_space<vmem>>, vector<8x1024xbf16>
    %c152_178 = arith.constant 152 : index
    %c0_179 = arith.constant 0 : index
    %142 = vector.load %arg12[%c152_178, %c0_179] : memref<216x1024xbf16, #tpu.memory_space<vmem>>, vector<8x1024xbf16>
    tpu.vector_store %arg12[%c152_178, %c0_179], %141 {strides = array<i32>} : memref<216x1024xbf16, #tpu.memory_space<vmem>>, vector<8x1024xbf16>,
    %c0_180 = arith.constant 0 : index
    %c219_181 = arith.constant 219 : index
    %143 = vector.load %arg10[%c0_180, %c219_181] : memref<8x1280xbf16, #tpu.memory_space<vmem>>, vector<8x1024xbf16>
    %c160_182 = arith.constant 160 : index
    %c0_183 = arith.constant 0 : index
    %144 = vector.load %arg12[%c160_182, %c0_183] : memref<216x1024xbf16, #tpu.memory_space<vmem>>, vector<8x1024xbf16>
    tpu.vector_store %arg12[%c160_182, %c0_183], %143 {strides = array<i32>} : memref<216x1024xbf16, #tpu.memory_space<vmem>>, vector<8x1024xbf16>,
    %c0_184 = arith.constant 0 : index
    %c227_185 = arith.constant 227 : index
    %145 = vector.load %arg10[%c0_184, %c227_185] : memref<8x1280xbf16, #tpu.memory_space<vmem>>, vector<8x1024xbf16>
    %c168_186 = arith.constant 168 : index
    %c0_187 = arith.constant 0 : index
    %146 = vector.load %arg12[%c168_186, %c0_187] : memref<216x1024xbf16, #tpu.memory_space<vmem>>, vector<8x1024xbf16>
    tpu.vector_store %arg12[%c168_186, %c0_187], %145 {strides = array<i32>} : memref<216x1024xbf16, #tpu.memory_space<vmem>>, vector<8x1024xbf16>,
    %c0_188 = arith.constant 0 : index
    %c228_189 = arith.constant 228 : index
    %147 = vector.load %arg10[%c0_188, %c228_189] : memref<8x1280xbf16, #tpu.memory_space<vmem>>, vector<8x1024xbf16>
    %c176_190 = arith.constant 176 : index
    %c0_191 = arith.constant 0 : index
    %148 = vector.load %arg12[%c176_190, %c0_191] : memref<216x1024xbf16, #tpu.memory_space<vmem>>, vector<8x1024xbf16>
    tpu.vector_store %arg12[%c176_190, %c0_191], %147 {strides = array<i32>} : memref<216x1024xbf16, #tpu.memory_space<vmem>>, vector<8x1024xbf16>,
    %c0_192 = arith.constant 0 : index
    %c229_193 = arith.constant 229 : index
    %149 = vector.load %arg10[%c0_192, %c229_193] : memref<8x1280xbf16, #tpu.memory_space<vmem>>, vector<8x1024xbf16>
    %c184_194 = arith.constant 184 : index
    %c0_195 = arith.constant 0 : index
    %150 = vector.load %arg12[%c184_194, %c0_195] : memref<216x1024xbf16, #tpu.memory_space<vmem>>, vector<8x1024xbf16>
    tpu.vector_store %arg12[%c184_194, %c0_195], %149 {strides = array<i32>} : memref<216x1024xbf16, #tpu.memory_space<vmem>>, vector<8x1024xbf16>,
    %c0_196 = arith.constant 0 : index
    %c237_197 = arith.constant 237 : index
    %151 = vector.load %arg10[%c0_196, %c237_197] : memref<8x1280xbf16, #tpu.memory_space<vmem>>, vector<8x1024xbf16>
    %c192_198 = arith.constant 192 : index
    %c0_199 = arith.constant 0 : index
    %152 = vector.load %arg12[%c192_198, %c0_199] : memref<216x1024xbf16, #tpu.memory_space<vmem>>, vector<8x1024xbf16>
    tpu.vector_store %arg12[%c192_198, %c0_199], %151 {strides = array<i32>} : memref<216x1024xbf16, #tpu.memory_space<vmem>>, vector<8x1024xbf16>,
    %c0_200 = arith.constant 0 : index
    %c238_201 = arith.constant 238 : index
    %153 = vector.load %arg10[%c0_200, %c238_201] : memref<8x1280xbf16, #tpu.memory_space<vmem>>, vector<8x1024xbf16>
    %c200_202 = arith.constant 200 : index
    %c0_203 = arith.constant 0 : index
    %154 = vector.load %arg12[%c200_202, %c0_203] : memref<216x1024xbf16, #tpu.memory_space<vmem>>, vector<8x1024xbf16>
    tpu.vector_store %arg12[%c200_202, %c0_203], %153 {strides = array<i32>} : memref<216x1024xbf16, #tpu.memory_space<vmem>>, vector<8x1024xbf16>,
    %c0_204 = arith.constant 0 : index
    %c239_205 = arith.constant 239 : index
    %155 = vector.load %arg10[%c0_204, %c239_205] : memref<8x1280xbf16, #tpu.memory_space<vmem>>, vector<8x1024xbf16>
    %c208_206 = arith.constant 208 : index
    %c0_207 = arith.constant 0 : index
    %156 = vector.load %arg12[%c208_206, %c0_207] : memref<216x1024xbf16, #tpu.memory_space<vmem>>, vector<8x1024xbf16>
    tpu.vector_store %arg12[%c208_206, %c0_207], %155 {strides = array<i32>} : memref<216x1024xbf16, #tpu.memory_space<vmem>>, vector<8x1024xbf16>,
    %c0_208 = arith.constant 0 : index
    %c0_209 = arith.constant 0 : index
    %157 = vector.load %arg5[%c0_208, %c0_209] : memref<8x216xbf16, #tpu.memory_space<vmem>>, vector<8x216xbf16>
    %c0_210 = arith.constant 0 : index
    %c0_211 = arith.constant 0 : index
    %158 = vector.load %arg12[%c0_210, %c0_211] : memref<216x1024xbf16, #tpu.memory_space<vmem>>, vector<216x1024xbf16>
    %cst_212 = arith.constant dense<0.000000e+00> : vector<8x1024xf32>
    %159 = tpu.matmul %157, %158, %cst_212 {dimension_numbers = #tpu.dot_dimension_numbers<[1], [0], [0], [1], [0, 0, 1, 1], [], []>} : vector<8x216xbf16>, vector<216x1024xbf16>, vector<8x1024xf32> -> vector<8x1024xf32>
    %c0_213 = arith.constant 0 : index
    %c0_214 = arith.constant 0 : index
    %160 = vector.load %arg6[%c0_213, %c0_214] : memref<8x1xf32, #tpu.memory_space<vmem>>, vector<8x1xf32>
    %161 = vector.broadcast %160 : vector<8x1xf32> to vector<8x1024xf32>
    %162 = arith.mulf %159, %161 : vector<8x1024xf32>
    %c0_215 = arith.constant 0 : index
    %c0_216 = arith.constant 0 : index
    %163 = vector.load %arg7[%c0_215, %c0_216] : memref<8x1xf32, #tpu.memory_space<vmem>>, vector<8x1xf32>
    %164 = vector.broadcast %163 : vector<8x1xf32> to vector<8x1024xf32>
    %165 = arith.addf %162, %164 : vector<8x1024xf32>
    %166 = arith.addf %165, %96 : vector<8x1024xf32>
    %cst_217 = arith.constant 0.000000e+00 : f32
    %167 = vector.broadcast %cst_217 : f32 to vector<8x1024xf32>
    %168 = arith.maximumf %166, %167 : vector<8x1024xf32>
    %c0_218 = arith.constant 0 : index
    %c0_219 = arith.constant 0 : index
    %c0_220 = arith.constant 0 : index
    %169 = vector.load %arg9[%c0_218, %c0_219, %c0_220] : memref<1x8x1024xf32, #tpu.memory_space<vmem>>, vector<1x8x1024xf32>
    %170 = vector.shape_cast %169 : vector<1x8x1024xf32> to vector<8x1024xf32>
    %171 = vector.shape_cast %168 : vector<8x1024xf32> to vector<1x8x1024xf32>
    tpu.vector_store %arg9[%c0_218, %c0_219, %c0_220], %171 {strides = array<i32>} : memref<1x8x1024xf32, #tpu.memory_space<vmem>>, vector<1x8x1024xf32>,
    return
  }
  func.func @transform_0(%arg0: i32) -> (i32, i32, i32) {
    %c0_i32 = arith.constant 0 : i32
    %c0_i32_0 = arith.constant 0 : i32
    %c0_i32_1 = arith.constant 0 : i32
    return %arg0, %c0_i32, %c0_i32_0 : i32, i32, i32
  }
  func.func @transform_1(%arg0: i32) -> (i32, i32) {
    %c0_i32 = arith.constant 0 : i32
    %c0_i32_0 = arith.constant 0 : i32
    %c0_i32_1 = arith.constant 0 : i32
    return %c0_i32, %c0_i32_0 : i32, i32
  }
  func.func @transform_2(%arg0: i32) -> (i32, i32) {
    %c0_i32 = arith.constant 0 : i32
    %c0_i32_0 = arith.constant 0 : i32
    %c0_i32_1 = arith.constant 0 : i32
    return %c0_i32, %c0_i32_0 : i32, i32
  }
  func.func @transform_3(%arg0: i32) -> (i32, i32) {
    %c0_i32 = arith.constant 0 : i32
    %c0_i32_0 = arith.constant 0 : i32
    %c0_i32_1 = arith.constant 0 : i32
    return %c0_i32, %c0_i32_0 : i32, i32
  }
  func.func @transform_4(%arg0: i32) -> (i32, i32) {
    %c0_i32 = arith.constant 0 : i32
    %c0_i32_0 = arith.constant 0 : i32
    %c0_i32_1 = arith.constant 0 : i32
    return %c0_i32, %c0_i32_0 : i32, i32
  }
  func.func @transform_5(%arg0: i32) -> (i32, i32) {
    %c0_i32 = arith.constant 0 : i32
    %c0_i32_0 = arith.constant 0 : i32
    %c0_i32_1 = arith.constant 0 : i32
    return %c0_i32, %c0_i32_0 : i32, i32
  }
  func.func @transform_6(%arg0: i32) -> (i32, i32) {
    %c0_i32 = arith.constant 0 : i32
    %c0_i32_0 = arith.constant 0 : i32
    %c0_i32_1 = arith.constant 0 : i32
    return %c0_i32, %c0_i32_0 : i32, i32
  }
  func.func @transform_7(%arg0: i32) -> (i32, i32) {
    %c0_i32 = arith.constant 0 : i32
    %c0_i32_0 = arith.constant 0 : i32
    %c0_i32_1 = arith.constant 0 : i32
    return %c0_i32, %c0_i32_0 : i32, i32
  }
  func.func @transform_8(%arg0: i32) -> (i32, i32, i32) {
    %c0_i32 = arith.constant 0 : i32
    %c0_i32_0 = arith.constant 0 : i32
    %c0_i32_1 = arith.constant 0 : i32
    return %arg0, %c0_i32, %c0_i32_0 : i32, i32, i32
  }
}

</mosaic_0001>

<bundles_post_ra>
// kernel: tpu_custom_call.1
= control target key start
LH: loop header
LB: loop body
LE: loop exit
PB: predicated region body
PF: predicated region fallthrough
CT: control target
= control target key end

     0   :  { %s7020_s0 = inlined_call_operand.hbm [shape: bf16[2,8,1280], index: 0, kind: input, shape index: {}]   ;;  %s7021_s1 = inlined_call_operand.vmem [shape: bf16[16,216], index: 1, kind: input, shape index: {}]   ;;  %s7022_s2 = inlined_call_operand.vmem [shape: f32[16,1], index: 2, kind: input, shape index: {}]   ;;  %s7023_s3 = inlined_call_operand.vmem [shape: f32[16,1], index: 3, kind: input, shape index: {}]   ;;  %s7024_s4 = inlined_call_operand.vmem [shape: bf16[8,216], index: 4, kind: input, shape index: {}]   ;;  %s7025_s5 = inlined_call_operand.vmem [shape: f32[8,1], index: 5, kind: input, shape index: {}]   ;;  %s7026_s6 = inlined_call_operand.vmem [shape: f32[8,1], index: 6, kind: input, shape index: {}]   ;;  %s7027_s7 = inlined_call_operand.vmem [shape: f32[1,1024], index: 7, kind: input, shape index: {}]   ;;  %s7028_s8 = inlined_call_operand.hbm [shape: f32[2,8,1024], index: 8, kind: output, shape index: {}]  }
   0x1   :  { %7163 = sst [smem:[#allocation21_spill]] %s7020_s0 }
   0x2   :  { %7164 = sst [smem:[#allocation22_spill]] %s7021_s1 }
   0x3   :  { %7165 = sst [smem:[#allocation23_spill]] %s7024_s4 }
   0x4   :  { %7166 = sst [smem:[#allocation24_spill]] %s7025_s5 }
   0x5   :  { %7167 = sst [smem:[#allocation25_spill]] %s7026_s6 }
   0x6   :  { %7168 = sst [smem:[#allocation26_spill]] %s7027_s7 }
   0x7   :  { %7169 = sst [smem:[#allocation27_spill]] %s7028_s8 }
   0x8   :  { %13 = vsyncpa [#allocation6], 0 }
   0x9   :  { %15 = vsyncpa [#allocation6 + $0x1], 0 }
   0xa   :  { %16 = vsyncpa [#allocation7], 0 }
   0xb   :  { %18 = vsyncpa [#allocation7 + $0x1], 0  ;;  %s5010_s27 = smov 0   ;;  %s5012_s28 = smov 0  }
   0xc   :  { %s5014_s29 = smov 0   ;;  %s5016_s30 = smov 0  }
   0xd LB: > { %7170 = sst [smem:[#allocation11_spill]] %s4922_s27  ;;  %s5031_s9 = sadd.s32 4294967295, %s4934_s30   ;;  %s4934_s30 = sphi %s5016_s30, %s7386_s30   ;;  %s4930_s29 = sphi %s5014_s29, %s7389_s29   ;;  %s4926_s28 = sphi %s5012_s28, %s7388_s28   ;;  %s4922_s27 = sphi %s5010_s27, %s7387_s27  }
   0xe   : > { %7171 = sst [smem:[#allocation12_spill]] %s4926_s28  ;;  %s4493_s10 = sadd.s32 4294967294, %s4934_s30  }
   0xf   : > { %7172 = sst [smem:[#allocation13_spill]] %s4930_s29  ;;  %s5035_s11 = sadd.s32 1, %s4934_s30  }
  0x10   : > { %7173 = sst [smem:[#allocation14_spill]] %s4934_s30  ;;  %s31_s12 = sadd.s32 1, %s4930_s29 }
  0x11   : > { %7174 = sst [smem:[#allocation15_spill]] %s5031_s9  ;;  %s28_s13 = ssub.s32 %s4934_s30, %s5035_s11 }
  0x12   : > { %7175 = sst [smem:[#allocation16_spill]] %s5035_s11  ;;  %p38_p0 = scmp.ne.s32.totalorder %s4930_s29, %s4926_s28 }
  0x13   : > { %p29_p1 = scmp.eq.s32.totalorder %s28_s13, 0  ;;  %p39_p2 = scmp.eq.s32.totalorder %s4934_s30, 0 }
  0x14   : > { %p44_p3 = scmp.ne.s32.totalorder %s4926_s28, %s4922_s27  ;;  %p45_p4 = scmp.eq.s32.totalorder %s5031_s9, 0 }
  0x15   : > { %s5047_s14 = scalar_select %p29_p1, %s4930_s29, %s31_s12  }
  0x16   : > { %p40_p5 = por %p39_p2, %p38_p0  ;;  %p5049_p6 = por %p45_p4, %p44_p3 }
  0x17   : > { %7176 = sst [smem:[#allocation17_spill]] %s5047_s14  ;;  %p215_p7 = scmp.eq.s32.totalorder %s5031_s9, 1 }
  0x18   : > { %s7177_s15 = scalar_select %p5049_p6, 1, 0 }
  0x19   : > { %p221_p8 = scmp.eq.s32.totalorder %s4493_s10, 1  ;;  %p4772_p10 = scmp.lt.s32.totalorder %s4934_s30, 2 }
  0x1a   : > { %p5056_p11 = por %p215_p7, %p38_p0  ;;  %s262_s18 = sand.u32 1, %s4930_s29  }
  0x1b   : > { %p5060_p12 = por %p221_p8, %p44_p3  ;;  %s4758_s19 = smul.u32 640, %s4934_s30 }
  0x1c   : > { %s7178_s16 = scalar_select %p5056_p11, 1, 0 }
  0x1d   : > { %s7180_s17 = scalar_select %p5060_p12, 1, 0 }
  0x1e   : > { %7179 = sst [smem:[#allocation18_spill]] %s7178_s16  ;;  %s4757_s20 = smul.u32 40, %s262_s18 }
  0x1f   : > { %7181 = sst [smem:[#allocation19_spill]] %s7180_s17  ;;  %p5071_p13 = pnand %p4772_p10, %p40_p5 }
  0x20   : > { %s7182_s0 = sld [smem:[#allocation21_spill]]  ;;  %s266_s25 = scalar_lea.vmem [#allocation5], %s4757_s20 }
  0x21   : > { %s274_s26 = sshll.u32 %s266_s25, 4  ;;  %s263_s10 = scalar_lea.sflag [#allocation6], %s262_s18  ;;  %s275_s26 = int_to_ptr.vmem [resolvable:$true] %s274_s26 }
  0x22   : > { %p4844_p3 = pneg %p5071_p13 }
  0x26   : > { %s5069_s23 = scalar_lea.hbm %s7182_s0, %s4758_s19  ;;  %s4847_s21 = scalar_lea.hbm %s7182_s0, 1280 }
  0x27   : > { %s4842_s12 = scalar_lea.hbm %s5069_s23, 640  ;;  %p4848_p5 = scmp.lt.s32.totalorder %s5069_s23, %s7182_s0 }
  0x28   : > { %p4843_p2 = scmp.ne.s32.totalorder %s5069_s23, %s4842_s12  ;;  %p4849_p8 = scmp.lt.s32.totalorder %s4847_s21, %s4842_s12 }
  0x2a   : > { %p4845_p4 = pnand %p4844_p3, %p4843_p2  ;;  %p4850_p10 = por %p4849_p8, %p4848_p5 }
  0x2c   : > { %p4846_p7 = pneg %p4845_p4 }
  0x2e   : > { %p4851_p9 = pnand %p4850_p10, %p4846_p7 }
  0x30   : > { %4854 = shalt.err (!%p4851_p9)
}
  0x31   : > { %s4855_s20 = scalar_lea.vmem %s275_s26, 640  ;;  %s4936_s18 = smov [#allocation5]  }
  0x32   : > { %p4856_p0 = scmp.ne.s32.totalorder %s275_s26, %s4855_s20  ;;  %s4860_s25 = sshll.u32 %s4936_s18, 4  ;;  %s4861_s25 = int_to_ptr.vmem [resolvable:$false] %s4860_s25 }
  0x33   : > { %s4862_s29 = scalar_lea.vmem %s4861_s25, 1280  ;;  %p4863_p2 = scmp.lt.s32.totalorder %s275_s26, %s4861_s25 }
  0x34   : > { %p4858_p1 = pnand %p4856_p0, %p4844_p3  ;;  %p4864_p4 = scmp.lt.s32.totalorder %s4862_s29, %s4855_s20 }
  0x36   : > { %p4859_p12 = pneg %p4858_p1  ;;  %p4865_p11 = por %p4864_p4, %p4863_p2 }
  0x38   : > { %p4866_p6 = pnand %p4865_p11, %p4859_p12 }
  0x3a   : > { %4869 = shalt.err (!%p4866_p6)
}
  0x3b   : > { %4767 = dma.hbm_to_vmem [thread:$0]  (!%p5071_p13), %s5069_s23, 640, %s275_s26, %s263_s10  }
  0x3c   : > { %p7184_p9 = scmp.lt.s32.totalorder %s4934_s30, 3  ;;  %p7185_p7 = scmp.ge.s32.totalorder %s4934_s30, 1 }
  0x3e   : > { %p280_p5 = pnand %p7185_p7, %p7184_p9 }
  0x40   : > { %283 = sbr.rel (%p280_p5) target bundleno = 1202 (0x4b2), region = 52 }
  0x45   : > { %s5096_s14 = sand.u32 1, %s4926_s28   ;;  %p7187_p6 = scmp.ne.s32.totalorder %s7177_s15, 0 }
  0x46   : > { %7186 = sst [smem:[#allocation20_spill]] %s5096_s14  ;;  %s4759_s29 = smul.u32 40, %s5096_s14 }
  0x47   : > { %s286_s12 = scalar_lea.sflag [#allocation6], %s5096_s14 }
  0x48   : > { %s5100_s13 = scalar_lea.vmem [#allocation5], %s4759_s29 }
  0x49   : > { %4913 = dma.done.wait (%p7187_p6), %s286_s12, 640  }
  0x4a   : > { %4915 = vsyncadd (%p7187_p6), %s286_s12, 4294966656  ;;  %v5107_v0 = vld [vmem:[%s5100_s13 + $0x4] sm:$0xff]  ;;  %s7077_s23 = smov 119   ;;  %s7074_s24 = smov 127   ;;  %v5114_v1 = vld [vmem:[%s5100_s13 + $0xc] sm:$0xff]  ;;  %vm2083_vm0 = vcmask 719872  }
  0x4b   : > { %930 = vrot.lane.b32.xlu1 %v5107_v0, %s7077_s23  ;;  %888 = vrot.lane.b32.xlu0 %v5107_v0, %s7074_s24  ;;  %v829_v2 = vld [vmem:[%s5100_s13 + $0x8] sm:$0xff]  ;;  %v828_v3 = vld [vmem:[%s5100_s13] sm:$0xff]  ;;  %s7070_s15 = smov 1   ;;  %s7072_s26 = smov 10   ;;  %vm348_vm1 = vcmask 1043456   ;;  %vm904_vm2 = vcmask 1039360  }
  0x4c   : > { %s7068_s10 = smov 9   ;;  %s7066_s19 = smov 89   ;;  %v5198_v5 = vld [vmem:[%s5100_s13 + $0x1c] sm:$0xff]  ;;  %v5201_v6 = vld [vmem:[%s5100_s13 + $0x14] sm:$0xff]  ;;  %vm946_vm3 = vcmask 973824   ;;  %vm854_vm4 = vcmask 7168  }
  0x4d   : > { %s7064_s21 = smov 11   ;;  %s7062_s22 = smov 91   ;;  %v5216_v7 = vld [vmem:[%s5100_s13 + $0x18] sm:$0xff]  ;;  %v5219_v8 = vld [vmem:[%s5100_s13 + $0x10] sm:$0xff]  ;;  %vm770_vm5 = vcmask 80896   ;;  %vm812_vm6 = vcmask 72704  }
  0x4e   : > { %s7032_s20 = smov 90   ;;  %s7034_s18 = smov 100   ;;  %vm686_vm7 = vcmask 728064   ;;  %vm728_vm8 = vcmask 89088   ;;  %vm7124_vm9 = vcmask 744448   ;;  %vm7123_vm10 = vcmask 736256  }
  0x4f   : > { %932 = vrot.lane.b32.xlu1 %v5114_v1, %s7077_s23  ;;  %890 = vrot.lane.b32.xlu0 %v5114_v1, %s7074_s24  ;;  %s7036_s25 = smov 99   ;;  %s7038_s29 = smov 109   ;;  %vm7122_vm11 = vcmask 818176   ;;  %vm7121_vm12 = vcmask 809984   ;;  %vm7079_vm13 = vcmask 891904   ;;  %vm7076_vm14 = vcmask 826368  }
  0x50   : > { %s7058_s12 = smov 101   ;;  %s7188_s1 = sld [smem:[#allocation22_spill]]  ;;  %vm7088_vm15 = vcmask 908288  }
  0x51   : > { %s7202_s0 = smov 29   ;;  %s7203_s28 = smov 39  }
  0x52   : > { %s7204_s11 = smov 38   ;;  %s7205_s30 = smov 118  }
  0x53   : > { %840 = vrot.lane.b32.xlu1 %v829_v2, %s7070_s15  ;;  %838 = vrot.lane.b32.xlu0 %v828_v3, %s7070_s15  ;;  %s7206_s17 = smov 117   ;;  %s7207_s27 = smov 119  }
  0x54   : > { %s7208_s8 = smov 127   ;;  %s7209_s16 = smov 10  }
  0x55   : > { %s7210_s9 = smov 1   ;;  %s7211_s14 = smov 9  }
  0x56   : > { %v5191_v4 = vld [vmem:[%s7188_s1 + $0x4] ss:$8 sps:$4 sm:$0xff]   ;;  %s7212_s6 = smov 89   ;;  %s7213_s5 = smov 11  }
  0x57   : > { %756 = vrot.lane.b32.xlu1 %v829_v2, %s7072_s26  ;;  %754 = vrot.lane.b32.xlu0 %v828_v3, %s7072_s26  ;;  %s7214_s4 = smov 91   ;;  %s7274_s7 = sld [smem:[#allocation26_spill]] }
  0x58   : > { %4614 = vmatprep.mubr.msk.bf16.mxu0 %vm2083_vm0, %v5191_v4  ;;  %4616 = vmatprep.mubr.msk.bf16.mxu1 %vm2083_vm0, %v5191_v4 }
  0x5b   : > { %798 = vrot.lane.b32.xlu1 %v829_v2, %s7068_s10  ;;  %796 = vrot.lane.b32.xlu0 %v828_v3, %s7068_s10 }
  0x5f   : > { %672 = vrot.lane.b32.xlu1 %v829_v2, %s7066_s19  ;;  %670 = vrot.lane.b32.xlu0 %v828_v3, %s7066_s19 }
  0x63   : > { %714 = vrot.lane.b32.xlu1 %v829_v2, %s7064_s21  ;;  %712 = vrot.lane.b32.xlu0 %v828_v3, %s7064_s21 }
  0x67   : > { %588 = vrot.lane.b32.xlu1 %v829_v2, %s7062_s22  ;;  %586 = vrot.lane.b32.xlu0 %v828_v3, %s7062_s22 }
  0x6b   : > { %630 = vrot.lane.b32.xlu1 %v829_v2, %s7032_s20  ;;  %628 = vrot.lane.b32.xlu0 %v828_v3, %s7032_s20  ;;  %s7040_s20 = smov 111  }
  0x6f   : > { %504 = vrot.lane.b32.xlu1 %v829_v2, %s7034_s18  ;;  %502 = vrot.lane.b32.xlu0 %v828_v3, %s7034_s18  ;;  %s7042_s18 = smov 110  }
  0x73   : > { %546 = vrot.lane.b32.xlu1 %v829_v2, %s7036_s25  ;;  %544 = vrot.lane.b32.xlu0 %v828_v3, %s7036_s25  ;;  %s7044_s25 = smov 17  }
  0x77   : > { %420 = vrot.lane.b32.xlu1 %v829_v2, %s7038_s29  ;;  %418 = vrot.lane.b32.xlu0 %v828_v3, %s7038_s29  ;;  %s7046_s29 = smov 19  }
  0x7b   : > { %462 = vrot.lane.b32.xlu1 %v829_v2, %s7058_s12  ;;  %460 = vrot.lane.b32.xlu0 %v828_v3, %s7058_s12  ;;  %s7190_s12 = smov 100  }
  0x7f   : > { %335 = vrot.lane.b32.xlu1 %v829_v2, %s7040_s20  ;;  %333 = vrot.lane.b32.xlu0 %v828_v3, %s7040_s20  ;;  %s7048_s20 = smov 18  }
  0x83   : > { %378 = vrot.lane.b32.xlu1 %v829_v2, %s7042_s18  ;;  %376 = vrot.lane.b32.xlu0 %v828_v3, %s7042_s18  ;;  %s7050_s18 = smov 28  }
  0x87   : > { %1394 = vrot.lane.b32.xlu1 %v5114_v1, %s7044_s25  ;;  %1392 = vrot.lane.b32.xlu0 %v5107_v0, %s7044_s25  ;;  %s7052_s25 = smov 27  }
  0x8b   : > { %1310 = vrot.lane.b32.xlu1 %v5114_v1, %s7046_s29  ;;  %1308 = vrot.lane.b32.xlu0 %v5107_v0, %s7046_s29  ;;  %s7054_s29 = smov 37  }
  0x8f   : > { %1352 = vrot.lane.b32.xlu1 %v5114_v1, %s7048_s20  ;;  %1350 = vrot.lane.b32.xlu0 %v5107_v0, %s7048_s20  ;;  %s7056_s20 = smov 29  }
  0x93   : > { %1226 = vrot.lane.b32.xlu1 %v5114_v1, %s7050_s18  ;;  %1224 = vrot.lane.b32.xlu0 %v5107_v0, %s7050_s18  ;;  %s7060_s18 = smov 39  }
  0x97   : > { %1268 = vrot.lane.b32.xlu1 %v5114_v1, %s7052_s25  ;;  %1266 = vrot.lane.b32.xlu0 %v5107_v0, %s7052_s25  ;;  %s7086_s25 = smov 38  }
  0x9b   : > { %1142 = vrot.lane.b32.xlu1 %v5114_v1, %s7054_s29  ;;  %1140 = vrot.lane.b32.xlu0 %v5107_v0, %s7054_s29  ;;  %s7082_s29 = smov 118  }
  0x9f   : > { %1184 = vrot.lane.b32.xlu1 %v5114_v1, %s7056_s20  ;;  %1182 = vrot.lane.b32.xlu0 %v5107_v0, %s7056_s20  ;;  %s7189_s20 = smov 90  }
  0xa3   : > { %1058 = vrot.lane.b32.xlu1 %v5114_v1, %s7060_s18  ;;  %1056 = vrot.lane.b32.xlu0 %v5107_v0, %s7060_s18  ;;  %s7080_s18 = smov 117  }
  0xa7   : > { %1100 = vrot.lane.b32.xlu1 %v5114_v1, %s7086_s25  ;;  %1098 = vrot.lane.b32.xlu0 %v5107_v0, %s7086_s25  ;;  %s7201_s25 = smov 37  }
  0xab   : > { %974 = vrot.lane.b32.xlu1 %v5114_v1, %s7082_s29  ;;  %972 = vrot.lane.b32.xlu0 %v5107_v0, %s7082_s29  ;;  %s7200_s29 = smov 27  }
  0xaf   : > { %1016 = vrot.lane.b32.xlu1 %v5114_v1, %s7080_s18  ;;  %1014 = vrot.lane.b32.xlu0 %v5107_v0, %s7080_s18  ;;  %s7199_s18 = smov 28  }
  0xb3   : > { %894 = vrot.lane.b32.xlu1 %v5198_v5, %s7074_s24  ;;  %892 = vrot.lane.b32.xlu0 %v5201_v6, %s7074_s24  ;;  %s7197_s24 = smov 19  }
  0xb7   : > { %936 = vrot.lane.b32.xlu1 %v5198_v5, %s7077_s23  ;;  %934 = vrot.lane.b32.xlu0 %v5201_v6, %s7077_s23  ;;  %s7198_s23 = smov 18  }
  0xbb   : > { %844 = vrot.lane.b32.xlu1 %v5216_v7, %s7070_s15  ;;  %842 = vrot.lane.b32.xlu0 %v5219_v8, %s7070_s15  ;;  %s7195_s15 = smov 110  }
  0xbd   : > { %v931_v9 = vpop.permute.xlu1 %930  ;;  %v889_v10 = vpop.permute.xlu0 %888 }
  0xbe   : > { %v940_v11 = vrot.slane %v931_v9, 4  ;;  %v898_v14 = vrot.slane %v889_v10, 4 }
  0xbf   : > { %760 = vrot.lane.b32.xlu1 %v5216_v7, %s7072_s26  ;;  %758 = vrot.lane.b32.xlu0 %v5219_v8, %s7072_s26  ;;  %s7196_s26 = smov 17  }
  0xc1   : > { %v5229_v12 = vpop.permute.xlu1 %932  ;;  %v5231_v13 = vpop.permute.xlu0 %890 }
  0xc2   : > { %v941_v15 = vrot.slane %v5229_v12, 4  ;;  %v899_v16 = vrot.slane %v5231_v13, 4 }
  0xc3   : > { %802 = vrot.lane.b32.xlu1 %v5216_v7, %s7068_s10  ;;  %800 = vrot.lane.b32.xlu0 %v5219_v8, %s7068_s10  ;;  %s7194_s10 = smov 111  }
  0xc4   : > { %v903_v17 = vsel %vm348_vm1, %v898_v14, %v899_v16  ;;  %v945_v18 = vsel %vm348_vm1, %v940_v11, %v941_v15 }
  0xc5   : > { %v5245_v19 = vpop.permute.xlu1 %840  ;;  %v839_v20 = vpop.permute.xlu0 %838  ;;  %v905_v21 = vsel %vm904_vm2, %v889_v10, %v903_v17  ;;  %v947_v22 = vsel %vm946_vm3, %v931_v9, %v945_v18 }
  0xc6   : > { %v849_v23 = vrot.slane %v5245_v19, 4  ;;  %v848_v24 = vrot.slane %v839_v20, 4  ;;  %v4558_v25 = vcombine.high %v905_v21, %v947_v22  ;;  %v4557_v26 = vcombine.low %v905_v21, %v947_v22 }
  0xc7   : > { %676 = vrot.lane.b32.xlu1 %v5216_v7, %s7066_s19  ;;  %674 = vrot.lane.b32.xlu0 %v5219_v8, %s7066_s19  ;;  %s7193_s19 = smov 101  }
  0xc8   : > { %v853_v27 = vsel %vm348_vm1, %v848_v24, %v849_v23  ;;  %2112 = vmatprep.subr.bf16.mxu0 %v4558_v25 }
  0xc9   : > { %v855_v28 = vsel %vm854_vm4, %v839_v20, %v853_v27  ;;  %2113 = vmatpush1.bf16.msra.mxu0 %v4557_v26  ;;  %v5258_v29 = vpop.permute.xlu1 %756  ;;  %v755_v30 = vpop.permute.xlu0 %754 }
  0xca   : > { %v765_v31 = vrot.slane %v5258_v29, 4  ;;  %v764_v32 = vrot.slane %v755_v30, 4  ;;  %v4550_v33 = vcombine.high %v855_v28, %v5107_v0  ;;  %v4549_v34 = vcombine.low %v855_v28, %v5107_v0 }
  0xcb   : > { %718 = vrot.lane.b32.xlu1 %v5216_v7, %s7064_s21  ;;  %716 = vrot.lane.b32.xlu0 %v5219_v8, %s7064_s21  ;;  %s7192_s21 = smov 109  }
  0xcc   : > { %2114 = vmatprep.subr.bf16.mxu0 %v4550_v33  ;;  %v769_v37 = vsel %vm348_vm1, %v764_v32, %v765_v31 }
  0xcd   : > { %2115 = vmatpush1.bf16.msra.mxu0 %v4549_v34  ;;  %v5267_v35 = vpop.permute.xlu1 %798  ;;  %v797_v36 = vpop.permute.xlu0 %796  ;;  %v771_v41 = vsel %vm770_vm5, %v755_v30, %v769_v37 }
  0xce   : > { %v807_v38 = vrot.slane %v5267_v35, 4  ;;  %v806_v39 = vrot.slane %v797_v36, 4 }
  0xcf   : > { %592 = vrot.lane.b32.xlu1 %v5216_v7, %s7062_s22  ;;  %590 = vrot.lane.b32.xlu0 %v5219_v8, %s7062_s22  ;;  %s7191_s22 = smov 99  }
  0xd0   : > { %v811_v40 = vsel %vm348_vm1, %v806_v39, %v807_v38 }
  0xd1   : > { %v813_v42 = vsel %vm812_vm6, %v797_v36, %v811_v40  ;;  %v5282_v43 = vpop.permute.xlu1 %672  ;;  %v671_v44 = vpop.permute.xlu0 %670 }
  0xd2   : > { %v681_v45 = vrot.slane %v5282_v43, 4  ;;  %v680_v46 = vrot.slane %v671_v44, 4  ;;  %v4542_v47 = vcombine.high %v771_v41, %v813_v42  ;;  %v4541_v48 = vcombine.low %v771_v41, %v813_v42 }
  0xd3   : > { %634 = vrot.lane.b32.xlu1 %v5216_v7, %s7189_s20  ;;  %632 = vrot.lane.b32.xlu0 %v5219_v8, %s7189_s20 }
  0xd4   : > { %2116 = vmatprep.subr.bf16.mxu0 %v4542_v47  ;;  %v685_v51 = vsel %vm348_vm1, %v680_v46, %v681_v45 }
  0xd5   : > { %2117 = vmatpush1.bf16.msra.mxu0 %v4541_v48  ;;  %v5289_v49 = vpop.permute.xlu1 %714  ;;  %v713_v50 = vpop.permute.xlu0 %712  ;;  %v687_v55 = vsel %vm686_vm7, %v671_v44, %v685_v51 }
  0xd6   : > { %v723_v52 = vrot.slane %v5289_v49, 4  ;;  %v722_v53 = vrot.slane %v713_v50, 4 }
  0xd7   : > { %508 = vrot.lane.b32.xlu1 %v5216_v7, %s7190_s12  ;;  %506 = vrot.lane.b32.xlu0 %v5219_v8, %s7190_s12 }
  0xd8   : > { %v727_v54 = vsel %vm348_vm1, %v722_v53, %v723_v52 }
  0xd9   : > { %v729_v56 = vsel %vm728_vm8, %v713_v50, %v727_v54  ;;  %v5304_v57 = vpop.permute.xlu1 %588  ;;  %v587_v58 = vpop.permute.xlu0 %586 }
  0xda   : > { %v597_v59 = vrot.slane %v5304_v57, 4  ;;  %v596_v60 = vrot.slane %v587_v58, 4  ;;  %v4534_v61 = vcombine.high %v687_v55, %v729_v56  ;;  %v4533_v62 = vcombine.low %v687_v55, %v729_v56 }
  0xdb   : > { %550 = vrot.lane.b32.xlu1 %v5216_v7, %s7191_s22  ;;  %548 = vrot.lane.b32.xlu0 %v5219_v8, %s7191_s22 }
  0xdc   : > { %2118 = vmatprep.subr.bf16.mxu0 %v4534_v61  ;;  %v601_v1 = vsel %vm348_vm1, %v596_v60, %v597_v59 }
  0xdd   : > { %2119 = vmatpush1.bf16.msra.mxu0 %v4533_v62  ;;  %v5311_v63 = vpop.permute.xlu1 %630  ;;  %v629_v0 = vpop.permute.xlu0 %628  ;;  %v603_v10 = vsel %vm7124_vm9, %v587_v58, %v601_v1 }
  0xde   : > { %v639_v2 = vrot.slane %v5311_v63, 4  ;;  %v638_v3 = vrot.slane %v629_v0, 4 }
  0xdf   : > { %424 = vrot.lane.b32.xlu1 %v5216_v7, %s7192_s21  ;;  %422 = vrot.lane.b32.xlu0 %v5219_v8, %s7192_s21 }
  0xe0   : > { %v643_v9 = vsel %vm348_vm1, %v638_v3, %v639_v2 }
  0xe1   : > { %v645_v11 = vsel %vm7123_vm10, %v629_v0, %v643_v9  ;;  %v5326_v14 = vpop.permute.xlu1 %504  ;;  %v503_v17 = vpop.permute.xlu0 %502 }
  0xe2   : > { %v513_v18 = vrot.slane %v5326_v14, 4  ;;  %v512_v20 = vrot.slane %v503_v17, 4  ;;  %v4526_v21 = vcombine.high %v603_v10, %v645_v11  ;;  %v4525_v22 = vcombine.low %v603_v10, %v645_v11 }
  0xe3   : > { %466 = vrot.lane.b32.xlu1 %v5216_v7, %s7193_s19  ;;  %464 = vrot.lane.b32.xlu0 %v5219_v8, %s7193_s19 }
  0xe4   : > { %2120 = vmatprep.subr.bf16.mxu0 %v4526_v21  ;;  %v517_v26 = vsel %vm348_vm1, %v512_v20, %v513_v18 }
  0xe5   : > { %2121 = vmatpush1.bf16.msra.mxu0 %v4525_v22  ;;  %v5333_v24 = vpop.permute.xlu1 %546  ;;  %v545_v25 = vpop.permute.xlu0 %544  ;;  %v519_v32 = vsel %vm7122_vm11, %v503_v17, %v517_v26 }
  0xe6   : > { %v555_v27 = vrot.slane %v5333_v24, 4  ;;  %v554_v28 = vrot.slane %v545_v25, 4 }
  0xe7   : > { %339 = vrot.lane.b32.xlu1 %v5216_v7, %s7194_s10  ;;  %337 = vrot.lane.b32.xlu0 %v5219_v8, %s7194_s10 }
  0xe8   : > { %v559_v30 = vsel %vm348_vm1, %v554_v28, %v555_v27 }
  0xe9   : > { %v561_v33 = vsel %vm7121_vm12, %v545_v25, %v559_v30  ;;  %v5348_v34 = vpop.permute.xlu1 %420  ;;  %v419_v36 = vpop.permute.xlu0 %418 }
  0xea   : > { %v429_v37 = vrot.slane %v5348_v34, 4  ;;  %v428_v39 = vrot.slane %v419_v36, 4  ;;  %v4518_v40 = vcombine.high %v519_v32, %v561_v33  ;;  %v4517_v41 = vcombine.low %v519_v32, %v561_v33 }
  0xeb   : > { %382 = vrot.lane.b32.xlu1 %v5216_v7, %s7195_s15  ;;  %380 = vrot.lane.b32.xlu0 %v5219_v8, %s7195_s15 }
  0xec   : > { %2122 = vmatprep.subr.bf16.mxu0 %v4518_v40  ;;  %v433_v46 = vsel %vm348_vm1, %v428_v39, %v429_v37 }
  0xed   : > { %2123 = vmatpush1.bf16.msra.mxu0 %v4517_v41  ;;  %v5355_v42 = vpop.permute.xlu1 %462  ;;  %v461_v44 = vpop.permute.xlu0 %460  ;;  %v435_v8 = vsel %vm7079_vm13, %v419_v36, %v433_v46  ;;  %vm7084_vm13 = vcmask 138240  }
  0xee   : > { %v471_v47 = vrot.slane %v5355_v42, 4  ;;  %v470_v48 = vrot.slane %v461_v44, 4 }
  0xef   : > { %1398 = vrot.lane.b32.xlu1 %v5198_v5, %s7196_s26  ;;  %1396 = vrot.lane.b32.xlu0 %v5201_v6, %s7196_s26 }
  0xf0   : > { %v475_v7 = vsel %vm348_vm1, %v470_v48, %v471_v47 }
  0xf1   : > { %v477_v50 = vsel %vm7076_vm14, %v461_v44, %v475_v7  ;;  %v5370_v51 = vpop.permute.xlu1 %335  ;;  %v334_v53 = vpop.permute.xlu0 %333  ;;  %vm7085_vm14 = vcmask 900096  }
  0xf2   : > { %v344_v54 = vrot.slane %v5370_v51, 4  ;;  %v343_v55 = vrot.slane %v334_v53, 4  ;;  %v4510_v56 = vcombine.high %v435_v8, %v477_v50  ;;  %v4509_v58 = vcombine.low %v435_v8, %v477_v50 }
  0xf3   : > { %1314 = vrot.lane.b32.xlu1 %v5198_v5, %s7197_s24  ;;  %1312 = vrot.lane.b32.xlu0 %v5201_v6, %s7197_s24 }
  0xf4   : > { %2124 = vmatprep.subr.bf16.mxu0 %v4510_v56  ;;  %v349_v62 = vsel %vm348_vm1, %v343_v55, %v344_v54 }
  0xf5   : > { %2125 = vmatpush1.bf16.msra.mxu0 %v4509_v58  ;;  %v5377_v60 = vpop.permute.xlu1 %378  ;;  %v377_v61 = vpop.permute.xlu0 %376  ;;  %v351_v9 = vsel %vm7088_vm15, %v334_v53, %v349_v62  ;;  %vm1240_vm15 = vcmask 228352  }
  0xf6   : > { %v387_v0 = vrot.slane %v5377_v60, 4  ;;  %v386_v1 = vrot.slane %v377_v61, 4 }
  0xf7   : > { %1356 = vrot.lane.b32.xlu1 %v5198_v5, %s7198_s23  ;;  %1354 = vrot.lane.b32.xlu0 %v5201_v6, %s7198_s23 }
  0xf8   : > { %v391_v3 = vsel %vm348_vm1, %v386_v1, %v387_v0 }
  0xf9   : > { %v393_v10 = vsel %vm7085_vm14, %v377_v61, %v391_v3  ;;  %v5392_v11 = vpop.permute.xlu1 %1394  ;;  %v1393_v17 = vpop.permute.xlu0 %1392  ;;  %vm7089_vm14 = vcmask 146432  }
  0xfa   : > { %v1403_v20 = vrot.slane %v5392_v11, 4  ;;  %v1402_v21 = vrot.slane %v1393_v17, 4  ;;  %v4502_v22 = vcombine.high %v351_v9, %v393_v10  ;;  %v4501_v25 = vcombine.low %v351_v9, %v393_v10 }
  0xfb   : > { %1230 = vrot.lane.b32.xlu1 %v5198_v5, %s7199_s18  ;;  %1228 = vrot.lane.b32.xlu0 %v5201_v6, %s7199_s18 }
  0xfc   : > { %v1407_v26 = vsel %vm348_vm1, %v1402_v21, %v1403_v20  ;;  %2126 = vmatprep.subr.bf16.mxu0 %v4502_v22 }
  0xfd   : > { %v1409_v28 = vsel %vm7084_vm13, %v1393_v17, %v1407_v26  ;;  %v5403_v30 = vpop.permute.xlu1 %1310  ;;  %2127 = vmatpush1.bf16.msra.mxu0 %v4501_v25  ;;  %v1309_v32 = vpop.permute.xlu0 %1308  ;;  %vm7093_vm13 = vcmask 154624  }
  0xfe   : > { %v4606_v33 = vcombine.high %v1409_v28, %v1409_v28  ;;  %v1319_v36 = vrot.slane %v5403_v30, 4  ;;  %v1318_v39 = vrot.slane %v1309_v32, 4  ;;  %v4605_v40 = vcombine.low %v1409_v28, %v1409_v28 }
  0xff   : > { %1272 = vrot.lane.b32.xlu1 %v5198_v5, %s7200_s29  ;;  %1270 = vrot.lane.b32.xlu0 %v5201_v6, %s7200_s29 }
 0x100   : > { %4613 = vmatprep.subr.msk.bf16.mxu0 %vm348_vm1, %v4606_v33  ;;  %v2089_v41 = vsel %vm348_vm1, %v4605_v40, 0  ;;  %v1323_v48 = vsel %vm348_vm1, %v1318_v39, %v1319_v36 }
 0x101   : > { %v5412_v44 = vpop.permute.xlu1 %1352  ;;  %2133 = vmatpush2.bf16.msra.mxu0 %v2089_v41  ;;  %v1351_v46 = vpop.permute.xlu0 %1350  ;;  %v1325_v53 = vsel %vm7093_vm13, %v1309_v32, %v1323_v48  ;;  %vm7098_vm13 = vcmask 302080  }
 0x102   : > { %v1361_v7 = vrot.slane %v5412_v44, 4  ;;  %v1360_v8 = vrot.slane %v1351_v46, 4 }
 0x103   : > { %1146 = vrot.lane.b32.xlu1 %v5198_v5, %s7201_s25  ;;  %1144 = vrot.lane.b32.xlu0 %v5201_v6, %s7201_s25 }
 0x104   : > { %v1365_v50 = vsel %vm348_vm1, %v1360_v8, %v1361_v7 }
 0x105   : > { %v1367_v55 = vsel %vm7089_vm14, %v1351_v46, %v1365_v50  ;;  %v5427_v56 = vpop.permute.xlu1 %1226  ;;  %v1225_v58 = vpop.permute.xlu0 %1224  ;;  %vm7094_vm14 = vcmask 220160  }
 0x106   : > { %v7117_v61 = vrot.slane %v5427_v56, 4  ;;  %v1234_v62 = vrot.slane %v1225_v58, 4  ;;  %v4598_v1 = vcombine.high %v1325_v53, %v1367_v55  ;;  %v4597_v3 = vcombine.low %v1325_v53, %v1367_v55 }
 0x107   : > { %1188 = vrot.lane.b32.xlu1 %v5198_v5, %s7202_s0  ;;  %1186 = vrot.lane.b32.xlu0 %v5201_v6, %s7202_s0 }
 0x108   : > { %2134 = vmatprep.subr.bf16.mxu0 %v4598_v1  ;;  %v1239_v17 = vsel %vm348_vm1, %v1234_v62, %v7117_v61  ;;  %v871_v61 = vld [vmem:[%s5100_s13 + $0xc] sm:$0xff] }
 0x109   : > { %v5434_v9 = vpop.permute.xlu1 %1268  ;;  %2135 = vmatpush2.bf16.msra.mxu0 %v4597_v3  ;;  %v1267_v10 = vpop.permute.xlu0 %1266  ;;  %v1241_v26 = vsel %vm1240_vm15, %v1225_v58, %v1239_v17 }
 0x10a   : > { %v7113_v21 = vrot.slane %v5434_v9, 4  ;;  %v1276_v22 = vrot.slane %v1267_v10, 4 }
 0x10b   : > { %1062 = vrot.lane.b32.xlu1 %v5198_v5, %s7203_s28  ;;  %1060 = vrot.lane.b32.xlu0 %v5201_v6, %s7203_s28 }
 0x10c   : > { %v1281_v25 = vsel %vm348_vm1, %v1276_v22, %v7113_v21 }
 0x10d   : > { %v1283_v28 = vsel %vm7094_vm14, %v1267_v10, %v1281_v25  ;;  %v5449_v32 = vpop.permute.xlu1 %1142  ;;  %v1141_v33 = vpop.permute.xlu0 %1140  ;;  %vm7097_vm14 = vcmask 236544  }
 0x10e   : > { %v7112_v39 = vrot.slane %v5449_v32, 4  ;;  %v1150_v40 = vrot.slane %v1141_v33, 4  ;;  %v4590_v41 = vcombine.high %v1241_v26, %v1283_v28  ;;  %v4589_v46 = vcombine.low %v1241_v26, %v1283_v28  ;;  %v924_v28 = vld [vmem:[%s5100_s13 + $0x24] sm:$0xf] }
 0x10f   : > { %1104 = vrot.lane.b32.xlu1 %v5198_v5, %s7204_s11  ;;  %1102 = vrot.lane.b32.xlu0 %v5201_v6, %s7204_s11 }
 0x110   : > { %2136 = vmatprep.subr.bf16.mxu0 %v4590_v41  ;;  %v1155_v50 = vsel %vm348_vm1, %v1150_v40, %v7112_v39 }
 0x111   : > { %v5456_v48 = vpop.permute.xlu1 %1184  ;;  %2137 = vmatpush2.bf16.msra.mxu0 %v4589_v46  ;;  %v1183_v8 = vpop.permute.xlu0 %1182  ;;  %v1157_v62 = vsel %vm7098_vm13, %v1141_v33, %v1155_v50  ;;  %v882_v33 = vld [vmem:[%s5100_s13 + $0x24] sm:$0xf]  ;;  %vm7107_vm13 = vcmask 310272  }
 0x112   : > { %v7102_v53 = vrot.slane %v5456_v48, 4  ;;  %v1192_v55 = vrot.slane %v1183_v8, 4 }
 0x113   : > { %978 = vrot.lane.b32.xlu1 %v5198_v5, %s7205_s30  ;;  %976 = vrot.lane.b32.xlu0 %v5201_v6, %s7205_s30 }
 0x114   : > { %v1197_v58 = vsel %vm348_vm1, %v1192_v55, %v7102_v53  ;;  %v748_v55 = vld [vmem:[%s5100_s13 + $0x20] sm:$0xf] }
 0x115   : > { %v1199_v1 = vsel %vm7097_vm14, %v1183_v8, %v1197_v58  ;;  %v5471_v3 = vpop.permute.xlu1 %1058  ;;  %v1057_v10 = vpop.permute.xlu0 %1056  ;;  %vm7106_vm14 = vcmask 318464   ;;  %v832_v58 = vld [vmem:[%s5100_s13 + $0x20] sm:$0xf] }
 0x116   : > { %v7101_v17 = vrot.slane %v5471_v3, 4  ;;  %v1066_v22 = vrot.slane %v1057_v10, 4  ;;  %v4582_v25 = vcombine.high %v1157_v62, %v1199_v1  ;;  %v4581_v26 = vcombine.low %v1157_v62, %v1199_v1 }
 0x117   : > { %1020 = vrot.lane.b32.xlu1 %v5198_v5, %s7206_s17  ;;  %1018 = vrot.lane.b32.xlu0 %v5201_v6, %s7206_s17 }
 0x118   : > { %2138 = vmatprep.subr.bf16.mxu0 %v4582_v25  ;;  %v1071_v46 = vsel %vm348_vm1, %v1066_v22, %v7101_v17 }
 0x119   : > { %v5480_v40 = vpop.permute.xlu1 %1100  ;;  %2139 = vmatpush2.bf16.msra.mxu0 %v4581_v26  ;;  %v1099_v41 = vpop.permute.xlu0 %1098  ;;  %v1073_v62 = vsel %vm7106_vm14, %v1057_v10, %v1071_v46  ;;  %vm988_vm14 = vcmask 965632  }
 0x11a   : > { %v7111_v8 = vrot.slane %v5480_v40, 4  ;;  %v1108_v5 = vrot.slane %v1099_v41, 4 }
 0x11b   : > { %938 = vrot.lane.b32.xlu1 %v924_v28, %s7207_s27  ;;  %896 = vrot.lane.b32.xlu0 %v882_v33, %s7208_s8  ;;  %v790_v33 = vld [vmem:[%s5100_s13 + $0x20] sm:$0xf] }
 0x11c   : > { %v1113_v50 = vsel %vm348_vm1, %v1108_v5, %v7111_v8  ;;  %v664_v5 = vld [vmem:[%s5100_s13 + $0x20] sm:$0xf] }
 0x11d   : > { %v1115_v1 = vsel %vm7107_vm13, %v1099_v41, %v1113_v50  ;;  %v5495_v22 = vpop.permute.xlu1 %974  ;;  %v973_v25 = vpop.permute.xlu0 %972  ;;  %vm1030_vm13 = vcmask 957440  }
 0x11e   : > { %v7110_v26 = vrot.slane %v5495_v22, 4  ;;  %v982_v28 = vrot.slane %v973_v25, 4  ;;  %v4574_v17 = vcombine.high %v1073_v62, %v1115_v1  ;;  %v4573_v53 = vcombine.low %v1073_v62, %v1115_v1 }
 0x11f   : > { %762 = vrot.lane.b32.xlu1 %v748_v55, %s7209_s16  ;;  %846 = vrot.lane.b32.xlu0 %v832_v58, %s7210_s9  ;;  %v580_v58 = vld [vmem:[%s5100_s13 + $0x20] sm:$0xf] }
 0x120   : > { %2140 = vmatprep.subr.bf16.mxu0 %v4574_v17  ;;  %v987_v46 = vsel %vm348_vm1, %v982_v28, %v7110_v26 }
 0x121   : > { %v5502_v10 = vpop.permute.xlu1 %1016  ;;  %2141 = vmatpush2.bf16.msra.mxu0 %v4573_v53  ;;  %v1015_v41 = vpop.permute.xlu0 %1014  ;;  %v706_v53 = vld [vmem:[%s5100_s13 + $0x20] sm:$0xf]  ;;  %v989_v62 = vsel %vm988_vm14, %v973_v25, %v987_v46 }
 0x122   : > { %v7115_v50 = vrot.slane %v5502_v10, 4  ;;  %v1024_v55 = vrot.slane %v1015_v41, 4  ;;  %v5527_v25 = vld [vmem:[%s7188_s1] ss:$8 sps:$4 sm:$0xff]  }
 0x123   : > { %804 = vrot.lane.b32.xlu0 %v790_v33, %s7211_s14  ;;  %678 = vrot.lane.b32.xlu1 %v664_v5, %s7212_s6  ;;  %v622_v5 = vld [vmem:[%s5100_s13 + $0x20] sm:$0xf]  ;;  %s7277_s6 = smov 39   ;;  %s7278_s14 = smov 38  }
 0x124   : > { %v1029_v17 = vsel %vm348_vm1, %v1024_v55, %v7115_v50  ;;  %v496_v55 = vld [vmem:[%s5100_s13 + $0x20] sm:$0xf] }
 0x125   : > { %v1031_v1 = vsel %vm1030_vm13, %v1015_v41, %v1029_v17  ;;  %v5517_v28 = vpop.permute.xlu1 %894  ;;  %v893_v26 = vpop.permute.xlu0 %892 }
 0x126   : > { %v7114_v8 = vrot.slane %v5517_v28, 4  ;;  %v900_v33 = vrot.slane %v893_v26, 4  ;;  %v4566_v39 = vcombine.high %v989_v62, %v1031_v1  ;;  %v4565_v21 = vcombine.low %v989_v62, %v1031_v1  ;;  %v538_v62 = vld [vmem:[%s5100_s13 + $0x20] sm:$0xf] }
 0x127   : > { %720 = vrot.lane.b32.xlu0 %v706_v53, %s7213_s5  ;;  %594 = vrot.lane.b32.xlu1 %v580_v58, %s7214_s4 }
 0x128   : > { %2142 = vmatprep.subr.bf16.mxu0 %v4566_v39  ;;  %v908_v17 = vsel %vm348_vm1, %v900_v33, %v7114_v8  ;;  %v906_v39 = vsel %vm348_vm1, %v899_v16, %v900_v33  ;;  %v412_v8 = vld [vmem:[%s5100_s13 + $0x20] sm:$0xf] }
 0x129   : > { %v5529_v41 = vpop.permute.xlu1 %936  ;;  %2143 = vmatpush2.bf16.msra.mxu0 %v4565_v21  ;;  %v935_v46 = vpop.permute.xlu0 %934  ;;  %v909_v50 = vsel %vm904_vm2, %v893_v26, %v908_v17 }
 0x12a   : > { %v7116_v53 = vrot.slane %v5529_v41, 4  ;;  %v942_v58 = vrot.slane %v935_v46, 4 }
 0x12b   : > { %636 = vrot.lane.b32.xlu0 %v622_v5, %s7189_s20  ;;  %510 = vrot.lane.b32.xlu1 %v496_v55, %s7190_s12  ;;  %v907_v55 = vsel %vm904_vm2, %v5231_v13, %v906_v39  ;;  %v327_v39 = vld [vmem:[%s5100_s13 + $0x20] sm:$0xf] }
 0x12c   : > { %v950_v21 = vsel %vm348_vm1, %v942_v58, %v7116_v53  ;;  %v948_v1 = vsel %vm348_vm1, %v941_v15, %v942_v58  ;;  %2145 = vmatmul.mubr.bf16.vlgmr.msra.gmra.mxu0 %v5527_v25 }
 0x12d   : > { %v951_v16 = vsel %vm946_vm3, %v935_v46, %v950_v21  ;;  %v5551_v33 = vpop.permute.xlu1 %844  ;;  %v843_v5 = vpop.permute.xlu0 %842  ;;  %v949_v53 = vsel %vm946_vm3, %v5229_v12, %v948_v1  ;;  %4618 = vmatprep.mubr.msk.bf16.mxu0 %vm2083_vm0, %v5191_v4  ;;  %v454_v12 = vld [vmem:[%s5100_s13 + $0x20] sm:$0xf] }
 0x12e   : > { %v4561_v15 = vcombine.low %v909_v50, %v951_v16  ;;  %v851_v58 = vrot.slane %v5551_v33, 4  ;;  %v850_v26 = vrot.slane %v843_v5, 4  ;;  %v4560_v17 = vcombine.high %v907_v55, %v949_v53 }
 0x12f   : > { %552 = vrot.lane.b32.xlu0 %v538_v62, %s7191_s22  ;;  %v4562_v46 = vcombine.high %v909_v50, %v951_v16  ;;  %v4559_v21 = vcombine.low %v907_v55, %v949_v53  ;;  %426 = vrot.lane.b32.xlu1 %v412_v8, %s7192_s21 }
 0x130   : > { %v858_v13 = vsel %vm348_vm1, %v850_v26, %v851_v58  ;;  %2155 = vmatprep.subr.bf16.mxu1 %v4560_v17  ;;  %v856_v4 = vsel %vm348_vm1, %v849_v23, %v850_v26  ;;  %v370_v17 = vld [vmem:[%s5100_s13 + $0x20] sm:$0xf] }
 0x131   : > { %v859_v1 = vsel %vm854_vm4, %v843_v5, %v858_v13  ;;  %2198 = vmatprep.subr.bf16.mxu0 %v4562_v46  ;;  %v5572_v50 = vpop.permute.xlu1 %760  ;;  %2156 = vmatpush1.bf16.msra.mxu1 %v4559_v21  ;;  %v759_v8 = vpop.permute.xlu0 %758  ;;  %v857_v53 = vsel %vm854_vm4, %v5245_v19, %v856_v4  ;;  %v1386_v46 = vld [vmem:[%s5100_s13 + $0x24] sm:$0xf] }
 0x132   : > { %v4553_v62 = vcombine.low %v859_v1, %v5201_v6  ;;  %v767_v16 = vrot.slane %v5572_v50, 4  ;;  %2199 = vmatpush1.bf16.msra.mxu0 %v4561_v15  ;;  %v766_v55 = vrot.slane %v759_v8, 4  ;;  %v4552_v23 = vcombine.high %v857_v53, %v871_v61 }
 0x133   : > { %468 = vrot.lane.b32.xlu0 %v454_v12, %s7193_s19  ;;  %v4554_v5 = vcombine.high %v859_v1, %v5201_v6  ;;  %v4551_v26 = vcombine.low %v857_v53, %v871_v61  ;;  %341 = vrot.lane.b32.xlu1 %v327_v39, %s7194_s10  ;;  %v1344_v39 = vld [vmem:[%s5100_s13 + $0x24] sm:$0xf] }
 0x134   : > { %2157 = vmatprep.subr.bf16.mxu1 %v4552_v23  ;;  %v774_v15 = vsel %vm348_vm1, %v766_v55, %v767_v16  ;;  %v772_v61 = vsel %vm348_vm1, %v765_v31, %v766_v55  ;;  %v1302_v1 = vld [vmem:[%s5100_s13 + $0x24] sm:$0xf] }
 0x135   : > { %2200 = vmatprep.subr.bf16.mxu0 %v4554_v5  ;;  %v5583_v19 = vpop.permute.xlu1 %802  ;;  %2158 = vmatpush1.bf16.msra.mxu1 %v4551_v26  ;;  %v801_v21 = vpop.permute.xlu0 %800  ;;  %v775_v53 = vsel %vm770_vm5, %v759_v8, %v774_v15  ;;  %v773_v23 = vsel %vm770_vm5, %v5258_v29, %v772_v61  ;;  %v1260_v8 = vld [vmem:[%s5100_s13 + $0x24] sm:$0xf] }
 0x136   : > { %v7118_v13 = vrot.slane %v5583_v19, 4  ;;  %2201 = vmatpush1.bf16.msra.mxu0 %v4553_v62  ;;  %v808_v6 = vrot.slane %v801_v21, 4 }
 0x137   : > { %384 = vrot.lane.b32.xlu0 %v370_v17, %s7195_s15  ;;  %1400 = vrot.lane.b32.xlu1 %v1386_v46, %s7196_s26 }
 0x138   : > { %v816_v12 = vsel %vm348_vm1, %v808_v6, %v7118_v13  ;;  %v814_v4 = vsel %vm348_vm1, %v807_v38, %v808_v6 }
 0x139   : > { %v817_v31 = vsel %vm812_vm6, %v801_v21, %v816_v12  ;;  %v5604_v62 = vpop.permute.xlu1 %676  ;;  %v675_v55 = vpop.permute.xlu0 %674  ;;  %v815_v5 = vsel %vm812_vm6, %v5267_v35, %v814_v4  ;;  %v1218_v21 = vld [vmem:[%s5100_s13 + $0x24] sm:$0xf] }
 0x13a   : > { %v4545_v26 = vcombine.low %v775_v53, %v817_v31  ;;  %v683_v38 = vrot.slane %v5604_v62, 4  ;;  %v682_v17 = vrot.slane %v675_v55, 4  ;;  %v4544_v46 = vcombine.high %v773_v23, %v815_v5 }
 0x13b   : > { %v4546_v6 = vcombine.high %v775_v53, %v817_v31  ;;  %v4543_v13 = vcombine.low %v773_v23, %v815_v5  ;;  %1358 = vrot.lane.b32.xlu1 %v1344_v39, %s7198_s23  ;;  %1316 = vrot.lane.b32.xlu0 %v1302_v1, %s7197_s24  ;;  %v1176_v1 = vld [vmem:[%s5100_s13 + $0x24] sm:$0xf] }
 0x13c   : > { %2159 = vmatprep.subr.bf16.mxu1 %v4544_v46  ;;  %v690_v15 = vsel %vm348_vm1, %v682_v17, %v683_v38  ;;  %v688_v4 = vsel %vm348_vm1, %v681_v45, %v682_v17  ;;  %v1134_v53 = vld [vmem:[%s5100_s13 + $0x24] sm:$0xf] }
 0x13d   : > { %2202 = vmatprep.subr.bf16.mxu0 %v4546_v6  ;;  %v5615_v29 = vpop.permute.xlu1 %718  ;;  %2160 = vmatpush1.bf16.msra.mxu1 %v4543_v13  ;;  %v717_v35 = vpop.permute.xlu0 %716  ;;  %v691_v31 = vsel %vm686_vm7, %v675_v55, %v690_v15  ;;  %v1092_v55 = vld [vmem:[%s5100_s13 + $0x24] sm:$0xf] }
 0x13e   : > { %v725_v61 = vrot.slane %v5615_v29, 4  ;;  %2203 = vmatpush1.bf16.msra.mxu0 %v4545_v26  ;;  %v724_v12 = vrot.slane %v717_v35, 4  ;;  %v689_v26 = vsel %vm686_vm7, %v5282_v43, %v688_v4 }
 0x13f   : > { %1274 = vrot.lane.b32.xlu1 %v1260_v8, %s7200_s29  ;;  %1232 = vrot.lane.b32.xlu0 %v1218_v21, %s7199_s18 }
 0x140   : > { %v732_v13 = vsel %vm348_vm1, %v724_v12, %v725_v61  ;;  %v730_v39 = vsel %vm348_vm1, %v723_v52, %v724_v12 }
 0x141   : > { %v733_v45 = vsel %vm728_vm8, %v717_v35, %v732_v13  ;;  %v5636_v23 = vpop.permute.xlu1 %592  ;;  %v591_v5 = vpop.permute.xlu0 %590  ;;  %v731_v17 = vsel %vm728_vm8, %v5289_v49, %v730_v39  ;;  %v1050_v35 = vld [vmem:[%s5100_s13 + $0x24] sm:$0xf] }
 0x142   : > { %v4537_v46 = vcombine.low %v691_v31, %v733_v45  ;;  %v599_v52 = vrot.slane %v5636_v23, 4  ;;  %v598_v6 = vrot.slane %v591_v5, 4  ;;  %v4536_v8 = vcombine.high %v689_v26, %v731_v17 }
 0x143   : > { %v4538_v21 = vcombine.high %v691_v31, %v733_v45  ;;  %v4535_v12 = vcombine.low %v689_v26, %v731_v17  ;;  %1190 = vrot.lane.b32.xlu1 %v1176_v1, %s7202_s0  ;;  %1148 = vrot.lane.b32.xlu0 %v1134_v53, %s7201_s25  ;;  %v1008_v31 = vld [vmem:[%s5100_s13 + $0x24] sm:$0xf] }
 0x144   : > { %2161 = vmatprep.subr.bf16.mxu1 %v4536_v8  ;;  %v606_v15 = vsel %vm348_vm1, %v598_v6, %v599_v52  ;;  %v604_v39 = vsel %vm348_vm1, %v597_v59, %v598_v6  ;;  %v966_v45 = vld [vmem:[%s5100_s13 + $0x24] sm:$0xf] }
 0x145   : > { %2204 = vmatprep.subr.bf16.mxu0 %v4538_v21  ;;  %v5647_v43 = vpop.permute.xlu1 %634  ;;  %2162 = vmatpush1.bf16.msra.mxu1 %v4535_v12  ;;  %v633_v49 = vpop.permute.xlu0 %632  ;;  %v607_v26 = vsel %vm7124_vm9, %v591_v5, %v606_v15  ;;  %v605_v6 = vsel %vm7124_vm9, %v5304_v57, %v604_v39  ;;  %v2284_v5 = vld [vmem:[%s7022_s2] sm:$0xff] }
 0x146   : > { %v641_v4 = vrot.slane %v5647_v43, 4  ;;  %2205 = vmatpush1.bf16.msra.mxu0 %v4537_v46  ;;  %v640_v13 = vrot.slane %v633_v49, 4  ;;  %v2312_v15 = vld [vmem:[%s7023_s3] sm:$0xff] }
 0x147   : > { %1106 = vrot.lane.b32.xlu1 %v1092_v55, %s7204_s11  ;;  %1064 = vrot.lane.b32.xlu0 %v1050_v35, %s7203_s28  ;;  %s7275_s11 = smov 9  }
 0x148   : > { %v648_v1 = vsel %vm348_vm1, %v640_v13, %v641_v4  ;;  %v646_v53 = vsel %vm348_vm1, %v639_v2, %v640_v13 }
 0x149   : > { %v649_v17 = vsel %vm7123_vm10, %v633_v49, %v648_v1  ;;  %v5668_v46 = vpop.permute.xlu1 %508  ;;  %v507_v59 = vpop.permute.xlu0 %506  ;;  %v647_v8 = vsel %vm7123_vm10, %v5311_v63, %v646_v53  ;;  %v4963_v49 = vmov 0  }
 0x14a   : > { %v4529_v21 = vcombine.low %v607_v26, %v649_v17  ;;  %v515_v12 = vrot.slane %v5668_v46, 4  ;;  %v514_v55 = vrot.slane %v507_v59, 4  ;;  %v4528_v2 = vcombine.high %v605_v6, %v647_v8  ;;  %2398 = vst [vmem:[#allocation2] sm:$0xf] %v4963_v49  ;;  %2399 = vst [vmem:[#allocation2 + $0x24] sm:$0xf] %v4963_v49  ;;  %4833 = vset.pattern.permute.xlu0 %v4963_v49 }
 0x14b   : > { %v4530_v35 = vcombine.high %v607_v26, %v649_v17  ;;  %v4527_v13 = vcombine.low %v605_v6, %v647_v8  ;;  %1022 = vrot.lane.b32.xlu1 %v1008_v31, %s7206_s17  ;;  %980 = vrot.lane.b32.xlu0 %v966_v45, %s7205_s30 }
 0x14c   : > { %2163 = vmatprep.subr.bf16.mxu1 %v4528_v2  ;;  %v522_v39 = vsel %vm348_vm1, %v514_v55, %v515_v12  ;;  %v520_v31 = vsel %vm348_vm1, %v513_v18, %v514_v55  ;;  %4834 = vset.pattern.permute.xlu1 %v4963_v49 }
 0x14d   : > { %2206 = vmatprep.subr.bf16.mxu0 %v4530_v35  ;;  %v5680_v57 = vpop.permute.xlu1 %550  ;;  %2164 = vmatpush1.bf16.msra.mxu1 %v4527_v13  ;;  %v549_v63 = vpop.permute.xlu0 %548  ;;  %v523_v17 = vsel %vm7122_vm11, %v507_v59, %v522_v39  ;;  %v521_v18 = vsel %vm7122_vm11, %v5326_v14, %v520_v31  ;;  %vm7216_vm11 = vcmask 826368  }
 0x14e   : > { %v557_v1 = vrot.slane %v5680_v57, 4  ;;  %2207 = vmatpush1.bf16.msra.mxu0 %v4529_v21  ;;  %v556_v53 = vrot.slane %v549_v63, 4  ;;  %vm7218_vm9 = vmmov %vm7216_vm11 }
 0x14f   : > { %2288 = vperm.xlu0 %4833, %v2284_v5   ;;  %2316 = vperm.xlu1 %4834, %v2312_v15  }
 0x150   : > { %v564_v45 = vsel %vm348_vm1, %v556_v53, %v557_v1  ;;  %v562_v26 = vsel %vm348_vm1, %v555_v27, %v556_v53 }
 0x151   : > { %v565_v6 = vsel %vm7121_vm12, %v549_v63, %v564_v45  ;;  %v5700_v8 = vpop.permute.xlu1 %424  ;;  %v423_v21 = vpop.permute.xlu0 %422  ;;  %v563_v55 = vsel %vm7121_vm12, %v5333_v24, %v562_v26  ;;  %vm7215_vm12 = vcmask 891904  }
 0x152   : > { %v4521_v2 = vcombine.low %v523_v17, %v565_v6  ;;  %v431_v35 = vrot.slane %v5700_v8, 4  ;;  %v430_v13 = vrot.slane %v423_v21, 4  ;;  %v4520_v5 = vcombine.high %v521_v18, %v563_v55  ;;  %vm7217_vm10 = vmmov %vm7215_vm12 }
 0x153   : > { %v4522_v27 = vcombine.high %v523_v17, %v565_v6  ;;  %v4519_v49 = vcombine.low %v521_v18, %v563_v55 }
 0x154   : > { %2165 = vmatprep.subr.bf16.mxu1 %v4520_v5  ;;  %v438_v14 = vsel %vm348_vm1, %v430_v13, %v431_v35  ;;  %v436_v39 = vsel %vm348_vm1, %v429_v37, %v430_v13 }
 0x155   : > { %2208 = vmatprep.subr.bf16.mxu0 %v4522_v27  ;;  %v5707_v59 = vpop.permute.xlu1 %466  ;;  %2166 = vmatpush1.bf16.msra.mxu1 %v4519_v49  ;;  %v465_v63 = vpop.permute.xlu0 %464  ;;  %v439_v45 = vsel %vm7215_vm12, %v423_v21, %v438_v14  ;;  %v437_v18 = vsel %vm7217_vm10, %v5348_v34, %v436_v39  ;;  %vm7220_vm10 = vcmask 900096  }
 0x156   : > { %v473_v15 = vrot.slane %v5707_v59, 4  ;;  %2209 = vmatpush1.bf16.msra.mxu0 %v4521_v2  ;;  %v472_v24 = vrot.slane %v465_v63, 4  ;;  %vm7222_vm12 = vmmov %vm7220_vm10 }
 0x158   : > { %v480_v53 = vsel %vm348_vm1, %v472_v24, %v473_v15  ;;  %v478_v31 = vsel %vm348_vm1, %v471_v47, %v472_v24 }
 0x159   : > { %v481_v26 = vsel %vm7216_vm11, %v465_v63, %v480_v53  ;;  %v5724_v17 = vpop.permute.xlu1 %339  ;;  %v338_v6 = vpop.permute.xlu0 %337  ;;  %v479_v37 = vsel %vm7218_vm9, %v5355_v42, %v478_v31  ;;  %vm7219_vm9 = vcmask 908288  }
 0x15a   : > { %v4513_v55 = vcombine.low %v439_v45, %v481_v26  ;;  %v346_v2 = vrot.slane %v5724_v17, 4  ;;  %v345_v13 = vrot.slane %v338_v6, 4  ;;  %v4512_v5 = vcombine.high %v437_v18, %v479_v37  ;;  %vm7221_vm11 = vmmov %vm7219_vm9 }
 0x15b   : > { %v4514_v27 = vcombine.high %v439_v45, %v481_v26  ;;  %v4511_v47 = vcombine.low %v437_v18, %v479_v37 }
 0x15c   : > { %2167 = vmatprep.subr.bf16.mxu1 %v4512_v5  ;;  %v354_v34 = vsel %vm348_vm1, %v345_v13, %v346_v2  ;;  %v352_v14 = vsel %vm348_vm1, %v344_v54, %v345_v13 }
 0x15d   : > { %2210 = vmatprep.subr.bf16.mxu0 %v4514_v27  ;;  %v5731_v21 = vpop.permute.xlu1 %382  ;;  %2168 = vmatpush1.bf16.msra.mxu1 %v4511_v47  ;;  %v381_v49 = vpop.permute.xlu0 %380  ;;  %v355_v53 = vsel %vm7219_vm9, %v338_v6, %v354_v34  ;;  %v353_v18 = vsel %vm7221_vm11, %v5370_v51, %v352_v14  ;;  %vm7223_vm9 = vcmask 138240   ;;  %vm7225_vm11 = vcmask 154624  }
 0x15e   : > { %v389_v63 = vrot.slane %v5731_v21, 4  ;;  %2211 = vmatpush1.bf16.msra.mxu0 %v4513_v55  ;;  %v388_v42 = vrot.slane %v381_v49, 4 }
 0x160   : > { %v396_v24 = vsel %vm348_vm1, %v388_v42, %v389_v63  ;;  %v394_v39 = vsel %vm348_vm1, %v387_v0, %v388_v42 }
 0x161   : > { %v397_v31 = vsel %vm7220_vm10, %v381_v49, %v396_v24  ;;  %v5748_v45 = vpop.permute.xlu1 %1398  ;;  %v1397_v26 = vpop.permute.xlu0 %1396  ;;  %v395_v54 = vsel %vm7222_vm12, %v5377_v60, %v394_v39  ;;  %vm7224_vm10 = vmmov %vm7223_vm9  ;;  %vm7226_vm12 = vcmask 146432  }
 0x162   : > { %v4505_v37 = vcombine.low %v355_v53, %v397_v31  ;;  %v1405_v55 = vrot.slane %v5748_v45, 4  ;;  %v1404_v13 = vrot.slane %v1397_v26, 4  ;;  %v4504_v5 = vcombine.high %v353_v18, %v395_v54 }
 0x163   : > { %v4506_v27 = vcombine.high %v355_v53, %v397_v31  ;;  %v4503_v0 = vcombine.low %v353_v18, %v395_v54 }
 0x164   : > { %v1410_v6 = vsel %vm348_vm1, %v1403_v20, %v1404_v13  ;;  %v1412_v47 = vsel %vm348_vm1, %v1404_v13, %v1405_v55  ;;  %2169 = vmatprep.subr.bf16.mxu1 %v4504_v5 }
 0x165   : > { %v1413_v51 = vsel %vm7223_vm9, %v1397_v26, %v1412_v47  ;;  %2212 = vmatprep.subr.bf16.mxu0 %v4506_v27  ;;  %v5762_v60 = vpop.permute.xlu1 %1314  ;;  %2170 = vmatpush1.bf16.msra.mxu1 %v4503_v0  ;;  %v1313_v49 = vpop.permute.xlu0 %1312  ;;  %v1411_v34 = vsel %vm7224_vm10, %v5392_v11, %v1410_v6  ;;  %vm7227_vm9 = vmmov %vm7225_vm11 }
 0x166   : > { %v4609_v42 = vcombine.low %v1413_v51, %v1413_v51  ;;  %v4610_v14 = vcombine.high %v1413_v51, %v1413_v51  ;;  %v1321_v24 = vrot.slane %v5762_v60, 4  ;;  %2213 = vmatpush1.bf16.msra.mxu0 %v4505_v37  ;;  %v1320_v20 = vrot.slane %v1313_v49, 4  ;;  %vm7228_vm10 = vmmov %vm7226_vm12 }
 0x167   : > { %v4608_v39 = vcombine.high %v1411_v34, %v1411_v34  ;;  %v4607_v53 = vcombine.low %v1411_v34, %v1411_v34 }
 0x168   : > { %4617 = vmatprep.subr.msk.bf16.mxu0 %vm348_vm1, %v4610_v14  ;;  %v2101_v31 = vsel %vm348_vm1, %v4609_v42, 0  ;;  %v1328_v11 = vsel %vm348_vm1, %v1320_v20, %v1321_v24  ;;  %v1326_v5 = vsel %vm348_vm1, %v1319_v36, %v1320_v20 }
 0x169   : > { %4615 = vmatprep.subr.msk.bf16.mxu1 %vm348_vm1, %v4608_v39  ;;  %v5770_v26 = vpop.permute.xlu1 %1356  ;;  %v2095_v18 = vsel %vm348_vm1, %v4607_v53, 0  ;;  %v1355_v54 = vpop.permute.xlu0 %1354  ;;  %v1329_v6 = vsel %vm7225_vm11, %v1313_v49, %v1328_v11  ;;  %v1327_v42 = vsel %vm7227_vm9, %v5403_v30, %v1326_v5  ;;  %v7229_v11 = vrot.slane %v5427_v56, 4 }
 0x16a   : > { %v1363_v37 = vrot.slane %v5770_v26, 4  ;;  %2176 = vmatpush2.bf16.msra.mxu1 %v2095_v18  ;;  %2219 = vmatpush2.bf16.msra.mxu0 %v2101_v31  ;;  %v1362_v13 = vrot.slane %v1355_v54, 4  ;;  %vm7231_vm11 = vcmask 220160   ;;  %vm7235_vm9 = vcmask 302080  }
 0x16c   : > { %v1370_v27 = vsel %vm348_vm1, %v1362_v13, %v1363_v37  ;;  %v1368_v0 = vsel %vm348_vm1, %v1361_v7, %v1362_v13 }
 0x16d   : > { %v1371_v47 = vsel %vm7226_vm12, %v1355_v54, %v1370_v27  ;;  %v5788_v51 = vpop.permute.xlu1 %1230  ;;  %v1229_v34 = vpop.permute.xlu0 %1228  ;;  %v1369_v36 = vsel %vm7228_vm10, %v5412_v44, %v1368_v0  ;;  %v7230_v27 = vrot.slane %v5434_v9, 4  ;;  %vm7232_vm12 = vmmov %vm7231_vm11  ;;  %vm7236_vm10 = vcmask 236544  }
 0x16e   : > { %v4601_v14 = vcombine.low %v1329_v6, %v1371_v47  ;;  %v7125_v20 = vrot.slane %v5788_v51, 4  ;;  %v1236_v39 = vrot.slane %v1229_v34, 4  ;;  %v4600_v53 = vcombine.high %v1327_v42, %v1369_v36 }
 0x16f   : > { %v4602_v31 = vcombine.high %v1329_v6, %v1371_v47  ;;  %v4599_v7 = vcombine.low %v1327_v42, %v1369_v36 }
 0x170   : > { %2177 = vmatprep.subr.bf16.mxu1 %v4600_v53  ;;  %v1244_v30 = vsel %vm348_vm1, %v1236_v39, %v7125_v20  ;;  %v1242_v13 = vsel %vm348_vm1, %v7229_v11, %v1236_v39 }
 0x171   : > { %2220 = vmatprep.subr.bf16.mxu0 %v4602_v31  ;;  %v5795_v49 = vpop.permute.xlu1 %1272  ;;  %2178 = vmatpush2.bf16.msra.mxu1 %v4599_v7  ;;  %v1271_v18 = vpop.permute.xlu0 %1270  ;;  %v1245_v6 = vsel %vm1240_vm15, %v1229_v34, %v1244_v30 }
 0x172   : > { %v7132_v54 = vrot.slane %v5795_v49, 4  ;;  %2221 = vmatpush2.bf16.msra.mxu0 %v4601_v14  ;;  %v1278_v44 = vrot.slane %v1271_v18, 4  ;;  %v1243_v14 = vsel %vm1240_vm15, %v5427_v56, %v1242_v13  ;;  %v7233_v13 = vrot.slane %v5449_v32, 4 }
 0x174   : > { %v1286_v5 = vsel %vm348_vm1, %v1278_v44, %v7132_v54  ;;  %v1284_v0 = vsel %vm348_vm1, %v7230_v27, %v1278_v44  ;;  %v7234_v27 = vrot.slane %v5456_v48, 4 }
 0x175   : > { %v1287_v47 = vsel %vm7231_vm11, %v1271_v18, %v1286_v5  ;;  %v5812_v42 = vpop.permute.xlu1 %1146  ;;  %v1145_v36 = vpop.permute.xlu0 %1144  ;;  %v1285_v39 = vsel %vm7232_vm12, %v5434_v9, %v1284_v0  ;;  %vm7237_vm11 = vmmov %vm7235_vm9 }
 0x176   : > { %v4593_v53 = vcombine.low %v1245_v6, %v1287_v47  ;;  %v7126_v31 = vrot.slane %v5812_v42, 4  ;;  %v1152_v7 = vrot.slane %v1145_v36, 4  ;;  %v4592_v11 = vcombine.high %v1243_v14, %v1285_v39  ;;  %vm7238_vm12 = vmmov %vm7236_vm10 }
 0x177   : > { %v4594_v20 = vcombine.high %v1245_v6, %v1287_v47  ;;  %v4591_v44 = vcombine.low %v1243_v14, %v1285_v39 }
 0x178   : > { %2179 = vmatprep.subr.bf16.mxu1 %v4592_v11  ;;  %v1160_v56 = vsel %vm348_vm1, %v1152_v7, %v7126_v31  ;;  %v1158_v5 = vsel %vm348_vm1, %v7233_v13, %v1152_v7 }
 0x179   : > { %2222 = vmatprep.subr.bf16.mxu0 %v4594_v20  ;;  %v5819_v34 = vpop.permute.xlu1 %1188  ;;  %2180 = vmatpush2.bf16.msra.mxu1 %v4591_v44  ;;  %v1187_v18 = vpop.permute.xlu0 %1186  ;;  %v1161_v6 = vsel %vm7235_vm9, %v1145_v36, %v1160_v56  ;;  %vm7241_vm9 = vcmask 318464  }
 0x17a   : > { %v7127_v30 = vrot.slane %v5819_v34, 4  ;;  %2223 = vmatpush2.bf16.msra.mxu0 %v4593_v53  ;;  %v1194_v9 = vrot.slane %v1187_v18, 4  ;;  %v1159_v53 = vsel %vm7237_vm11, %v5449_v32, %v1158_v5  ;;  %v7239_v5 = vrot.slane %v5471_v3, 4  ;;  %vm7243_vm11 = vmmov %vm7241_vm9 }
 0x17c   : > { %v1202_v20 = vsel %vm348_vm1, %v1194_v9, %v7127_v30  ;;  %v1200_v0 = vsel %vm348_vm1, %v7234_v27, %v1194_v9 }
 0x17d   : > { %v1203_v47 = vsel %vm7236_vm10, %v1187_v18, %v1202_v20  ;;  %v5836_v14 = vpop.permute.xlu1 %1062  ;;  %v1061_v39 = vpop.permute.xlu0 %1060  ;;  %v1201_v7 = vsel %vm7238_vm12, %v5456_v48, %v1200_v0  ;;  %vm7242_vm10 = vcmask 310272  }
 0x17e   : > { %v4585_v11 = vcombine.low %v1161_v6, %v1203_v47  ;;  %v7128_v44 = vrot.slane %v5836_v14, 4  ;;  %v1068_v13 = vrot.slane %v1061_v39, 4  ;;  %v4584_v31 = vcombine.high %v1159_v53, %v1201_v7  ;;  %vm7244_vm12 = vmmov %vm7242_vm10 }
 0x17f   : > { %v4586_v30 = vcombine.high %v1161_v6, %v1203_v47  ;;  %v4583_v9 = vcombine.low %v1159_v53, %v1201_v7 }
 0x180   : > { %2181 = vmatprep.subr.bf16.mxu1 %v4584_v31  ;;  %v1076_v32 = vsel %vm348_vm1, %v1068_v13, %v7128_v44  ;;  %v1074_v20 = vsel %vm348_vm1, %v7239_v5, %v1068_v13 }
 0x181   : > { %2224 = vmatprep.subr.bf16.mxu0 %v4586_v30  ;;  %v5843_v36 = vpop.permute.xlu1 %1104  ;;  %2182 = vmatpush2.bf16.msra.mxu1 %v4583_v9  ;;  %v1103_v18 = vpop.permute.xlu0 %1102  ;;  %v7240_v30 = vrot.slane %v5480_v40, 4  ;;  %v1077_v0 = vsel %vm7241_vm9, %v1061_v39, %v1076_v32  ;;  %v1075_v7 = vsel %vm7243_vm11, %v5471_v3, %v1074_v20  ;;  %v7245_v20 = vrot.slane %v5495_v22, 4 }
 0x182   : > { %v7129_v56 = vrot.slane %v5843_v36, 4  ;;  %2225 = vmatpush2.bf16.msra.mxu0 %v4585_v11  ;;  %v1110_v48 = vrot.slane %v1103_v18, 4  ;;  %vm7250_vm9 = vcmask 744448   ;;  %vm7252_vm11 = vcmask 818176  }
 0x184   : > { %v1118_v31 = vsel %vm348_vm1, %v1110_v48, %v7129_v56  ;;  %v1116_v27 = vsel %vm348_vm1, %v7240_v30, %v1110_v48 }
 0x185   : > { %v1119_v6 = vsel %vm7242_vm10, %v1103_v18, %v1118_v31  ;;  %v5860_v47 = vpop.permute.xlu1 %978  ;;  %v977_v53 = vpop.permute.xlu0 %976  ;;  %v1117_v11 = vsel %vm7244_vm12, %v5480_v40, %v1116_v27  ;;  %vm7251_vm10 = vcmask 736256   ;;  %vm7253_vm12 = vcmask 809984  }
 0x186   : > { %v4577_v13 = vcombine.low %v1077_v0, %v1119_v6  ;;  %v7130_v9 = vrot.slane %v5860_v47, 4  ;;  %v984_v5 = vrot.slane %v977_v53, 4  ;;  %v4576_v44 = vcombine.high %v1075_v7, %v1117_v11 }
 0x187   : > { %v4578_v56 = vcombine.high %v1077_v0, %v1119_v6  ;;  %v4575_v48 = vcombine.low %v1075_v7, %v1117_v11 }
 0x188   : > { %2183 = vmatprep.subr.bf16.mxu1 %v4576_v44  ;;  %v992_v3 = vsel %vm348_vm1, %v984_v5, %v7130_v9  ;;  %v990_v31 = vsel %vm348_vm1, %v7245_v20, %v984_v5 }
 0x189   : > { %2226 = vmatprep.subr.bf16.mxu0 %v4578_v56  ;;  %v5867_v39 = vpop.permute.xlu1 %1020  ;;  %2184 = vmatpush2.bf16.msra.mxu1 %v4575_v48  ;;  %v1019_v18 = vpop.permute.xlu0 %1018  ;;  %v7246_v56 = vrot.slane %v5502_v10, 4  ;;  %v993_v27 = vsel %vm988_vm14, %v977_v53, %v992_v3  ;;  %v991_v11 = vsel %vm988_vm14, %v5495_v22, %v990_v31 }
 0x18a   : > { %v7131_v32 = vrot.slane %v5867_v39, 4  ;;  %2227 = vmatpush2.bf16.msra.mxu0 %v4577_v13  ;;  %v1026_v40 = vrot.slane %v1019_v18, 4 }
 0x18c   : > { %v1034_v44 = vsel %vm348_vm1, %v1026_v40, %v7131_v32  ;;  %v1032_v30 = vsel %vm348_vm1, %v7246_v56, %v1026_v40  ;;  %v7247_v40 = vrot.slane %v5529_v41, 4 }
 0x18d   : > { %v1035_v0 = vsel %vm1030_vm13, %v1019_v18, %v1034_v44  ;;  %v939_v6 = vpop.permute.xlu1 %938  ;;  %v897_v7 = vpop.permute.xlu0 %896  ;;  %v1033_v13 = vsel %vm1030_vm13, %v5502_v10, %v1032_v30  ;;  %v7248_v18 = vrot.slane %v5517_v28, 4 }
 0x18e   : > { %v4569_v5 = vcombine.low %v993_v27, %v1035_v0  ;;  %v944_v48 = vrot.slane %v939_v6, 4  ;;  %v902_v20 = vrot.slane %v897_v7, 4  ;;  %v4568_v9 = vcombine.high %v991_v11, %v1033_v13  ;;  %v873_v6 = vld [vmem:[%s5100_s13 + $0x1c] sm:$0xff]  ;;  %s7276_s13 = smov 89  }
 0x18f   : > { %v4570_v32 = vcombine.high %v993_v27, %v1035_v0  ;;  %v4567_v54 = vcombine.low %v991_v11, %v1033_v13 }
 0x190   : > { %v952_v53 = vsel %vm348_vm1, %v7247_v40, %v944_v48  ;;  %v910_v3 = vsel %vm348_vm1, %v7248_v18, %v902_v20  ;;  %2185 = vmatprep.subr.bf16.mxu1 %v4568_v9 }
 0x191   : > { %2228 = vmatprep.subr.bf16.mxu0 %v4570_v32  ;;  %v763_v22 = vpop.permute.xlu1 %762  ;;  %2186 = vmatpush2.bf16.msra.mxu1 %v4567_v54  ;;  %v847_v10 = vpop.permute.xlu0 %846  ;;  %v911_v31 = vsel %vm904_vm2, %v5517_v28, %v910_v3  ;;  %v953_v44 = vsel %vm946_vm3, %v5529_v41, %v952_v53 }
 0x192   : > { %v768_v56 = vrot.slane %v763_v22, 4  ;;  %2229 = vmatpush2.bf16.msra.mxu0 %v4569_v5  ;;  %v852_v30 = vrot.slane %v847_v10, 4  ;;  %v4563_v27 = vcombine.low %v911_v31, %v953_v44  ;;  %v4564_v0 = vcombine.high %v911_v31, %v953_v44 }
 0x194   : > { %v860_v9 = vsel %vm348_vm1, %v851_v58, %v852_v30  ;;  %2188 = vmatmul.mubr.bf16.vlgmr.msra.gmra.mxu1 %v5527_v25  ;;  %2241 = vmatprep.subr.bf16.mxu1 %v4564_v0  ;;  %v776_v28 = vsel %vm348_vm1, %v767_v16, %v768_v56  ;;  %v4840_v58 = vld [vmem:[%s7188_s1 + $0x4] ss:$8 sps:$4 sm:$0xff]   ;;  %v7249_v16 = vrot.slane %v5583_v19, 4 }
 0x195   : > { %2231 = vmatmul.mubr.bf16.vlgmr.msra.gmra.mxu0 %v5527_v25  ;;  %2242 = vmatpush1.bf16.msra.mxu1 %v4563_v27  ;;  %v805_v41 = vpop.permute.xlu0 %804  ;;  %v679_v54 = vpop.permute.xlu1 %678  ;;  %v861_v32 = vsel %vm854_vm4, %v5551_v33, %v860_v9  ;;  %v777_v20 = vsel %vm770_vm5, %v5572_v50, %v776_v28 }
 0x196   : > { %v810_v7 = vrot.slane %v805_v41, 4  ;;  %v684_v11 = vrot.slane %v679_v54, 4  ;;  %v4555_v13 = vcombine.low %v861_v32, %v873_v6  ;;  %v4556_v5 = vcombine.high %v861_v32, %v873_v6  ;;  %4620 = vmatprep.mubr.msk.bf16.mxu1 %vm2083_vm0, %v4840_v58 }
 0x198   : > { %v818_v25 = vsel %vm348_vm1, %v7249_v16, %v810_v7  ;;  %2243 = vmatprep.subr.bf16.mxu1 %v4556_v5  ;;  %v692_v48 = vsel %vm348_vm1, %v683_v38, %v684_v11 }
 0x199   : > { %2244 = vmatpush1.bf16.msra.mxu1 %v4555_v13  ;;  %v721_v33 = vpop.permute.xlu0 %720  ;;  %v819_v40 = vsel %vm812_vm6, %v5583_v19, %v818_v25  ;;  %v595_v53 = vpop.permute.xlu1 %594  ;;  %v693_v50 = vsel %vm686_vm7, %v5604_v62, %v692_v48 }
 0x19a   : > { %v726_v18 = vrot.slane %v721_v33, 4  ;;  %v4547_v3 = vcombine.low %v777_v20, %v819_v40  ;;  %v4548_v22 = vcombine.high %v777_v20, %v819_v40  ;;  %v600_v10 = vrot.slane %v595_v53, 4 }
 0x19c   : > { %v734_v31 = vsel %vm348_vm1, %v725_v61, %v726_v18  ;;  %2245 = vmatprep.subr.bf16.mxu1 %v4548_v22  ;;  %v608_v38 = vsel %vm348_vm1, %v599_v52, %v600_v10 }
 0x19d   : > { %2246 = vmatpush1.bf16.msra.mxu1 %v4547_v3  ;;  %v637_v44 = vpop.permute.xlu0 %636  ;;  %v735_v19 = vsel %vm728_vm8, %v5615_v29, %v734_v31  ;;  %v511_v56 = vpop.permute.xlu1 %510  ;;  %v609_v61 = vsel %vm7250_vm9, %v5636_v23, %v608_v38  ;;  %vm7254_vm9 = vcmask 891904  }
 0x19e   : > { %v642_v30 = vrot.slane %v637_v44, 4  ;;  %v4539_v27 = vcombine.low %v693_v50, %v735_v19  ;;  %v4540_v0 = vcombine.high %v693_v50, %v735_v19  ;;  %v516_v6 = vrot.slane %v511_v56, 4 }
 0x1a0   : > { %v650_v52 = vsel %vm348_vm1, %v641_v4, %v642_v30  ;;  %2247 = vmatprep.subr.bf16.mxu1 %v4540_v0  ;;  %v524_v62 = vsel %vm348_vm1, %v515_v12, %v516_v6 }
 0x1a1   : > { %2248 = vmatpush1.bf16.msra.mxu1 %v4539_v27  ;;  %v553_v9 = vpop.permute.xlu0 %552  ;;  %v651_v29 = vsel %vm7251_vm10, %v5647_v43, %v650_v52  ;;  %v427_v28 = vpop.permute.xlu1 %426  ;;  %v525_v23 = vsel %vm7252_vm11, %v5668_v46, %v524_v62  ;;  %vm7255_vm10 = vcmask 826368   ;;  %vm7256_vm11 = vcmask 908288  }
 0x1a2   : > { %v558_v41 = vrot.slane %v553_v9, 4  ;;  %v4531_v54 = vcombine.low %v609_v61, %v651_v29  ;;  %v4532_v32 = vcombine.high %v609_v61, %v651_v29  ;;  %v432_v7 = vrot.slane %v427_v28, 4 }
 0x1a3   : > { %v7261_v61 = vrot.slane %v5795_v49, 4  ;;  %v7262_v52 = vrot.slane %v5788_v51, 4 }
 0x1a4   : > { %v566_v4 = vsel %vm348_vm1, %v557_v1, %v558_v41  ;;  %2249 = vmatprep.subr.bf16.mxu1 %v4532_v32  ;;  %v440_v12 = vsel %vm348_vm1, %v431_v35, %v432_v7  ;;  %v7264_v7 = vrot.slane %v5819_v34, 4 }
 0x1a5   : > { %2250 = vmatpush1.bf16.msra.mxu1 %v4531_v54  ;;  %v469_v11 = vpop.permute.xlu0 %468  ;;  %v567_v43 = vsel %vm7253_vm12, %v5680_v57, %v566_v4  ;;  %v342_v13 = vpop.permute.xlu1 %341  ;;  %v441_v46 = vsel %vm7254_vm9, %v5700_v8, %v440_v12  ;;  %vm7257_vm12 = vcmask 900096   ;;  %vm7258_vm9 = vcmask 138240  }
 0x1a6   : > { %v474_v5 = vrot.slane %v469_v11, 4  ;;  %v4523_v58 = vcombine.low %v525_v23, %v567_v43  ;;  %v4524_v16 = vcombine.high %v525_v23, %v567_v43  ;;  %v347_v25 = vrot.slane %v342_v13, 4 }
 0x1a7   : > { %v7265_v4 = vrot.slane %v5812_v42, 4 }
 0x1a8   : > { %v482_v1 = vsel %vm348_vm1, %v473_v15, %v474_v5  ;;  %2251 = vmatprep.subr.bf16.mxu1 %v4524_v16  ;;  %v356_v35 = vsel %vm348_vm1, %v346_v2, %v347_v25  ;;  %v7268_v25 = vrot.slane %v5843_v36, 4 }
 0x1a9   : > { %2252 = vmatpush1.bf16.msra.mxu1 %v4523_v58  ;;  %v385_v48 = vpop.permute.xlu0 %384  ;;  %v483_v57 = vsel %vm7255_vm10, %v5707_v59, %v482_v1  ;;  %v1401_v33 = vpop.permute.xlu1 %1400  ;;  %v357_v8 = vsel %vm7256_vm11, %v5724_v17, %v356_v35  ;;  %vm7259_vm10 = vcmask 154624   ;;  %vm7260_vm11 = vcmask 146432  }
 0x1aa   : > { %v390_v20 = vrot.slane %v385_v48, 4  ;;  %v4515_v40 = vcombine.low %v441_v46, %v483_v57  ;;  %v4516_v53 = vcombine.high %v441_v46, %v483_v57  ;;  %v1406_v18 = vrot.slane %v1401_v33, 4 }
 0x1ab   : > { %v7269_v1 = vrot.slane %v5836_v14, 4 }
 0x1ac   : > { %v398_v15 = vsel %vm348_vm1, %v389_v63, %v390_v20  ;;  %2253 = vmatprep.subr.bf16.mxu1 %v4516_v53  ;;  %v1414_v2 = vsel %vm348_vm1, %v1405_v55, %v1406_v18  ;;  %v7272_v18 = vrot.slane %v5867_v39, 4 }
 0x1ad   : > { %2254 = vmatpush1.bf16.msra.mxu1 %v4515_v40  ;;  %v399_v59 = vsel %vm7257_vm12, %v5731_v21, %v398_v15  ;;  %v1359_v3 = vpop.permute.xlu1 %1358  ;;  %v1317_v22 = vpop.permute.xlu0 %1316  ;;  %v1415_v10 = vsel %vm7258_vm9, %v5748_v45, %v1414_v2  ;;  %vm7263_vm12 = vcmask 220160   ;;  %vm7266_vm9 = vcmask 302080  }
 0x1ae   : > { %v4507_v31 = vcombine.low %v357_v8, %v399_v59  ;;  %v4508_v17 = vcombine.high %v357_v8, %v399_v59  ;;  %v1364_v38 = vrot.slane %v1359_v3, 4  ;;  %v1322_v44 = vrot.slane %v1317_v22, 4 }
 0x1af   : > { %v4612_v50 = vcombine.high %v1415_v10, %v1415_v10  ;;  %v4611_v63 = vcombine.low %v1415_v10, %v1415_v10  ;;  %v7273_v15 = vrot.slane %v5860_v47, 4  ;;  %v4841_v10 = vld [vmem:[%s7188_s1] ss:$8 sps:$4 sm:$0xff]  }
 0x1b0   : > { %2255 = vmatprep.subr.bf16.mxu1 %v4508_v17  ;;  %v1372_v55 = vsel %vm348_vm1, %v1363_v37, %v1364_v38  ;;  %v1330_v21 = vsel %vm348_vm1, %v1321_v24, %v1322_v44 }
 0x1b1   : > { %2256 = vmatpush1.bf16.msra.mxu1 %v4507_v31  ;;  %v1275_v19 = vpop.permute.xlu1 %1274  ;;  %v1233_v56 = vpop.permute.xlu0 %1232  ;;  %v1331_v45 = vsel %vm7259_vm10, %v5762_v60, %v1330_v21  ;;  %v1373_v30 = vsel %vm7260_vm11, %v5770_v26, %v1372_v55  ;;  %v2107_v0 = vsel %vm348_vm1, %v4611_v63, 0  ;;  %vm7267_vm10 = vcmask 236544  }
 0x1b2   : > { %4619 = vmatprep.subr.msk.bf16.mxu1 %vm348_vm1, %v4612_v50  ;;  %v1280_v27 = vrot.slane %v1275_v19, 4  ;;  %v1238_v6 = vrot.slane %v1233_v56, 4  ;;  %v4604_v37 = vcombine.high %v1331_v45, %v1373_v30  ;;  %v4603_v60 = vcombine.low %v1331_v45, %v1373_v30  ;;  %v3022_v45 = vld [vmem:[#allocation2 + $0x24] sm:$0xf] }
 0x1b3   : > { %vm7270_vm11 = vcmask 318464   ;;  %v2350_v31 = vlaneseq }
 0x1b4   : > { %v1288_v24 = vsel %vm348_vm1, %v7261_v61, %v1280_v27  ;;  %v1246_v62 = vsel %vm348_vm1, %v7262_v52, %v1238_v6 }
 0x1b5   : > { %2262 = vmatpush2.bf16.msra.mxu1 %v2107_v0  ;;  %v1191_v9 = vpop.permute.xlu1 %1190  ;;  %v1149_v29 = vpop.permute.xlu0 %1148  ;;  %v1247_v26 = vsel %vm1240_vm15, %v5788_v51, %v1246_v62  ;;  %v1289_v28 = vsel %vm7263_vm12, %v5795_v49, %v1288_v24  ;;  %vm7271_vm12 = vcmask 310272   ;;  %v2351_v17 = vshrl.u32 %v2350_v31, 7 }
 0x1b6   : > { %2263 = vmatprep.subr.bf16.mxu1 %v4604_v37  ;;  %v1196_v41 = vrot.slane %v1191_v9, 4  ;;  %v1154_v54 = vrot.slane %v1149_v29, 4  ;;  %v4596_v32 = vcombine.high %v1247_v26, %v1289_v28  ;;  %v4595_v11 = vcombine.low %v1247_v26, %v1289_v28 }
 0x1b7   : > { %v2360_v38 = vsub.s32 2, %v2351_v17  ;;  %v2368_v44 = vsub.s32 4, %v2351_v17  ;;  %v2364_v55 = vsub.s32 3, %v2351_v17  ;;  %v2372_v21 = vsub.s32 5, %v2351_v17 }
 0x1b8   : > { %v1204_v23 = vsel %vm348_vm1, %v7264_v7, %v1196_v41  ;;  %v1162_v12 = vsel %vm348_vm1, %v7265_v4, %v1154_v54  ;;  %v2352_v27 = vsub.s32 0, %v2351_v17  ;;  %v2356_v61 = vsub.s32 1, %v2351_v17 }
 0x1b9   : > { %2264 = vmatpush2.bf16.msra.mxu1 %v4603_v60  ;;  %v1107_v43 = vpop.permute.xlu1 %1106  ;;  %v1065_v13 = vpop.permute.xlu0 %1064  ;;  %v1163_v51 = vsel %vm7266_vm9, %v5812_v42, %v1162_v12  ;;  %v1205_v49 = vsel %vm7267_vm10, %v5819_v34, %v1204_v23  ;;  %v2376_v7 = vsub.s32 6, %v2351_v17  ;;  %v2380_v4 = vsub.s32 7, %v2351_v17 }
 0x1ba   : > { %2265 = vmatprep.subr.bf16.mxu1 %v4596_v32  ;;  %v1112_v5 = vrot.slane %v1107_v43, 4  ;;  %v1070_v58 = vrot.slane %v1065_v13, 4  ;;  %v4588_v16 = vcombine.high %v1163_v51, %v1205_v49  ;;  %v4587_v48 = vcombine.low %v1163_v51, %v1205_v49 }
 0x1bb   : > { %vm7280_vm9 = vcmask 744448   ;;  %vm7281_vm10 = vcmask 736256  }
 0x1bc   : > { %v1120_v46 = vsel %vm348_vm1, %v7268_v25, %v1112_v5  ;;  %v1078_v35 = vsel %vm348_vm1, %v7269_v1, %v1070_v58 }
 0x1bd   : > { %2266 = vmatpush2.bf16.msra.mxu1 %v4595_v11  ;;  %v1023_v57 = vpop.permute.xlu1 %1022  ;;  %v981_v33 = vpop.permute.xlu0 %980  ;;  %v1079_v42 = vsel %vm7270_vm11, %v5836_v14, %v1078_v35  ;;  %v1121_v34 = vsel %vm7271_vm12, %v5843_v36, %v1120_v46  ;;  %vm7282_vm11 = vcmask 818176   ;;  %vm7283_vm12 = vcmask 809984  }
 0x1be   : > { %2267 = vmatprep.subr.bf16.mxu1 %v4588_v16  ;;  %v1028_v20 = vrot.slane %v1023_v57, 4  ;;  %v986_v40 = vrot.slane %v981_v33, 4  ;;  %v4580_v53 = vcombine.high %v1079_v42, %v1121_v34  ;;  %v4579_v59 = vcombine.low %v1079_v42, %v1121_v34 }
 0x1c0   : > { %v1036_v8 = vsel %vm348_vm1, %v7272_v18, %v1028_v20  ;;  %v994_v2 = vsel %vm348_vm1, %v7273_v15, %v986_v40 }
 0x1c1   : > { %2268 = vmatpush2.bf16.msra.mxu1 %v4587_v48  ;;  %v995_v14 = vsel %vm988_vm14, %v5860_v47, %v994_v2  ;;  %v1037_v36 = vsel %vm1030_vm13, %v5867_v39, %v1036_v8  ;;  %v2348_v47 = vld [vmem:[%s7274_s7] sm:$0xff]  ;;  %s7279_s7 = sld [smem:[#allocation23_spill]] }
 0x1c2   : > { %2269 = vmatprep.subr.bf16.mxu1 %v4580_v53  ;;  %v4572_v3 = vcombine.high %v995_v14, %v1037_v36  ;;  %v4571_v22 = vcombine.low %v995_v14, %v1037_v36  ;;  %v2981_v39 = vld [vmem:[#allocation2 + $0x24] sm:$0xf]  ;;  %v2361_v50 = vrot.slane %v2348_v47, %v2360_v38  ;;  %v2369_v63 = vrot.slane %v2348_v47, %v2368_v44 }
 0x1c3   : > { %2995 = vrot.lane.b32.xlu0 %v2981_v39, %s7208_s8  ;;  %v2365_v19 = vrot.slane %v2348_v47, %v2364_v55  ;;  %v2373_v56 = vrot.slane %v2348_v47, %v2372_v21  ;;  %v2353_v60 = vrot.slane %v2348_v47, %v2352_v27  ;;  %v2357_v26 = vrot.slane %v2348_v47, %v2356_v61 }
 0x1c4   : > { %v6048_v23 = vrot.slane %v2348_v47, %v2376_v7  ;;  %v6050_v12 = vrot.slane %v2348_v47, %v2380_v4 }
 0x1c5   : > { %2270 = vmatpush2.bf16.msra.mxu1 %v4579_v59 }
 0x1c6   : > { %2271 = vmatprep.subr.bf16.mxu1 %v4572_v3 }
 0x1c7   : > { %3036 = vrot.lane.b32.xlu0 %v3022_v45, %s7207_s27  ;;  %v6160_v21 = vld [vmem:[%s7279_s7] sm:$0xff] }
 0x1c9   : > { %2272 = vmatpush2.bf16.msra.mxu1 %v4571_v22 }
 0x1ca   : > { %v6035_v30 = vpop.permute.xlu0 %2288  ;;  %v6037_v6 = vpop.permute.xlu1 %2316 }
 0x1cc   : > { %2274 = vmatmul.mubr.bf16.vlgmr.msra.gmra.mxu1 %v4841_v10 }
 0x1ec   : > { %v2146_v0 = vpop.f32.mrf.mxu0 }
 0x1ed   : > { %v2296_v37 = vmul.f32 %v6035_v30, %v2146_v0 }
 0x1ee   : > { %v2148_v24 = vpop.f32.mrf.mxu0 }
 0x1ef   : > { %v2297_v52 = vmul.f32 %v6035_v30, %v2148_v24  ;;  %v2324_v62 = vadd.f32 %v6037_v6, %v2296_v37 }
 0x1f0   : > { %v6052_v11 = vpop.f32.mrf.mxu0 }
 0x1f1   : > { %v2325_v9 = vadd.f32 %v6037_v6, %v2297_v52  ;;  %v2340_v29 = vmax.f32 %v2324_v62, 0.0 }
 0x1f2   : > { %v6054_v43 = vpop.f32.mrf.mxu0 }
 0x1f3   : > { %v2341_v28 = vmax.f32 %v2325_v9, 0.0  ;;  %v2390_v41 = vmul.f32 %v2353_v60, %v2340_v29 }
 0x1f5   : > { %v2391_v54 = vmul.f32 %v2357_v26, %v2341_v28 }
 0x1f7   : > { %v6043_v32 = vpack.c.bf16 %v2391_v54, %v2390_v41 }
 0x1f9   : > { %2432 = vst [vmem:[#allocation2 + $0x4] sm:$0xff] %v6043_v32  ;;  %2987 = vrot.lane.b32.xlu1 %v6043_v32, %s7208_s8 }
 0x200   : > { %v2928_v59 = vld [vmem:[#allocation2] sm:$0xff] }
 0x254   : > { %v2189_v13 = vpop.f32.mrf.mxu1 }
 0x255   : > { %v2298_v51 = vmul.f32 %v6035_v30, %v2189_v13  ;;  %v2232_v49 = vpop.f32.mrf.mxu0 }
 0x256   : > { %v2300_v5 = vmul.f32 %v6035_v30, %v2232_v49  ;;  %v2191_v58 = vpop.f32.mrf.mxu1 }
 0x257   : > { %v2326_v16 = vadd.f32 %v6037_v6, %v2298_v51  ;;  %v2299_v25 = vmul.f32 %v6035_v30, %v2191_v58  ;;  %v2234_v46 = vpop.f32.mrf.mxu0 }
 0x258   : > { %v2328_v1 = vadd.f32 %v6037_v6, %v2300_v5  ;;  %v2301_v35 = vmul.f32 %v6035_v30, %v2234_v46  ;;  %v6093_v36 = vpop.f32.mrf.mxu1 }
 0x259   : > { %v2342_v48 = vmax.f32 %v2326_v16, 0.0  ;;  %v2327_v57 = vadd.f32 %v6037_v6, %v2299_v25 }
 0x25a   : > { %v2344_v33 = vmax.f32 %v2328_v1, 0.0  ;;  %v2329_v42 = vadd.f32 %v6037_v6, %v2301_v35  ;;  %v6097_v3 = vpop.f32.mrf.mxu1 }
 0x25b   : > { %v2343_v34 = vmax.f32 %v2327_v57, 0.0  ;;  %v2392_v40 = vmul.f32 %v2361_v50, %v2342_v48 }
 0x25c   : > { %v2345_v20 = vmax.f32 %v2329_v42, 0.0  ;;  %v2394_v18 = vmul.f32 %v2369_v63, %v2344_v33 }
 0x25d   : > { %v2393_v53 = vmul.f32 %v2365_v19, %v2343_v34  ;;  %v6164_v19 = vcombine.high %v6160_v21, %v6160_v21 }
 0x25e   : > { %v2395_v8 = vmul.f32 %v2373_v56, %v2345_v20  ;;  %v6174_v56 = vpop.permute.xlu0 %2995 }
 0x25f   : > { %v6064_v15 = vpack.c.bf16 %v2393_v53, %v2392_v40  ;;  %4740 = vmatprep.mubr.msk.bf16.mxu0 %vm2083_vm0, %v6164_v19  ;;  %4742 = vmatprep.mubr.msk.bf16.mxu1 %vm2083_vm0, %v6164_v19 }
 0x260   : > { %v6066_v2 = vpack.c.bf16 %v2395_v8, %v2394_v18 }
 0x261   : > { %2433 = vst [vmem:[#allocation2 + $0xc] sm:$0xff] %v6064_v15  ;;  %2989 = vrot.lane.b32.xlu0 %v6064_v15, %s7208_s8  ;;  %3030 = vrot.lane.b32.xlu1 %v6064_v15, %s7207_s27 }
 0x262   : > { %2434 = vst [vmem:[#allocation2 + $0x14] sm:$0xff] %v6066_v2 }
 0x265   : > { %3028 = vrot.lane.b32.xlu0 %v6043_v32, %s7207_s27  ;;  %2938 = vrot.lane.b32.xlu1 %v2928_v59, %s7210_s9 }
 0x268   : > { %v2929_v14 = vld [vmem:[#allocation2 + $0x8] sm:$0xff] }
 0x269   : > { %2940 = vrot.lane.b32.xlu0 %v2929_v14, %s7210_s9  ;;  %2858 = vrot.lane.b32.xlu1 %v2929_v14, %s7209_s16  ;;  %v2930_v45 = vld [vmem:[#allocation2 + $0x10] sm:$0xff] }
 0x26b   : > { %v2988_v27 = vpop.permute.xlu1 %2987 }
 0x26c   : > { %v2997_v61 = vrot.slane %v2988_v27, 4 }
 0x26d   : > { %2897 = vrot.lane.b32.xlu1 %v2928_v59, %s7275_s11  ;;  %2856 = vrot.lane.b32.xlu0 %v2928_v59, %s7209_s16 }
 0x271   : > { %2899 = vrot.lane.b32.xlu0 %v2929_v14, %s7275_s11  ;;  %2776 = vrot.lane.b32.xlu1 %v2929_v14, %s7276_s13 }
 0x275   : > { %2815 = vrot.lane.b32.xlu1 %v2928_v59, %s7213_s5  ;;  %2774 = vrot.lane.b32.xlu0 %v2928_v59, %s7276_s13 }
 0x279   : > { %2817 = vrot.lane.b32.xlu0 %v2929_v14, %s7213_s5  ;;  %2694 = vrot.lane.b32.xlu1 %v2929_v14, %s7214_s4 }
 0x27d   : > { %2733 = vrot.lane.b32.xlu1 %v2928_v59, %s7189_s20  ;;  %2692 = vrot.lane.b32.xlu0 %v2928_v59, %s7214_s4 }
 0x281   : > { %2735 = vrot.lane.b32.xlu0 %v2929_v14, %s7189_s20  ;;  %2612 = vrot.lane.b32.xlu1 %v2929_v14, %s7190_s12 }
 0x285   : > { %2651 = vrot.lane.b32.xlu1 %v2928_v59, %s7191_s22  ;;  %2610 = vrot.lane.b32.xlu0 %v2928_v59, %s7190_s12 }
 0x289   : > { %2653 = vrot.lane.b32.xlu0 %v2929_v14, %s7191_s22  ;;  %2530 = vrot.lane.b32.xlu1 %v2929_v14, %s7192_s21 }
 0x28c   : > { %v2275_v22 = vpop.f32.mrf.mxu1 }
 0x28d   : > { %v2302_v10 = vmul.f32 %v6035_v30, %v2275_v22  ;;  %2569 = vrot.lane.b32.xlu1 %v2928_v59, %s7193_s19  ;;  %2528 = vrot.lane.b32.xlu0 %v2928_v59, %s7192_s21 }
 0x28e   : > { %v2277_v31 = vpop.f32.mrf.mxu1 }
 0x28f   : > { %v2330_v17 = vadd.f32 %v6037_v6, %v2302_v10  ;;  %v2303_v38 = vmul.f32 %v6035_v30, %v2277_v31  ;;  %v6181_v30 = vpop.permute.xlu0 %3036 }
 0x291   : > { %v2346_v44 = vmax.f32 %v2330_v17, 0.0  ;;  %v2331_v47 = vadd.f32 %v6037_v6, %v2303_v38  ;;  %2571 = vrot.lane.b32.xlu0 %v2929_v14, %s7193_s19  ;;  %2448 = vrot.lane.b32.xlu1 %v2929_v14, %s7194_s10 }
 0x293   : > { %v2347_v39 = vmax.f32 %v2331_v47, 0.0  ;;  %v2396_v50 = vmul.f32 %v6048_v23, %v2346_v44 }
 0x295   : > { %v2397_v63 = vmul.f32 %v6050_v12, %v2347_v39  ;;  %2487 = vrot.lane.b32.xlu1 %v2928_v59, %s7195_s15  ;;  %2446 = vrot.lane.b32.xlu0 %v2928_v59, %s7194_s10 }
 0x297   : > { %v6111_v55 = vpack.c.bf16 %v2397_v63, %v2396_v50 }
 0x299   : > { %2435 = vst [vmem:[#allocation2 + $0x1c] sm:$0xff] %v6111_v55  ;;  %3481 = vrot.lane.b32.xlu1 %v6064_v15, %s7196_s26  ;;  %2489 = vrot.lane.b32.xlu0 %v2929_v14, %s7195_s15 }
 0x29d   : > { %3397 = vrot.lane.b32.xlu1 %v6043_v32, %s7197_s24  ;;  %3479 = vrot.lane.b32.xlu0 %v6043_v32, %s7196_s26 }
 0x2a1   : > { %3440 = vrot.lane.b32.xlu1 %v6064_v15, %s7198_s23  ;;  %3399 = vrot.lane.b32.xlu0 %v6064_v15, %s7197_s24 }
 0x2a5   : > { %3315 = vrot.lane.b32.xlu1 %v6043_v32, %s7199_s18  ;;  %3438 = vrot.lane.b32.xlu0 %v6043_v32, %s7198_s23 }
 0x2a9   : > { %3358 = vrot.lane.b32.xlu1 %v6064_v15, %s7200_s29  ;;  %3317 = vrot.lane.b32.xlu0 %v6064_v15, %s7199_s18 }
 0x2ad   : > { %3233 = vrot.lane.b32.xlu1 %v6043_v32, %s7201_s25  ;;  %3356 = vrot.lane.b32.xlu0 %v6043_v32, %s7200_s29 }
 0x2b1   : > { %3276 = vrot.lane.b32.xlu1 %v6064_v15, %s7202_s0  ;;  %3235 = vrot.lane.b32.xlu0 %v6064_v15, %s7201_s25 }
 0x2b5   : > { %3151 = vrot.lane.b32.xlu1 %v6043_v32, %s7277_s6  ;;  %3274 = vrot.lane.b32.xlu0 %v6043_v32, %s7202_s0 }
 0x2b9   : > { %3194 = vrot.lane.b32.xlu1 %v6064_v15, %s7278_s14  ;;  %3153 = vrot.lane.b32.xlu0 %v6064_v15, %s7277_s6 }
 0x2bd   : > { %3069 = vrot.lane.b32.xlu1 %v6043_v32, %s7205_s30  ;;  %3192 = vrot.lane.b32.xlu0 %v6043_v32, %s7278_s14 }
 0x2c1   : > { %3112 = vrot.lane.b32.xlu1 %v6064_v15, %s7206_s17  ;;  %3071 = vrot.lane.b32.xlu0 %v6064_v15, %s7205_s30 }
 0x2c5   : > { %2991 = vrot.lane.b32.xlu1 %v6066_v2, %s7208_s8  ;;  %3110 = vrot.lane.b32.xlu0 %v6043_v32, %s7206_s17 }
 0x2c9   : > { %2942 = vrot.lane.b32.xlu1 %v2930_v45, %s7210_s9  ;;  %3032 = vrot.lane.b32.xlu0 %v6066_v2, %s7207_s27 }
 0x2cd   : > { %2901 = vrot.lane.b32.xlu1 %v2930_v45, %s7275_s11  ;;  %2860 = vrot.lane.b32.xlu0 %v2930_v45, %s7209_s16 }
 0x2d1   : > { %2819 = vrot.lane.b32.xlu1 %v2930_v45, %s7213_s5  ;;  %2778 = vrot.lane.b32.xlu0 %v2930_v45, %s7276_s13 }
 0x2d3   : > { %v6185_v0 = vpop.permute.xlu1 %3030  ;;  %v6187_v6 = vpop.permute.xlu0 %2989 }
 0x2d4   : > { %v2998_v37 = vrot.slane %v6187_v6, 4  ;;  %v3039_v62 = vrot.slane %v6185_v0, 4 }
 0x2d5   : > { %2737 = vrot.lane.b32.xlu1 %v2930_v45, %s7189_s20  ;;  %2696 = vrot.lane.b32.xlu0 %v2930_v45, %s7214_s4 }
 0x2d6   : > { %v3002_v60 = vsel %vm348_vm1, %v2997_v61, %v2998_v37 }
 0x2d7   : > { %v2939_v24 = vpop.permute.xlu1 %2938  ;;  %v3029_v52 = vpop.permute.xlu0 %3028  ;;  %v3003_v26 = vsel %vm904_vm2, %v2988_v27, %v3002_v60 }
 0x2d8   : > { %v3038_v9 = vrot.slane %v3029_v52, 4  ;;  %v2948_v7 = vrot.slane %v2939_v24, 4 }
 0x2d9   : > { %2655 = vrot.lane.b32.xlu1 %v2930_v45, %s7191_s22  ;;  %2614 = vrot.lane.b32.xlu0 %v2930_v45, %s7190_s12 }
 0x2da   : > { %v3043_v29 = vsel %vm348_vm1, %v3038_v9, %v3039_v62 }
 0x2db   : > { %v3044_v28 = vsel %vm946_vm3, %v3029_v52, %v3043_v29  ;;  %v6203_v41 = vpop.permute.xlu1 %2858  ;;  %v6205_v54 = vpop.permute.xlu0 %2940 }
 0x2dc   : > { %v4683_v23 = vcombine.low %v3003_v26, %v3044_v28  ;;  %v2949_v4 = vrot.slane %v6205_v54, 4  ;;  %v4684_v12 = vcombine.high %v3003_v26, %v3044_v28  ;;  %v2867_v46 = vrot.slane %v6203_v41, 4 }
 0x2dd   : > { %2573 = vrot.lane.b32.xlu1 %v2930_v45, %s7193_s19  ;;  %2532 = vrot.lane.b32.xlu0 %v2930_v45, %s7192_s21 }
 0x2de   : > { %4192 = vmatprep.subr.bf16.mxu0 %v4684_v12  ;;  %v2953_v13 = vsel %vm348_vm1, %v2948_v7, %v2949_v4 }
 0x2df   : > { %v2898_v51 = vpop.permute.xlu1 %2897  ;;  %4193 = vmatpush1.bf16.msra.mxu0 %v4683_v23  ;;  %v2857_v49 = vpop.permute.xlu0 %2856  ;;  %v2954_v5 = vsel %vm854_vm4, %v2939_v24, %v2953_v13 }
 0x2e0   : > { %v2866_v58 = vrot.slane %v2857_v49, 4  ;;  %v4675_v16 = vcombine.low %v2954_v5, %v6043_v32  ;;  %v4676_v25 = vcombine.high %v2954_v5, %v6043_v32  ;;  %v2907_v48 = vrot.slane %v2898_v51, 4 }
 0x2e1   : > { %2491 = vrot.lane.b32.xlu1 %v2930_v45, %s7195_s15  ;;  %2450 = vrot.lane.b32.xlu0 %v2930_v45, %s7194_s10 }
 0x2e2   : > { %4194 = vmatprep.subr.bf16.mxu0 %v4676_v25  ;;  %v2871_v57 = vsel %vm348_vm1, %v2866_v58, %v2867_v46 }
 0x2e3   : > { %v6219_v1 = vpop.permute.xlu1 %2776  ;;  %4195 = vmatpush1.bf16.msra.mxu0 %v4675_v16  ;;  %v6221_v35 = vpop.permute.xlu0 %2899  ;;  %v2872_v42 = vsel %vm770_vm5, %v2857_v49, %v2871_v57  ;;  %v2932_v57 = vld [vmem:[#allocation2 + $0x20] sm:$0xf] }
 0x2e4   : > { %v2908_v33 = vrot.slane %v6221_v35, 4  ;;  %v2785_v15 = vrot.slane %v6219_v1, 4 }
 0x2e5   : > { %3401 = vrot.lane.b32.xlu1 %v6066_v2, %s7197_s24  ;;  %3483 = vrot.lane.b32.xlu0 %v6066_v2, %s7196_s26 }
 0x2e6   : > { %v2912_v32 = vsel %vm348_vm1, %v2907_v48, %v2908_v33 }
 0x2e7   : > { %v2816_v34 = vpop.permute.xlu1 %2815  ;;  %v2775_v20 = vpop.permute.xlu0 %2774  ;;  %v2913_v40 = vsel %vm812_vm6, %v2898_v51, %v2912_v32 }
 0x2e8   : > { %v2784_v53 = vrot.slane %v2775_v20, 4  ;;  %v4667_v18 = vcombine.low %v2872_v42, %v2913_v40  ;;  %v4668_v8 = vcombine.high %v2872_v42, %v2913_v40  ;;  %v2825_v22 = vrot.slane %v2816_v34, 4 }
 0x2e9   : > { %3319 = vrot.lane.b32.xlu1 %v6066_v2, %s7199_s18  ;;  %3442 = vrot.lane.b32.xlu0 %v6066_v2, %s7198_s23 }
 0x2ea   : > { %4196 = vmatprep.subr.bf16.mxu0 %v4668_v8  ;;  %v2789_v10 = vsel %vm348_vm1, %v2784_v53, %v2785_v15  ;;  %v6301_v53 = vld [vmem:[#allocation2 + $0x18] sm:$0xff] }
 0x2eb   : > { %v6241_v59 = vpop.permute.xlu1 %2694  ;;  %4197 = vmatpush1.bf16.msra.mxu0 %v4667_v18  ;;  %v6243_v14 = vpop.permute.xlu0 %2817  ;;  %v2790_v38 = vsel %vm686_vm7, %v2775_v20, %v2789_v10  ;;  %v2850_v18 = vld [vmem:[#allocation2 + $0x20] sm:$0xf] }
 0x2ec   : > { %v2826_v31 = vrot.slane %v6243_v14, 4  ;;  %v2703_v27 = vrot.slane %v6241_v59, 4 }
 0x2ed   : > { %3237 = vrot.lane.b32.xlu1 %v6066_v2, %s7201_s25  ;;  %3360 = vrot.lane.b32.xlu0 %v6066_v2, %s7200_s29 }
 0x2ee   : > { %v2830_v17 = vsel %vm348_vm1, %v2825_v22, %v2826_v31 }
 0x2ef   : > { %v2734_v44 = vpop.permute.xlu1 %2733  ;;  %v2693_v47 = vpop.permute.xlu0 %2692  ;;  %v2831_v39 = vsel %vm728_vm8, %v2816_v34, %v2830_v17 }
 0x2f0   : > { %v2702_v50 = vrot.slane %v2693_v47, 4  ;;  %v4659_v63 = vcombine.low %v2790_v38, %v2831_v39  ;;  %v4660_v45 = vcombine.high %v2790_v38, %v2831_v39  ;;  %v2743_v52 = vrot.slane %v2734_v44, 4 }
 0x2f1   : > { %3155 = vrot.lane.b32.xlu1 %v6066_v2, %s7277_s6  ;;  %3278 = vrot.lane.b32.xlu0 %v6066_v2, %s7202_s0 }
 0x2f2   : > { %4198 = vmatprep.subr.bf16.mxu0 %v4660_v45  ;;  %v2707_v60 = vsel %vm348_vm1, %v2702_v50, %v2703_v27  ;;  %v2891_v50 = vld [vmem:[#allocation2 + $0x20] sm:$0xf] }
 0x2f3   : > { %v6263_v61 = vpop.permute.xlu1 %2612  ;;  %4199 = vmatpush1.bf16.msra.mxu0 %v4659_v63  ;;  %v6265_v24 = vpop.permute.xlu0 %2735  ;;  %v2708_v26 = vsel %vm7280_vm9, %v2693_v47, %v2707_v60  ;;  %vm7284_vm9 = vcmask 891904  }
 0x2f4   : > { %v2744_v9 = vrot.slane %v6265_v24, 4  ;;  %v2621_v49 = vrot.slane %v6263_v61, 4 }
 0x2f5   : > { %3073 = vrot.lane.b32.xlu1 %v6066_v2, %s7205_s30  ;;  %3196 = vrot.lane.b32.xlu0 %v6066_v2, %s7278_s14 }
 0x2f6   : > { %v2748_v29 = vsel %vm348_vm1, %v2743_v52, %v2744_v9 }
 0x2f7   : > { %v2652_v28 = vpop.permute.xlu1 %2651  ;;  %v2611_v7 = vpop.permute.xlu0 %2610  ;;  %v2749_v23 = vsel %vm7281_vm10, %v2734_v44, %v2748_v29  ;;  %vm7285_vm10 = vcmask 826368  }
 0x2f8   : > { %v2620_v12 = vrot.slane %v2611_v7, 4  ;;  %v4651_v13 = vcombine.low %v2708_v26, %v2749_v23  ;;  %v4652_v51 = vcombine.high %v2708_v26, %v2749_v23  ;;  %v2661_v16 = vrot.slane %v2652_v28, 4 }
 0x2f9   : > { %2993 = vrot.lane.b32.xlu1 %v6111_v55, %s7208_s8  ;;  %3114 = vrot.lane.b32.xlu0 %v6066_v2, %s7206_s17 }
 0x2fa   : > { %4200 = vmatprep.subr.bf16.mxu0 %v4652_v51  ;;  %v2625_v25 = vsel %vm348_vm1, %v2620_v12, %v2621_v49 }
 0x2fb   : > { %v6285_v5 = vpop.permute.xlu1 %2530  ;;  %4201 = vmatpush1.bf16.msra.mxu0 %v4651_v13  ;;  %v6287_v58 = vpop.permute.xlu0 %2653  ;;  %v2626_v32 = vsel %vm7282_vm11, %v2611_v7, %v2625_v25  ;;  %vm7286_vm11 = vcmask 908288  }
 0x2fc   : > { %v2662_v48 = vrot.slane %v6287_v58, 4  ;;  %v7145_v10 = vrot.slane %v6285_v5, 4 }
 0x2fd   : > { %3034 = vrot.lane.b32.xlu1 %v6111_v55, %s7207_s27  ;;  %2946 = vrot.lane.b32.xlu0 %v2932_v57, %s7210_s9 }
 0x2fe   : > { %v2666_v2 = vsel %vm348_vm1, %v2661_v16, %v2662_v48 }
 0x2ff   : > { %v2570_v42 = vpop.permute.xlu1 %2569  ;;  %v2529_v34 = vpop.permute.xlu0 %2528  ;;  %v2667_v20 = vsel %vm7283_vm12, %v2652_v28, %v2666_v2  ;;  %v2768_v28 = vld [vmem:[#allocation2 + $0x20] sm:$0xf]  ;;  %vm7287_vm12 = vcmask 900096  }
 0x300   : > { %v2538_v40 = vrot.slane %v2529_v34, 4  ;;  %v4643_v8 = vcombine.low %v2626_v32, %v2667_v20  ;;  %v4644_v22 = vcombine.high %v2626_v32, %v2667_v20  ;;  %v2579_v44 = vrot.slane %v2570_v42, 4  ;;  %v2809_v2 = vld [vmem:[#allocation2 + $0x20] sm:$0xf] }
 0x301   : > { %2944 = vrot.lane.b32.xlu1 %v6301_v53, %s7210_s9  ;;  %2864 = vrot.lane.b32.xlu0 %v2850_v18, %s7209_s16 }
 0x302   : > { %4202 = vmatprep.subr.bf16.mxu0 %v4644_v22  ;;  %v2543_v47 = vsel %vm348_vm1, %v2538_v40, %v7145_v10  ;;  %v2686_v22 = vld [vmem:[#allocation2 + $0x20] sm:$0xf] }
 0x303   : > { %v6307_v17 = vpop.permute.xlu1 %2448  ;;  %4203 = vmatpush1.bf16.msra.mxu0 %v4643_v8  ;;  %v6309_v38 = vpop.permute.xlu0 %2571  ;;  %v2544_v45 = vsel %vm7284_vm9, %v2529_v34, %v2543_v47  ;;  %vm7288_vm9 = vcmask 138240  }
 0x304   : > { %v2580_v39 = vrot.slane %v6309_v38, 4  ;;  %v7141_v12 = vrot.slane %v6307_v17, 4 }
 0x305   : > { %2862 = vrot.lane.b32.xlu1 %v6301_v53, %s7209_s16  ;;  %2905 = vrot.lane.b32.xlu0 %v2891_v50, %s7275_s11 }
 0x306   : > { %v2584_v63 = vsel %vm348_vm1, %v2579_v44, %v2580_v39 }
 0x307   : > { %v2488_v52 = vpop.permute.xlu1 %2487  ;;  %v2447_v60 = vpop.permute.xlu0 %2446  ;;  %v2585_v29 = vsel %vm7285_vm10, %v2570_v42, %v2584_v63  ;;  %vm7289_vm10 = vcmask 154624  }
 0x308   : > { %v2456_v26 = vrot.slane %v2447_v60, 4  ;;  %v4635_v7 = vcombine.low %v2544_v45, %v2585_v29  ;;  %v4636_v23 = vcombine.high %v2544_v45, %v2585_v29  ;;  %v2497_v16 = vrot.slane %v2488_v52, 4 }
 0x309   : > { %2903 = vrot.lane.b32.xlu1 %v6301_v53, %s7275_s11  ;;  %2782 = vrot.lane.b32.xlu0 %v2768_v28, %s7276_s13  ;;  %v2727_v28 = vld [vmem:[#allocation2 + $0x20] sm:$0xf] }
 0x30a   : > { %4204 = vmatprep.subr.bf16.mxu0 %v4636_v23  ;;  %v2461_v25 = vsel %vm348_vm1, %v2456_v26, %v7141_v12 }
 0x30b   : > { %v6327_v13 = vpop.permute.xlu1 %3481  ;;  %4205 = vmatpush1.bf16.msra.mxu0 %v4635_v7  ;;  %v6329_v51 = vpop.permute.xlu0 %2489  ;;  %v2462_v42 = vsel %vm7286_vm11, %v2447_v60, %v2461_v25  ;;  %vm7290_vm11 = vcmask 146432  }
 0x30c   : > { %v7144_v57 = vrot.slane %v6329_v51, 4  ;;  %v7139_v18 = vrot.slane %v6327_v13, 4 }
 0x30d   : > { %2780 = vrot.lane.b32.xlu1 %v6301_v53, %s7276_s13  ;;  %2823 = vrot.lane.b32.xlu0 %v2809_v2, %s7213_s5 }
 0x30e   : > { %v2502_v32 = vsel %vm348_vm1, %v2497_v16, %v7144_v57 }
 0x30f   : > { %v3398_v34 = vpop.permute.xlu1 %3397  ;;  %v3480_v20 = vpop.permute.xlu0 %3479  ;;  %v2503_v40 = vsel %vm7287_vm12, %v2488_v52, %v2502_v32  ;;  %vm7291_vm12 = vcmask 220160  }
 0x310   : > { %v3489_v8 = vrot.slane %v3480_v20, 4  ;;  %v4627_v44 = vcombine.low %v2462_v42, %v2503_v40  ;;  %v4628_v47 = vcombine.high %v2462_v42, %v2503_v40  ;;  %v3407_v7 = vrot.slane %v3398_v34, 4 }
 0x311   : > { %2821 = vrot.lane.b32.xlu1 %v6301_v53, %s7213_s5  ;;  %2700 = vrot.lane.b32.xlu0 %v2686_v22, %s7214_s4 }
 0x312   : > { %v3494_v50 = vsel %vm348_vm1, %v3489_v8, %v7139_v18  ;;  %4206 = vmatprep.subr.bf16.mxu0 %v4628_v47 }
 0x313   : > { %v3495_v63 = vsel %vm7288_vm9, %v3480_v20, %v3494_v50  ;;  %v6351_v45 = vpop.permute.xlu1 %3440  ;;  %4207 = vmatpush1.bf16.msra.mxu0 %v4627_v44  ;;  %v6353_v52 = vpop.permute.xlu0 %3399  ;;  %v2604_v20 = vld [vmem:[#allocation2 + $0x20] sm:$0xf]  ;;  %vm7292_vm9 = vcmask 302080  }
 0x314   : > { %v4731_v60 = vcombine.low %v3495_v63, %v3495_v63  ;;  %v4732_v29 = vcombine.high %v3495_v63, %v3495_v63  ;;  %v7137_v26 = vrot.slane %v6353_v52, 4  ;;  %v7136_v2 = vrot.slane %v6351_v45, 4 }
 0x315   : > { %2698 = vrot.lane.b32.xlu1 %v6301_v53, %s7214_s4  ;;  %2741 = vrot.lane.b32.xlu0 %v2727_v28, %s7189_s20  ;;  %s7308_s4 = sld [smem:[#allocation24_spill]] }
 0x316   : > { %4739 = vmatprep.subr.msk.bf16.mxu0 %vm348_vm1, %v4732_v29  ;;  %v4169_v23 = vsel %vm348_vm1, %v4731_v60, 0  ;;  %v3412_v32 = vsel %vm348_vm1, %v3407_v7, %v7137_v26  ;;  %v2645_v29 = vld [vmem:[#allocation2 + $0x20] sm:$0xf] }
 0x317   : > { %v3316_v16 = vpop.permute.xlu1 %3315  ;;  %4213 = vmatpush2.bf16.msra.mxu0 %v4169_v23  ;;  %v3439_v25 = vpop.permute.xlu0 %3438  ;;  %v3413_v8 = vsel %vm7289_vm10, %v3398_v34, %v3412_v32  ;;  %vm7293_vm10 = vcmask 236544   ;;  %v2481_v26 = vld [vmem:[#allocation2 + $0x20] sm:$0xf] }
 0x318   : > { %v3448_v42 = vrot.slane %v3439_v25, 4  ;;  %v3325_v28 = vrot.slane %v3316_v16, 4 }
 0x319   : > { %2739 = vrot.lane.b32.xlu1 %v6301_v53, %s7189_s20  ;;  %2618 = vrot.lane.b32.xlu0 %v2604_v20, %s7190_s12 }
 0x31a   : > { %v3453_v40 = vsel %vm348_vm1, %v3448_v42, %v7136_v2  ;;  %v2522_v42 = vld [vmem:[#allocation2 + $0x20] sm:$0xf] }
 0x31b   : > { %v3454_v22 = vsel %vm7290_vm11, %v3439_v25, %v3453_v40  ;;  %v6373_v44 = vpop.permute.xlu1 %3358  ;;  %v6375_v47 = vpop.permute.xlu0 %3317  ;;  %vm7294_vm11 = vcmask 318464  }
 0x31c   : > { %v4723_v50 = vcombine.low %v3413_v8, %v3454_v22  ;;  %v4724_v63 = vcombine.high %v3413_v8, %v3454_v22  ;;  %v7133_v60 = vrot.slane %v6375_v47, 4  ;;  %v7134_v23 = vrot.slane %v6373_v44, 4 }
 0x31d   : > { %2616 = vrot.lane.b32.xlu1 %v6301_v53, %s7190_s12  ;;  %2659 = vrot.lane.b32.xlu0 %v2645_v29, %s7191_s22  ;;  %s4964_s12 = smov [#allocation8]  }
 0x31e   : > { %4214 = vmatprep.subr.bf16.mxu0 %v4724_v63  ;;  %v3330_v25 = vsel %vm348_vm1, %v3325_v28, %v7133_v60  ;;  %v2563_v60 = vld [vmem:[#allocation2 + $0x20] sm:$0xf]  ;;  %s4874_s11 = sshll.u32 %s4964_s12, 4  ;;  %s4875_s11 = int_to_ptr.vmem [resolvable:$false] %s4874_s11 }
 0x31f   : > { %v3234_v7 = vpop.permute.xlu1 %3233  ;;  %4215 = vmatpush2.bf16.msra.mxu0 %v4723_v50  ;;  %v3357_v34 = vpop.permute.xlu0 %3356  ;;  %v3331_v40 = vsel %vm1240_vm15, %v3316_v16, %v3330_v25  ;;  %s4876_s13 = scalar_lea.vmem %s4875_s11, 2048 }
 0x320   : > { %v3366_v32 = vrot.slane %v3357_v34, 4 }
 0x321   : > { %2657 = vrot.lane.b32.xlu1 %v6301_v53, %s7191_s22  ;;  %2536 = vrot.lane.b32.xlu0 %v2522_v42, %s7192_s21  ;;  %v3243_v42 = vrot.slane %v3234_v7, 4 }
 0x322   : > { %v3371_v20 = vsel %vm348_vm1, %v3366_v32, %v7134_v23 }
 0x323   : > { %v3372_v8 = vsel %vm7291_vm12, %v3357_v34, %v3371_v20  ;;  %v6393_v22 = vpop.permute.xlu1 %3276  ;;  %v6395_v50 = vpop.permute.xlu0 %3235  ;;  %vm7295_vm12 = vcmask 310272  }
 0x324   : > { %v4715_v63 = vcombine.low %v3331_v40, %v3372_v8  ;;  %v4716_v29 = vcombine.high %v3331_v40, %v3372_v8  ;;  %v7135_v28 = vrot.slane %v6395_v50, 4  ;;  %v7138_v34 = vrot.slane %v6393_v22, 4  ;;  %v2440_v40 = vld [vmem:[#allocation2 + $0x20] sm:$0xf] }
 0x325   : > { %2534 = vrot.lane.b32.xlu1 %v6301_v53, %s7192_s21  ;;  %2577 = vrot.lane.b32.xlu0 %v2563_v60, %s7193_s19 }
 0x326   : > { %4216 = vmatprep.subr.bf16.mxu0 %v4716_v29  ;;  %v3248_v25 = vsel %vm348_vm1, %v3243_v42, %v7135_v28 }
 0x327   : > { %v3152_v32 = vpop.permute.xlu1 %3151  ;;  %4217 = vmatpush2.bf16.msra.mxu0 %v4715_v63  ;;  %v3275_v16 = vpop.permute.xlu0 %3274  ;;  %v3249_v8 = vsel %vm7292_vm9, %v3234_v7, %v3248_v25  ;;  %vm7296_vm9 = vcmask 744448  }
 0x328   : > { %v3284_v20 = vrot.slane %v3275_v16, 4 }
 0x329   : > { %2575 = vrot.lane.b32.xlu1 %v6301_v53, %s7193_s19  ;;  %2454 = vrot.lane.b32.xlu0 %v2440_v40, %s7194_s10  ;;  %v3161_v40 = vrot.slane %v3152_v32, 4  ;;  %s7378_s19 = sld [smem:[#allocation18_spill]] }
 0x32a   : > { %v3289_v60 = vsel %vm348_vm1, %v3284_v20, %v7138_v34  ;;  %v3473_v20 = vld [vmem:[#allocation2 + $0x24] sm:$0xf] }
 0x32b   : > { %v3290_v63 = vsel %vm7293_vm10, %v3275_v16, %v3289_v60  ;;  %v6413_v29 = vpop.permute.xlu1 %3194  ;;  %v6415_v23 = vpop.permute.xlu0 %3153  ;;  %vm7297_vm10 = vcmask 736256  }
 0x32c   : > { %v4707_v42 = vcombine.low %v3249_v8, %v3290_v63  ;;  %v4708_v28 = vcombine.high %v3249_v8, %v3290_v63  ;;  %v7140_v2 = vrot.slane %v6415_v23, 4  ;;  %v7143_v25 = vrot.slane %v6413_v29, 4 }
 0x32d   : > { %2452 = vrot.lane.b32.xlu1 %v6301_v53, %s7194_s10  ;;  %2495 = vrot.lane.b32.xlu0 %v2481_v26, %s7195_s15 }
 0x32e   : > { %4218 = vmatprep.subr.bf16.mxu0 %v4708_v28  ;;  %v3166_v60 = vsel %vm348_vm1, %v3161_v40, %v7140_v2  ;;  %v3391_v28 = vld [vmem:[#allocation2 + $0x24] sm:$0xf] }
 0x32f   : > { %v3070_v7 = vpop.permute.xlu1 %3069  ;;  %4219 = vmatpush2.bf16.msra.mxu0 %v4707_v42  ;;  %v3193_v16 = vpop.permute.xlu0 %3192  ;;  %v3167_v63 = vsel %vm7294_vm11, %v3152_v32, %v3166_v60  ;;  %vm7298_vm11 = vcmask 818176   ;;  %p7380_p12 = scmp.ne.s32.totalorder %s7378_s19, 0 }
 0x330   : > { %v3202_v8 = vrot.slane %v3193_v16, 4 }
 0x331   : > { %2493 = vrot.lane.b32.xlu1 %v6301_v53, %s7195_s15  ;;  %3487 = vrot.lane.b32.xlu0 %v3473_v20, %s7196_s26  ;;  %v3079_v53 = vrot.slane %v3070_v7, 4  ;;  %v3432_v20 = vld [vmem:[#allocation2 + $0x24] sm:$0xf]  ;;  %s7377_s15 = sld [smem:[#allocation15_spill]] }
 0x332   : > { %v3207_v26 = vsel %vm348_vm1, %v3202_v8, %v7143_v25 }
 0x333   : > { %v3208_v42 = vsel %vm7295_vm12, %v3193_v16, %v3207_v26  ;;  %v6433_v34 = vpop.permute.xlu1 %3112  ;;  %v6435_v18 = vpop.permute.xlu0 %3071  ;;  %vm7299_vm12 = vcmask 809984  }
 0x334   : > { %v4699_v40 = vcombine.low %v3167_v63, %v3208_v42  ;;  %v4700_v2 = vcombine.high %v3167_v63, %v3208_v42  ;;  %v7142_v12 = vrot.slane %v6435_v18, 4  ;;  %v3121_v16 = vrot.slane %v6433_v34, 4 }
 0x335   : > { %3485 = vrot.lane.b32.xlu1 %v6111_v55, %s7196_s26  ;;  %3405 = vrot.lane.b32.xlu0 %v3391_v28, %s7197_s24  ;;  %v3309_v28 = vld [vmem:[#allocation2 + $0x24] sm:$0xf] }
 0x336   : > { %4220 = vmatprep.subr.bf16.mxu0 %v4700_v2  ;;  %v3084_v26 = vsel %vm348_vm1, %v3079_v53, %v7142_v12 }
 0x337   : > { %v6441_v8 = vpop.permute.xlu1 %2991  ;;  %4221 = vmatpush2.bf16.msra.mxu0 %v4699_v40  ;;  %v3111_v32 = vpop.permute.xlu0 %3110  ;;  %v3085_v40 = vsel %vm988_vm14, %v3070_v7, %v3084_v26  ;;  %v6482_v26 = vcombine.low %v6160_v21, %v6160_v21  ;;  %s4756_s26 = sshll.u32 %s7377_s15, 10 }
 0x338   : > { %v2999_v60 = vrot.slane %v6441_v8, 4  ;;  %v3120_v63 = vrot.slane %v3111_v32, 4 }
 0x339   : > { %3403 = vrot.lane.b32.xlu1 %v6111_v55, %s7197_s24  ;;  %3446 = vrot.lane.b32.xlu0 %v3432_v20, %s7198_s23 }
 0x33a   : > { %v3125_v2 = vsel %vm348_vm1, %v3120_v63, %v3121_v16  ;;  %v3004_v42 = vsel %vm348_vm1, %v2998_v37, %v2999_v60 }
 0x33b   : > { %v3126_v53 = vsel %vm1030_vm13, %v3111_v32, %v3125_v2  ;;  %v6461_v12 = vpop.permute.xlu1 %2942  ;;  %v6463_v25 = vpop.permute.xlu0 %3032  ;;  %v3350_v32 = vld [vmem:[#allocation2 + $0x24] sm:$0xf] }
 0x33c   : > { %v4691_v20 = vcombine.low %v3085_v40, %v3126_v53  ;;  %v4692_v57 = vcombine.high %v3085_v40, %v3126_v53  ;;  %v7146_v10 = vrot.slane %v6461_v12, 4  ;;  %v3040_v63 = vrot.slane %v6463_v25, 4 }
 0x33d   : > { %3444 = vrot.lane.b32.xlu1 %v6111_v55, %s7198_s23  ;;  %3323 = vrot.lane.b32.xlu0 %v3309_v28, %s7199_s18 }
 0x33e   : > { %v2955_v37 = vsel %vm348_vm1, %v2949_v4, %v7146_v10  ;;  %v3045_v7 = vsel %vm348_vm1, %v3039_v62, %v3040_v63  ;;  %4222 = vmatprep.subr.bf16.mxu0 %v4692_v57  ;;  %v3005_v4 = vsel %vm904_vm2, %v6187_v6, %v3004_v42  ;;  %v3227_v42 = vld [vmem:[#allocation2 + $0x24] sm:$0xf] }
 0x33f   : > { %v6484_v2 = vpop.permute.xlu1 %2901  ;;  %4223 = vmatpush2.bf16.msra.mxu0 %v4691_v20  ;;  %v6486_v28 = vpop.permute.xlu0 %2860  ;;  %v3046_v40 = vsel %vm946_vm3, %v6185_v0, %v3045_v7  ;;  %v2956_v62 = vsel %vm854_vm4, %v6205_v54, %v2955_v37  ;;  %v2970_v20 = vld [vmem:[#allocation2 + $0xc] sm:$0xff] }
 0x340   : > { %v2909_v57 = vrot.slane %v6484_v2, 4  ;;  %v2868_v53 = vrot.slane %v6486_v28, 4  ;;  %v4685_v21 = vcombine.low %v3005_v4, %v3046_v40  ;;  %v4686_v10 = vcombine.high %v3005_v4, %v3046_v40 }
 0x341   : > { %3321 = vrot.lane.b32.xlu1 %v6111_v55, %s7199_s18  ;;  %3364 = vrot.lane.b32.xlu0 %v3350_v32, %s7200_s29  ;;  %v4678_v54 = vcombine.high %v2956_v62, %v2970_v20  ;;  %v4677_v4 = vcombine.low %v2956_v62, %v2970_v20  ;;  %s7379_s18 = sld [smem:[#allocation27_spill]] }
 0x342   : > { %v2914_v0 = vsel %vm348_vm1, %v2908_v33, %v2909_v57  ;;  %v2873_v6 = vsel %vm348_vm1, %v2867_v46, %v2868_v53  ;;  %4225 = vmatmul.mubr.bf16.vlgmr.msra.gmra.mxu0 %v6482_v26  ;;  %4233 = vmatprep.subr.bf16.mxu1 %v4686_v10 }
 0x343   : > { %v6510_v37 = vpop.permute.xlu1 %2819  ;;  %4234 = vmatpush1.bf16.msra.mxu1 %v4685_v21  ;;  %v6512_v7 = vpop.permute.xlu0 %2778  ;;  %v2874_v32 = vsel %vm770_vm5, %v6203_v41, %v2873_v6  ;;  %v2915_v33 = vsel %vm812_vm6, %v6221_v35, %v2914_v0  ;;  %4744 = vmatprep.mubr.msk.bf16.mxu0 %vm2083_vm0, %v6164_v19  ;;  %v3268_v21 = vld [vmem:[#allocation2 + $0x24] sm:$0xf] }
 0x344   : > { %v2827_v46 = vrot.slane %v6510_v37, 4  ;;  %v2786_v10 = vrot.slane %v6512_v7, 4  ;;  %4235 = vmatprep.subr.bf16.mxu1 %v4678_v54  ;;  %v4670_v40 = vcombine.high %v2874_v32, %v2915_v33 }
 0x345   : > { %3362 = vrot.lane.b32.xlu1 %v6111_v55, %s7200_s29  ;;  %3241 = vrot.lane.b32.xlu0 %v3227_v42, %s7201_s25  ;;  %v4669_v42 = vcombine.low %v2874_v32, %v2915_v33 }
 0x346   : > { %v2832_v41 = vsel %vm348_vm1, %v2826_v31, %v2827_v46  ;;  %v2791_v35 = vsel %vm348_vm1, %v2785_v15, %v2786_v10 }
 0x347   : > { %v6535_v62 = vpop.permute.xlu1 %2737  ;;  %4236 = vmatpush1.bf16.msra.mxu1 %v4677_v4  ;;  %v6537_v20 = vpop.permute.xlu0 %2696  ;;  %v2792_v0 = vsel %vm686_vm7, %v6219_v1, %v2791_v35  ;;  %v2833_v6 = vsel %vm728_vm8, %v6243_v14, %v2832_v41  ;;  %v3145_v4 = vld [vmem:[#allocation2 + $0x24] sm:$0xf] }
 0x348   : > { %v7158_v31 = vrot.slane %v6535_v62, 4  ;;  %v2704_v54 = vrot.slane %v6537_v20, 4  ;;  %4237 = vmatprep.subr.bf16.mxu1 %v4670_v40  ;;  %v4662_v14 = vcombine.high %v2792_v0, %v2833_v6 }
 0x349   : > { %3239 = vrot.lane.b32.xlu1 %v6111_v55, %s7201_s25  ;;  %3282 = vrot.lane.b32.xlu0 %v3268_v21, %s7202_s0  ;;  %v4661_v21 = vcombine.low %v2792_v0, %v2833_v6  ;;  %s6981_s25 = scalar_lea.hbm %s7379_s18, %s4756_s26 }
 0x34a   : > { %v2750_v1 = vsel %vm348_vm1, %v2744_v9, %v7158_v31  ;;  %v2709_v15 = vsel %vm348_vm1, %v2703_v27, %v2704_v54 }
 0x34b   : > { %v6558_v32 = vpop.permute.xlu1 %2655  ;;  %4238 = vmatpush1.bf16.msra.mxu1 %v4669_v42  ;;  %v6560_v33 = vpop.permute.xlu0 %2614  ;;  %v2710_v41 = vsel %vm7296_vm9, %v6241_v59, %v2709_v15  ;;  %v2751_v35 = vsel %vm7297_vm10, %v6265_v24, %v2750_v1  ;;  %v3186_v42 = vld [vmem:[#allocation2 + $0x24] sm:$0xf]  ;;  %vm7301_vm9 = vcmask 891904   ;;  %vm7302_vm10 = vcmask 826368  }
 0x34c   : > { %v7154_v9 = vrot.slane %v6558_v32, 4  ;;  %v7157_v40 = vrot.slane %v6560_v33, 4  ;;  %4239 = vmatprep.subr.bf16.mxu1 %v4662_v14  ;;  %v4654_v24 = vcombine.high %v2710_v41, %v2751_v35 }
 0x34d   : > { %3280 = vrot.lane.b32.xlu1 %v6111_v55, %s7202_s0  ;;  %3159 = vrot.lane.b32.xlu0 %v3145_v4, %s7277_s6  ;;  %v4653_v4 = vcombine.low %v2710_v41, %v2751_v35 }
 0x34e   : > { %v2668_v59 = vsel %vm348_vm1, %v2662_v48, %v7154_v9  ;;  %v2627_v27 = vsel %vm348_vm1, %v2621_v49, %v7157_v40  ;;  %v7300_v49 = vrot.slane %v6285_v5, 4 }
 0x34f   : > { %v6581_v0 = vpop.permute.xlu1 %2573  ;;  %4240 = vmatpush1.bf16.msra.mxu1 %v4661_v21  ;;  %v6583_v6 = vpop.permute.xlu0 %2532  ;;  %v2628_v1 = vsel %vm7298_vm11, %v6263_v61, %v2627_v27  ;;  %v2669_v15 = vsel %vm7299_vm12, %v6287_v58, %v2668_v59  ;;  %v3063_v59 = vld [vmem:[#allocation2 + $0x24] sm:$0xf]  ;;  %vm7305_vm11 = vcmask 908288   ;;  %vm7306_vm12 = vcmask 900096  }
 0x350   : > { %v7147_v48 = vrot.slane %v6581_v0, 4  ;;  %v7153_v14 = vrot.slane %v6583_v6, 4  ;;  %4241 = vmatprep.subr.bf16.mxu1 %v4654_v24  ;;  %v4646_v21 = vcombine.high %v2628_v1, %v2669_v15 }
 0x351   : > { %3157 = vrot.lane.b32.xlu1 %v6111_v55, %s7277_s6  ;;  %3200 = vrot.lane.b32.xlu0 %v3186_v42, %s7278_s14 }
 0x352   : > { %v2586_v61 = vsel %vm348_vm1, %v2580_v39, %v7147_v48  ;;  %v2545_v58 = vsel %vm348_vm1, %v7300_v49, %v7153_v14  ;;  %v4645_v48 = vcombine.low %v2628_v1, %v2669_v15 }
 0x353   : > { %v6604_v41 = vpop.permute.xlu1 %2491  ;;  %4242 = vmatpush1.bf16.msra.mxu1 %v4653_v4  ;;  %v6606_v35 = vpop.permute.xlu0 %2450  ;;  %v2546_v27 = vsel %vm7301_vm9, %v6285_v5, %v2545_v58  ;;  %v2587_v24 = vsel %vm7302_vm10, %v6309_v38, %v2586_v61  ;;  %v7303_v4 = vrot.slane %v6329_v51, 4  ;;  %v7304_v38 = vrot.slane %v6307_v17, 4  ;;  %v3104_v58 = vld [vmem:[#allocation2 + $0x24] sm:$0xf] }
 0x354   : > { %v7148_v39 = vrot.slane %v6604_v41, 4  ;;  %v7149_v42 = vrot.slane %v6606_v35, 4  ;;  %4243 = vmatprep.subr.bf16.mxu1 %v4646_v21  ;;  %v4638_v49 = vcombine.high %v2546_v27, %v2587_v24  ;;  %vm7309_vm9 = vcmask 138240  }
 0x355   : > { %3198 = vrot.lane.b32.xlu1 %v6111_v55, %s7278_s14  ;;  %3077 = vrot.lane.b32.xlu0 %v3063_v59, %s7205_s30  ;;  %vm7313_vm10 = vcmask 146432  }
 0x356   : > { %v2504_v5 = vsel %vm348_vm1, %v7303_v4, %v7148_v39  ;;  %v2463_v61 = vsel %vm348_vm1, %v7304_v38, %v7149_v42  ;;  %v6636_v4 = vld [vmem:[#allocation2 + $0x1c] sm:$0xff]  ;;  %v4637_v39 = vcombine.low %v2546_v27, %v2587_v24 }
 0x357   : > { %v6627_v1 = vpop.permute.xlu1 %3401  ;;  %4244 = vmatpush1.bf16.msra.mxu1 %v4645_v48  ;;  %v6629_v55 = vpop.permute.xlu0 %3483  ;;  %v2464_v15 = vsel %vm7305_vm11, %v6307_v17, %v2463_v61  ;;  %v2505_v21 = vsel %vm7306_vm12, %v6329_v51, %v2504_v5  ;;  %v7307_v17 = vrot.slane %v6327_v13, 4  ;;  %v4356_v5 = vld [vmem:[%s7308_s4] sm:$0xff]  ;;  %vm7315_vm11 = vcmask 154624  }
 0x358   : > { %v7150_v59 = vrot.slane %v6629_v55, 4  ;;  %4245 = vmatprep.subr.bf16.mxu1 %v4638_v49  ;;  %v7151_v48 = vrot.slane %v6627_v1, 4  ;;  %v4630_v51 = vcombine.high %v2464_v15, %v2505_v21  ;;  %v4629_v42 = vcombine.low %v2464_v15, %v2505_v21  ;;  %v2285_v15 = vld [vmem:[%s7022_s2 + $0x8] sm:$0xff] }
 0x359   : > { %3075 = vrot.lane.b32.xlu1 %v6636_v4, %s7205_s30  ;;  %3118 = vrot.lane.b32.xlu0 %v3104_v58, %s7206_s17  ;;  %s7312_s30 = sld [smem:[#allocation25_spill]]  ;;  %vm7317_vm12 = vcmask 220160  }
 0x35a   : > { %v3496_v38 = vsel %vm348_vm1, %v7307_v17, %v7150_v59  ;;  %v7310_v17 = vrot.slane %v6353_v52, 4 }
 0x35b   : > { %v6650_v61 = vpop.permute.xlu1 %3319  ;;  %4246 = vmatpush1.bf16.msra.mxu1 %v4637_v39  ;;  %v6652_v27 = vpop.permute.xlu0 %3442  ;;  %v3497_v24 = vsel %vm7309_vm9, %v6327_v13, %v3496_v38  ;;  %v7311_v13 = vrot.slane %v6351_v45, 4  ;;  %vm7320_vm9 = vcmask 236544  }
 0x35c   : > { %v7156_v49 = vrot.slane %v6650_v61, 4  ;;  %v7152_v58 = vrot.slane %v6652_v27, 4  ;;  %4247 = vmatprep.subr.bf16.mxu1 %v4630_v51  ;;  %v3414_v39 = vsel %vm348_vm1, %v7310_v17, %v7151_v48  ;;  %v4734_v59 = vcombine.high %v3497_v24, %v3497_v24 }
 0x35d   : > { %3116 = vrot.lane.b32.xlu1 %v6636_v4, %s7206_s17  ;;  %4359 = vperm.xlu0 %4833, %v4356_v5   ;;  %v4733_v51 = vcombine.low %v3497_v24, %v3497_v24  ;;  %s7376_s17 = sld [smem:[#allocation20_spill]] }
 0x35e   : > { %v3455_v38 = vsel %vm348_vm1, %v7311_v13, %v7152_v58  ;;  %v7314_v13 = vrot.slane %v6375_v47, 4 }
 0x35f   : > { %v4370_v21 = vld [vmem:[%s7312_s30] sm:$0xff]  ;;  %v6676_v5 = vpop.permute.xlu1 %3237  ;;  %4248 = vmatpush1.bf16.msra.mxu1 %v4629_v42  ;;  %v6678_v17 = vpop.permute.xlu0 %3360  ;;  %v3456_v48 = vsel %vm7313_vm10, %v6351_v45, %v3455_v38  ;;  %v3415_v42 = vsel %vm7315_vm11, %v6353_v52, %v3414_v39  ;;  %v7316_v45 = vrot.slane %v6373_v44, 4  ;;  %v4175_v9 = vsel %vm348_vm1, %v4733_v51, 0 }
 0x360   : > { %v3332_v58 = vsel %vm348_vm1, %v7314_v13, %v7156_v49  ;;  %v7155_v14 = vrot.slane %v6678_v17, 4  ;;  %4741 = vmatprep.subr.msk.bf16.mxu1 %vm348_vm1, %v4734_v59  ;;  %v7161_v24 = vrot.slane %v6676_v5, 4  ;;  %v4726_v13 = vcombine.high %v3415_v42, %v3456_v48  ;;  %v2313_v59 = vld [vmem:[%s7023_s3 + $0x8] sm:$0xff] }
 0x361   : > { %2293 = vperm.xlu1 %4834, %v2285_v15   ;;  %4373 = vperm.xlu0 %4833, %v4370_v21   ;;  %v3333_v52 = vsel %vm1240_vm15, %v6375_v47, %v3332_v58  ;;  %v4725_v40 = vcombine.low %v3415_v42, %v3456_v48  ;;  %v7319_v47 = vrot.slane %v6393_v22, 4  ;;  %v7321_v42 = vrot.slane %v6415_v23, 4 }
 0x362   : > { %v3373_v38 = vsel %vm348_vm1, %v7316_v45, %v7155_v14  ;;  %vm7322_vm10 = vcmask 302080   ;;  %vm7324_vm11 = vcmask 318464  }
 0x363   : > { %v6701_v15 = vpop.permute.xlu1 %3155  ;;  %4254 = vmatpush2.bf16.msra.mxu1 %v4175_v9  ;;  %v6703_v21 = vpop.permute.xlu0 %3278  ;;  %v3374_v39 = vsel %vm7317_vm12, %v6373_v44, %v3373_v38  ;;  %v7318_v9 = vrot.slane %v6395_v50, 4  ;;  %vm7325_vm12 = vcmask 310272   ;;  %s4498_s23 = sshll.u32 %s7376_s17, 6  ;;  %s4409_s29 = scalar_lea.sflag [#allocation7], %s7376_s17 }
 0x364   : > { %v7159_v45 = vrot.slane %v6701_v15, 4  ;;  %v7160_v51 = vrot.slane %v6703_v21, 4  ;;  %4255 = vmatprep.subr.bf16.mxu1 %v4726_v13  ;;  %v4717_v14 = vcombine.low %v3333_v52, %v3374_v39  ;;  %v4718_v49 = vcombine.high %v3333_v52, %v3374_v39  ;;  %s6964_s24 = scalar_lea.vmem [#allocation8], %s4498_s23 }
 0x365   : > { %2321 = vperm.xlu1 %4834, %v2313_v59   ;;  %v3250_v31 = vsel %vm348_vm1, %v7318_v9, %v7161_v24  ;;  %s4423_s10 = sshll.u32 %s6964_s24, 4  ;;  %s4424_s10 = int_to_ptr.vmem [resolvable:$true] %s4423_s10 }
 0x366   : > { %v3291_v44 = vsel %vm348_vm1, %v7319_v47, %v7160_v51  ;;  %v3168_v13 = vsel %vm348_vm1, %v7321_v42, %v7159_v45  ;;  %v3251_v52 = vsel %vm7322_vm10, %v6395_v50, %v3250_v31  ;;  %vm7342_vm10 = vcmask 826368   ;;  %s4870_s20 = scalar_lea.vmem %s4424_s10, 1024  ;;  %p4877_p1 = scmp.lt.s32.totalorder %s4424_s10, %s4875_s11 }
 0x367   : > { %v6721_v58 = vpop.permute.xlu1 %3073  ;;  %4256 = vmatpush2.bf16.msra.mxu1 %v4725_v40  ;;  %v6723_v38 = vpop.permute.xlu0 %3196  ;;  %v3292_v48 = vsel %vm7320_vm9, %v6393_v22, %v3291_v44  ;;  %v7323_v40 = vrot.slane %v6413_v29, 4  ;;  %v3169_v42 = vsel %vm7324_vm11, %v6415_v23, %v3168_v13  ;;  %vm7341_vm9 = vcmask 891904   ;;  %vm7343_vm11 = vmmov %vm7342_vm10  ;;  %p4871_p11 = scmp.ne.s32.totalorder %s4424_s10, %s4870_s20  ;;  %p4878_p3 = scmp.lt.s32.totalorder %s4876_s13, %s4870_s20 }
 0x368   : > { %v3204_v59 = vrot.slane %v6723_v38, 4  ;;  %4257 = vmatprep.subr.bf16.mxu1 %v4718_v49  ;;  %v3081_v39 = vrot.slane %v6721_v58, 4  ;;  %v4710_v9 = vcombine.high %v3251_v52, %v3292_v48  ;;  %v4709_v24 = vcombine.low %v3251_v52, %v3292_v48 }
 0x369   : > { %v3001_v48 = vrot.slane %v6174_v56, 4  ;;  %v3042_v52 = vrot.slane %v6181_v30, 4  ;;  %p4872_p13 = pnand %p4871_p11, %p7380_p12  ;;  %p4879_p8 = por %p4878_p3, %p4877_p1 }
 0x36a   : > { %v3209_v22 = vsel %vm348_vm1, %v7323_v40, %v3204_v59  ;;  %v7326_v40 = vrot.slane %v6435_v18, 4 }
 0x36b   : > { %v2994_v47 = vpop.permute.xlu1 %2993  ;;  %4258 = vmatpush2.bf16.msra.mxu1 %v4717_v14  ;;  %v6741_v44 = vpop.permute.xlu0 %3114  ;;  %v3210_v49 = vsel %vm7325_vm12, %v6413_v29, %v3209_v22  ;;  %vm7344_vm12 = vmmov %vm7341_vm9  ;;  %p4873_p0 = pneg %p4872_p13 }
 0x36c   : > { %v7162_v50 = vrot.slane %v6741_v44, 4  ;;  %4259 = vmatprep.subr.bf16.mxu1 %v4710_v9  ;;  %v4701_v31 = vcombine.low %v3169_v42, %v3210_v49  ;;  %v4702_v45 = vcombine.high %v3169_v42, %v3210_v49  ;;  %v3000_v51 = vrot.slane %v2994_v47, 4 }
 0x36d   : > { %v3086_v14 = vsel %vm348_vm1, %v7326_v40, %v3081_v39  ;;  %p4880_p10 = pnand %p4879_p8, %p4873_p0 }
 0x36e   : > { %v3127_v23 = vsel %vm348_vm1, %v3121_v16, %v7162_v50  ;;  %v3006_v42 = vsel %vm348_vm1, %v2999_v60, %v3000_v51  ;;  %v3087_v49 = vsel %vm988_vm14, %v6435_v18, %v3086_v14  ;;  %v3008_v16 = vsel %vm348_vm1, %v3000_v51, %v3001_v48 }
 0x36f   : > { %v3035_v29 = vpop.permute.xlu1 %3034  ;;  %4260 = vmatpush2.bf16.msra.mxu1 %v4709_v24  ;;  %v2947_v13 = vpop.permute.xlu0 %2946  ;;  %v3128_v22 = vsel %vm1030_vm13, %v6433_v34, %v3127_v23  ;;  %v3007_v18 = vsel %vm904_vm2, %v6441_v8, %v3006_v42  ;;  %v3009_v51 = vsel %vm904_vm2, %v2994_v47, %v3008_v16  ;;  %vm7330_vm2 = vcmask 736256  }
 0x370   : > { %v3041_v9 = vrot.slane %v3035_v29, 4  ;;  %4261 = vmatprep.subr.bf16.mxu1 %v4702_v45  ;;  %v4694_v56 = vcombine.high %v3087_v49, %v3128_v22  ;;  %v2952_v23 = vrot.slane %v2947_v13, 4 }
 0x372   : > { %v3047_v24 = vsel %vm348_vm1, %v3040_v63, %v3041_v9  ;;  %v3049_v34 = vsel %vm348_vm1, %v3041_v9, %v3042_v52  ;;  %v4693_v63 = vcombine.low %v3087_v49, %v3128_v22  ;;  %v2971_v22 = vld [vmem:[#allocation2 + $0x14] sm:$0xff] }
 0x373   : > { %v3050_v30 = vsel %vm946_vm3, %v3035_v29, %v3049_v34  ;;  %v2945_v40 = vpop.permute.xlu1 %2944  ;;  %4262 = vmatpush2.bf16.msra.mxu1 %v4701_v31  ;;  %v2865_v45 = vpop.permute.xlu0 %2864  ;;  %v3048_v60 = vsel %vm946_vm3, %v6463_v25, %v3047_v24  ;;  %v7327_v29 = vrot.slane %v6461_v12, 4  ;;  %vm7331_vm3 = vmmov %vm7330_vm2 }
 0x374   : > { %v2951_v50 = vrot.slane %v2945_v40, 4  ;;  %4263 = vmatprep.subr.bf16.mxu1 %v4694_v56  ;;  %v4687_v14 = vcombine.low %v3007_v18, %v3048_v60  ;;  %v4688_v48 = vcombine.high %v3007_v18, %v3048_v60  ;;  %v4690_v52 = vcombine.high %v3009_v51, %v3050_v30 }
 0x375   : > { %v4689_v42 = vcombine.low %v3009_v51, %v3050_v30  ;;  %v2870_v56 = vrot.slane %v2865_v45, 4 }
 0x376   : > { %v2957_v31 = vsel %vm348_vm1, %v7327_v29, %v2951_v50  ;;  %v2959_v9 = vsel %vm348_vm1, %v2951_v50, %v2952_v23  ;;  %4274 = vmatprep.subr.bf16.mxu0 %v4688_v48 }
 0x377   : > { %v2960_v25 = vsel %vm854_vm4, %v2945_v40, %v2959_v9  ;;  %v2863_v13 = vpop.permute.xlu1 %2862  ;;  %4264 = vmatpush2.bf16.msra.mxu1 %v4693_v63  ;;  %v2906_v24 = vpop.permute.xlu0 %2905  ;;  %v2958_v8 = vsel %vm854_vm4, %v6461_v12, %v2957_v31  ;;  %4275 = vmatpush1.bf16.msra.mxu0 %v4687_v14 }
 0x378   : > { %v2869_v47 = vrot.slane %v2863_v13, 4  ;;  %4315 = vmatprep.subr.bf16.mxu1 %v4690_v52  ;;  %v4679_v49 = vcombine.low %v2958_v8, %v2971_v22  ;;  %v4680_v16 = vcombine.high %v2958_v8, %v2971_v22  ;;  %v4682_v34 = vcombine.high %v2960_v25, %v6636_v4 }
 0x379   : > { %v2911_v23 = vrot.slane %v2906_v24, 4  ;;  %v4681_v18 = vcombine.low %v2960_v25, %v6636_v4 }
 0x37a   : > { %4266 = vmatmul.mubr.bf16.vlgmr.msra.gmra.mxu1 %v6482_v26  ;;  %4276 = vmatprep.subr.bf16.mxu0 %v4680_v16  ;;  %v2877_v60 = vsel %vm348_vm1, %v2869_v47, %v2870_v56  ;;  %v2875_v30 = vsel %vm348_vm1, %v2868_v53, %v2869_v47 }
 0x37b   : > { %v2904_v50 = vpop.permute.xlu1 %2903  ;;  %4316 = vmatpush1.bf16.msra.mxu1 %v4689_v42  ;;  %v2783_v40 = vpop.permute.xlu0 %2782  ;;  %4277 = vmatpush1.bf16.msra.mxu0 %v4679_v49  ;;  %v2878_v63 = vsel %vm770_vm5, %v2863_v13, %v2877_v60 }
 0x37c   : > { %v2910_v12 = vrot.slane %v2904_v50, 4  ;;  %4317 = vmatprep.subr.bf16.mxu1 %v4682_v34  ;;  %4746 = vmatprep.mubr.msk.bf16.mxu1 %vm2083_vm0, %v6164_v19  ;;  %v2876_v19 = vsel %vm770_vm5, %v6486_v28, %v2875_v30  ;;  %v2788_v25 = vrot.slane %v2783_v40, 4  ;;  %vm7329_vm0 = vcmask 744448  }
 0x37d   : > { %vm7332_vm4 = vmmov %vm7329_vm0  ;;  %vm7335_vm5 = vcmask 818176  }
 0x37e   : > { %v2916_v45 = vsel %vm348_vm1, %v2909_v57, %v2910_v12  ;;  %v2918_v51 = vsel %vm348_vm1, %v2910_v12, %v2911_v23 }
 0x37f   : > { %v2919_v14 = vsel %vm812_vm6, %v2904_v50, %v2918_v51  ;;  %v2781_v48 = vpop.permute.xlu1 %2780  ;;  %4318 = vmatpush1.bf16.msra.mxu1 %v4681_v18  ;;  %v2824_v4 = vpop.permute.xlu0 %2823  ;;  %v2917_v52 = vsel %vm812_vm6, %v6484_v2, %v2916_v45  ;;  %vm7336_vm6 = vcmask 809984  }
 0x380   : > { %v4673_v53 = vcombine.low %v2878_v63, %v2919_v14  ;;  %v4674_v29 = vcombine.high %v2878_v63, %v2919_v14  ;;  %v2787_v31 = vrot.slane %v2781_v48, 4  ;;  %v4671_v9 = vcombine.low %v2876_v19, %v2917_v52 }
 0x381   : > { %v4672_v57 = vcombine.high %v2876_v19, %v2917_v52  ;;  %v2829_v22 = vrot.slane %v2824_v4, 4  ;;  %v7328_v14 = vrot.slane %v6535_v62, 4 }
 0x382   : > { %v2793_v13 = vsel %vm348_vm1, %v2786_v10, %v2787_v31  ;;  %4319 = vmatprep.subr.bf16.mxu1 %v4674_v29  ;;  %v2795_v47 = vsel %vm348_vm1, %v2787_v31, %v2788_v25 }
 0x383   : > { %4278 = vmatprep.subr.bf16.mxu0 %v4672_v57  ;;  %v2822_v24 = vpop.permute.xlu1 %2821  ;;  %4320 = vmatpush1.bf16.msra.mxu1 %v4673_v53  ;;  %v2701_v8 = vpop.permute.xlu0 %2700  ;;  %v2794_v2 = vsel %vm686_vm7, %v6512_v7, %v2793_v13  ;;  %v2796_v10 = vsel %vm686_vm7, %v2781_v48, %v2795_v47  ;;  %vm7337_vm7 = vmmov %vm7336_vm6 }
 0x384   : > { %v2828_v42 = vrot.slane %v2822_v24, 4  ;;  %4279 = vmatpush1.bf16.msra.mxu0 %v4671_v9  ;;  %v2706_v18 = vrot.slane %v2701_v8, 4 }
 0x386   : > { %v2834_v28 = vsel %vm348_vm1, %v2827_v46, %v2828_v42  ;;  %v2836_v49 = vsel %vm348_vm1, %v2828_v42, %v2829_v22 }
 0x387   : > { %v2837_v16 = vsel %vm728_vm8, %v2822_v24, %v2836_v49  ;;  %v2699_v34 = vpop.permute.xlu1 %2698  ;;  %v2742_v56 = vpop.permute.xlu0 %2741  ;;  %v2835_v7 = vsel %vm728_vm8, %v6510_v37, %v2834_v28  ;;  %vm7338_vm8 = vmmov %vm7335_vm5 }
 0x388   : > { %v4665_v50 = vcombine.low %v2796_v10, %v2837_v16  ;;  %v4666_v40 = vcombine.high %v2796_v10, %v2837_v16  ;;  %v2705_v60 = vrot.slane %v2699_v34, 4  ;;  %v4663_v23 = vcombine.low %v2794_v2, %v2835_v7 }
 0x389   : > { %v4664_v12 = vcombine.high %v2794_v2, %v2835_v7  ;;  %v2747_v51 = vrot.slane %v2742_v56, 4  ;;  %v7334_v10 = vrot.slane %v6558_v32, 4 }
 0x38a   : > { %4321 = vmatprep.subr.bf16.mxu1 %v4666_v40  ;;  %v2713_v45 = vsel %vm348_vm1, %v2705_v60, %v2706_v18  ;;  %v2711_v37 = vsel %vm348_vm1, %v2704_v54, %v2705_v60 }
 0x38b   : > { %4280 = vmatprep.subr.bf16.mxu0 %v4664_v12  ;;  %v2740_v46 = vpop.permute.xlu1 %2739  ;;  %4322 = vmatpush1.bf16.msra.mxu1 %v4665_v50  ;;  %v2619_v30 = vpop.permute.xlu0 %2618  ;;  %v2714_v52 = vsel %vm7329_vm0, %v2699_v34, %v2713_v45  ;;  %v2712_v54 = vsel %vm7332_vm4, %v6537_v20, %v2711_v37  ;;  %vm7347_vm0 = vcmask 908288  }
 0x38c   : > { %v2746_v63 = vrot.slane %v2740_v46, 4  ;;  %4281 = vmatpush1.bf16.msra.mxu0 %v4663_v23  ;;  %v2624_v8 = vrot.slane %v2619_v30, 4 }
 0x38e   : > { %v2752_v48 = vsel %vm348_vm1, %v7328_v14, %v2746_v63  ;;  %v2754_v4 = vsel %vm348_vm1, %v2746_v63, %v2747_v51 }
 0x38f   : > { %v2755_v53 = vsel %vm7330_vm2, %v2740_v46, %v2754_v4  ;;  %v2617_v29 = vpop.permute.xlu1 %2616  ;;  %v2660_v31 = vpop.permute.xlu0 %2659  ;;  %v2753_v19 = vsel %vm7331_vm3, %v6535_v62, %v2752_v48  ;;  %v7333_v62 = vrot.slane %v6560_v33, 4  ;;  %vm7348_vm2 = vcmask 900096   ;;  %vm7349_vm3 = vmmov %vm7347_vm0 }
 0x390   : > { %v4657_v9 = vcombine.low %v2714_v52, %v2755_v53  ;;  %v4658_v57 = vcombine.high %v2714_v52, %v2755_v53  ;;  %v2623_v25 = vrot.slane %v2617_v29, 4  ;;  %v4655_v13 = vcombine.low %v2712_v54, %v2753_v19  ;;  %vm7350_vm4 = vmmov %vm7348_vm2 }
 0x391   : > { %v4656_v24 = vcombine.high %v2712_v54, %v2753_v19  ;;  %v2665_v42 = vrot.slane %v2660_v31, 4  ;;  %v7340_v52 = vrot.slane %v6581_v0, 4 }
 0x392   : > { %4323 = vmatprep.subr.bf16.mxu1 %v4658_v57  ;;  %v2631_v22 = vsel %vm348_vm1, %v2623_v25, %v2624_v8  ;;  %v2629_v49 = vsel %vm348_vm1, %v7333_v62, %v2623_v25 }
 0x393   : > { %4282 = vmatprep.subr.bf16.mxu0 %v4656_v24  ;;  %v2658_v2 = vpop.permute.xlu1 %2657  ;;  %4324 = vmatpush1.bf16.msra.mxu1 %v4657_v9  ;;  %v2537_v47 = vpop.permute.xlu0 %2536  ;;  %v2632_v34 = vsel %vm7335_vm5, %v2617_v29, %v2631_v22  ;;  %v2630_v18 = vsel %vm7338_vm8, %v6560_v33, %v2629_v49  ;;  %vm7352_vm5 = vcmask 138240   ;;  %vm7357_vm8 = vcmask 146432  }
 0x394   : > { %v2664_v28 = vrot.slane %v2658_v2, 4  ;;  %4283 = vmatpush1.bf16.msra.mxu0 %v4655_v13  ;;  %v2542_v45 = vrot.slane %v2537_v47, 4 }
 0x396   : > { %v2670_v20 = vsel %vm348_vm1, %v7334_v10, %v2664_v28  ;;  %v2672_v16 = vsel %vm348_vm1, %v2664_v28, %v2665_v42  ;;  %v7345_v28 = vrot.slane %v6606_v35, 4 }
 0x397   : > { %v2673_v56 = vsel %vm7336_vm6, %v2658_v2, %v2672_v16  ;;  %v2535_v7 = vpop.permute.xlu1 %2534  ;;  %v2578_v50 = vpop.permute.xlu0 %2577  ;;  %v2671_v40 = vsel %vm7337_vm7, %v6558_v32, %v2670_v20  ;;  %v7339_v32 = vrot.slane %v6583_v6, 4  ;;  %v7346_v20 = vrot.slane %v6604_v41, 4  ;;  %vm7353_vm6 = vmmov %vm7352_vm5 }
 0x398   : > { %v4649_v60 = vcombine.low %v2632_v34, %v2673_v56  ;;  %v4650_v23 = vcombine.high %v2632_v34, %v2673_v56  ;;  %v2541_v12 = vrot.slane %v2535_v7, 4  ;;  %v4647_v46 = vcombine.low %v2630_v18, %v2671_v40 }
 0x399   : > { %v4648_v30 = vcombine.high %v2630_v18, %v2671_v40  ;;  %v2583_v14 = vrot.slane %v2578_v50, 4  ;;  %vm7356_vm7 = vcmask 154624  }
 0x39a   : > { %4325 = vmatprep.subr.bf16.mxu1 %v4650_v23  ;;  %v2549_v37 = vsel %vm348_vm1, %v2541_v12, %v2542_v45  ;;  %v2547_v4 = vsel %vm348_vm1, %v7339_v32, %v2541_v12 }
 0x39b   : > { %4284 = vmatprep.subr.bf16.mxu0 %v4648_v30  ;;  %v2576_v51 = vpop.permute.xlu1 %2575  ;;  %4326 = vmatpush1.bf16.msra.mxu1 %v4649_v60  ;;  %v2455_v63 = vpop.permute.xlu0 %2454  ;;  %v2550_v29 = vsel %vm7341_vm9, %v2535_v7, %v2549_v37  ;;  %v2548_v24 = vsel %vm7344_vm12, %v6583_v6, %v2547_v4  ;;  %vm7358_vm9 = vmmov %vm7356_vm7 }
 0x39c   : > { %v2582_v48 = vrot.slane %v2576_v51, 4  ;;  %4285 = vmatpush1.bf16.msra.mxu0 %v4647_v46  ;;  %v2460_v47 = vrot.slane %v2455_v63, 4 }
 0x39e   : > { %v2588_v33 = vsel %vm348_vm1, %v7340_v52, %v2582_v48  ;;  %v2590_v53 = vsel %vm348_vm1, %v2582_v48, %v2583_v14 }
 0x39f   : > { %v2591_v31 = vsel %vm7342_vm10, %v2576_v51, %v2590_v53  ;;  %v2453_v19 = vpop.permute.xlu1 %2452  ;;  %v2496_v9 = vpop.permute.xlu0 %2495  ;;  %v2589_v57 = vsel %vm7343_vm11, %v6581_v0, %v2588_v33  ;;  %v7351_v51 = vrot.slane %v6629_v55, 4  ;;  %vm7359_vm10 = vmmov %vm7357_vm8  ;;  %vm7362_vm11 = vcmask 220160  }
 0x3a0   : > { %v4641_v25 = vcombine.low %v2550_v29, %v2591_v31  ;;  %v4642_v54 = vcombine.high %v2550_v29, %v2591_v31  ;;  %v2459_v13 = vrot.slane %v2453_v19, 4  ;;  %v4639_v8 = vcombine.low %v2548_v24, %v2589_v57  ;;  %vm7363_vm12 = vmmov %vm7362_vm11 }
 0x3a1   : > { %v4640_v2 = vcombine.high %v2548_v24, %v2589_v57  ;;  %v2501_v49 = vrot.slane %v2496_v9, 4  ;;  %v7354_v9 = vrot.slane %v6627_v1, 4 }
 0x3a2   : > { %4327 = vmatprep.subr.bf16.mxu1 %v4642_v54  ;;  %v2465_v62 = vsel %vm348_vm1, %v7345_v28, %v2459_v13  ;;  %v2467_v0 = vsel %vm348_vm1, %v2459_v13, %v2460_v47 }
 0x3a3   : > { %4286 = vmatprep.subr.bf16.mxu0 %v4640_v2  ;;  %v2494_v22 = vpop.permute.xlu1 %2493  ;;  %4328 = vmatpush1.bf16.msra.mxu1 %v4641_v25  ;;  %v3488_v42 = vpop.permute.xlu0 %3487  ;;  %v2468_v56 = vsel %vm7347_vm0, %v2453_v19, %v2467_v0  ;;  %v2466_v40 = vsel %vm7349_vm3, %v6606_v35, %v2465_v62  ;;  %vm7367_vm0 = vcmask 236544  }
 0x3a4   : > { %v2500_v10 = vrot.slane %v2494_v22, 4  ;;  %4287 = vmatpush1.bf16.msra.mxu0 %v4639_v8  ;;  %v3493_v34 = vrot.slane %v3488_v42, 4  ;;  %v7355_v8 = vrot.slane %v6652_v27, 4  ;;  %vm7369_vm3 = vmmov %vm7367_vm0 }
 0x3a6   : > { %v2506_v6 = vsel %vm348_vm1, %v7346_v20, %v2500_v10  ;;  %v2508_v16 = vsel %vm348_vm1, %v2500_v10, %v2501_v49 }
 0x3a7   : > { %v2509_v7 = vsel %vm7348_vm2, %v2494_v22, %v2508_v16  ;;  %v3486_v50 = vpop.permute.xlu1 %3485  ;;  %v2507_v60 = vsel %vm7350_vm4, %v6604_v41, %v2506_v6  ;;  %v3406_v23 = vpop.permute.xlu0 %3405  ;;  %vm7371_vm4 = vcmask 318464  }
 0x3a8   : > { %v4633_v12 = vcombine.low %v2468_v56, %v2509_v7  ;;  %v4634_v18 = vcombine.high %v2468_v56, %v2509_v7  ;;  %v3492_v46 = vrot.slane %v3486_v50, 4  ;;  %v4631_v30 = vcombine.low %v2466_v40, %v2507_v60 }
 0x3a9   : > { %v4632_v45 = vcombine.high %v2466_v40, %v2507_v60  ;;  %v3411_v48 = vrot.slane %v3406_v23, 4 }
 0x3aa   : > { %v3498_v63 = vsel %vm348_vm1, %v7351_v51, %v3492_v46  ;;  %v3500_v37 = vsel %vm348_vm1, %v3492_v46, %v3493_v34  ;;  %4329 = vmatprep.subr.bf16.mxu1 %v4634_v18 }
 0x3ab   : > { %v3501_v14 = vsel %vm7352_vm5, %v3486_v50, %v3500_v37  ;;  %4288 = vmatprep.subr.bf16.mxu0 %v4632_v45  ;;  %v3404_v35 = vpop.permute.xlu1 %3403  ;;  %4330 = vmatpush1.bf16.msra.mxu1 %v4633_v12  ;;  %v3499_v41 = vsel %vm7353_vm6, %v6629_v55, %v3498_v63  ;;  %v3447_v32 = vpop.permute.xlu0 %3446  ;;  %v7360_v50 = vrot.slane %v6650_v61, 4  ;;  %v7361_v12 = vrot.slane %v6678_v17, 4  ;;  %vm7373_vm6 = vmmov %vm7371_vm4 }
 0x3ac   : > { %v3410_v4 = vrot.slane %v3404_v35, 4  ;;  %4289 = vmatpush1.bf16.msra.mxu0 %v4631_v30  ;;  %v4736_v52 = vcombine.high %v3499_v41, %v3499_v41  ;;  %v4738_v33 = vcombine.high %v3501_v14, %v3501_v14  ;;  %v4735_v53 = vcombine.low %v3499_v41, %v3499_v41 }
 0x3ad   : > { %v4737_v29 = vcombine.low %v3501_v14, %v3501_v14  ;;  %v3452_v19 = vrot.slane %v3447_v32, 4  ;;  %vm7372_vm5 = vcmask 310272  }
 0x3ae   : > { %4743 = vmatprep.subr.msk.bf16.mxu0 %vm348_vm1, %v4736_v52  ;;  %4745 = vmatprep.subr.msk.bf16.mxu1 %vm348_vm1, %v4738_v33  ;;  %v4181_v31 = vsel %vm348_vm1, %v4735_v53, 0  ;;  %v3416_v57 = vsel %vm348_vm1, %v7354_v9, %v3410_v4  ;;  %v3418_v13 = vsel %vm348_vm1, %v3410_v4, %v3411_v48  ;;  %v7364_v53 = vrot.slane %v6676_v5, 4 }
 0x3af   : > { %v3445_v25 = vpop.permute.xlu1 %3444  ;;  %v4187_v55 = vsel %vm348_vm1, %v4737_v29, 0  ;;  %v3324_v54 = vpop.permute.xlu0 %3323  ;;  %v3417_v22 = vsel %vm7356_vm7, %v6627_v1, %v3416_v57  ;;  %v3419_v0 = vsel %vm7358_vm9, %v3404_v35, %v3418_v13  ;;  %v7365_v9 = vrot.slane %v6703_v21, 4  ;;  %vm7374_vm7 = vmmov %vm7372_vm5 }
 0x3b0   : > { %v3451_v24 = vrot.slane %v3445_v25, 4  ;;  %4295 = vmatpush2.bf16.msra.mxu0 %v4181_v31  ;;  %4336 = vmatpush2.bf16.msra.mxu1 %v4187_v55  ;;  %v3329_v28 = vrot.slane %v3324_v54, 4 }
 0x3b2   : > { %v3457_v2 = vsel %vm348_vm1, %v7355_v8, %v3451_v24  ;;  %v3459_v47 = vsel %vm348_vm1, %v3451_v24, %v3452_v19 }
 0x3b3   : > { %v3322_v42 = vpop.permute.xlu1 %3321  ;;  %v3458_v62 = vsel %vm7357_vm8, %v6652_v27, %v3457_v2  ;;  %v3460_v49 = vsel %vm7359_vm10, %v3445_v25, %v3459_v47  ;;  %v3365_v10 = vpop.permute.xlu0 %3364 }
 0x3b4   : > { %v3328_v20 = vrot.slane %v3322_v42, 4  ;;  %v4727_v6 = vcombine.low %v3417_v22, %v3458_v62  ;;  %v4728_v16 = vcombine.high %v3417_v22, %v3458_v62  ;;  %v4729_v34 = vcombine.low %v3419_v0, %v3460_v49 }
 0x3b5   : > { %v4730_v56 = vcombine.high %v3419_v0, %v3460_v49  ;;  %v3370_v7 = vrot.slane %v3365_v10, 4  ;;  %v7370_v10 = vrot.slane %v6701_v15, 4 }
 0x3b6   : > { %4296 = vmatprep.subr.bf16.mxu0 %v4728_v16  ;;  %v3334_v1 = vsel %vm348_vm1, %v7360_v50, %v3328_v20  ;;  %v3336_v60 = vsel %vm348_vm1, %v3328_v20, %v3329_v28 }
 0x3b7   : > { %4337 = vmatprep.subr.bf16.mxu1 %v4730_v56  ;;  %v3363_v40 = vpop.permute.xlu1 %3362  ;;  %4297 = vmatpush2.bf16.msra.mxu0 %v4727_v6  ;;  %v3242_v27 = vpop.permute.xlu0 %3241  ;;  %v3335_v30 = vsel %vm1240_vm15, %v6650_v61, %v3334_v1  ;;  %v3337_v37 = vsel %vm1240_vm15, %v3322_v42, %v3336_v60  ;;  %vm7366_vm15 = vcmask 302080  }
 0x3b8   : > { %v3369_v23 = vrot.slane %v3363_v40, 4  ;;  %4338 = vmatpush2.bf16.msra.mxu1 %v4729_v34  ;;  %v3247_v51 = vrot.slane %v3242_v27, 4  ;;  %vm7368_vm2 = vmmov %vm7366_vm15 }
 0x3ba   : > { %v3375_v18 = vsel %vm348_vm1, %v7361_v12, %v3369_v23  ;;  %v3377_v46 = vsel %vm348_vm1, %v3369_v23, %v3370_v7 }
 0x3bb   : > { %v3240_v45 = vpop.permute.xlu1 %3239  ;;  %v3376_v63 = vsel %vm7362_vm11, %v6678_v17, %v3375_v18  ;;  %v3378_v14 = vsel %vm7363_vm12, %v3363_v40, %v3377_v46  ;;  %v3283_v35 = vpop.permute.xlu0 %3282 }
 0x3bc   : > { %v3246_v48 = vrot.slane %v3240_v45, 4  ;;  %v4719_v41 = vcombine.low %v3335_v30, %v3376_v63  ;;  %v4720_v32 = vcombine.high %v3335_v30, %v3376_v63  ;;  %v4721_v4 = vcombine.low %v3337_v37, %v3378_v14 }
 0x3bd   : > { %v4722_v52 = vcombine.high %v3337_v37, %v3378_v14  ;;  %v3288_v33 = vrot.slane %v3283_v35, 4  ;;  %v7375_v37 = vrot.slane %v6741_v44, 4 }
 0x3be   : > { %4298 = vmatprep.subr.bf16.mxu0 %v4720_v32  ;;  %v3252_v61 = vsel %vm348_vm1, %v7364_v53, %v3246_v48  ;;  %v3254_v31 = vsel %vm348_vm1, %v3246_v48, %v3247_v51 }
 0x3bf   : > { %4339 = vmatprep.subr.bf16.mxu1 %v4722_v52  ;;  %v3281_v29 = vpop.permute.xlu1 %3280  ;;  %4299 = vmatpush2.bf16.msra.mxu0 %v4719_v41  ;;  %v3160_v17 = vpop.permute.xlu0 %3159  ;;  %v3253_v55 = vsel %vm7366_vm15, %v6676_v5, %v3252_v61  ;;  %v3255_v8 = vsel %vm7368_vm2, %v3240_v45, %v3254_v31 }
 0x3c0   : > { %v3287_v19 = vrot.slane %v3281_v29, 4  ;;  %4340 = vmatpush2.bf16.msra.mxu1 %v4721_v4  ;;  %v3165_v13 = vrot.slane %v3160_v17, 4  ;;  %v2236_v61 = vpop.f32.mrf.mxu0 }
 0x3c2   : > { %v3293_v57 = vsel %vm348_vm1, %v7365_v9, %v3287_v19  ;;  %v3295_v25 = vsel %vm348_vm1, %v3287_v19, %v3288_v33 }
 0x3c3   : > { %v3158_v54 = vpop.permute.xlu1 %3157  ;;  %v3294_v24 = vsel %vm7367_vm0, %v6703_v21, %v3293_v57  ;;  %v3296_v2 = vsel %vm7369_vm3, %v3281_v29, %v3295_v25  ;;  %v3201_v47 = vpop.permute.xlu0 %3200 }
 0x3c4   : > { %v3164_v22 = vrot.slane %v3158_v54, 4  ;;  %v4711_v42 = vcombine.low %v3253_v55, %v3294_v24  ;;  %v4712_v28 = vcombine.high %v3253_v55, %v3294_v24  ;;  %v4713_v62 = vcombine.low %v3255_v8, %v3296_v2 }
 0x3c5   : > { %v4714_v0 = vcombine.high %v3255_v8, %v3296_v2  ;;  %v3206_v49 = vrot.slane %v3201_v47, 4 }
 0x3c6   : > { %4300 = vmatprep.subr.bf16.mxu0 %v4712_v28  ;;  %v3170_v5 = vsel %vm348_vm1, %v7370_v10, %v3164_v22  ;;  %v3172_v6 = vsel %vm348_vm1, %v3164_v22, %v3165_v13 }
 0x3c7   : > { %4341 = vmatprep.subr.bf16.mxu1 %v4714_v0  ;;  %v3199_v20 = vpop.permute.xlu1 %3198  ;;  %4301 = vmatpush2.bf16.msra.mxu0 %v4711_v42  ;;  %v3078_v21 = vpop.permute.xlu0 %3077  ;;  %v3171_v7 = vsel %vm7371_vm4, %v6701_v15, %v3170_v5  ;;  %v3173_v27 = vsel %vm7373_vm6, %v3158_v54, %v3172_v6 }
 0x3c8   : > { %v3205_v16 = vrot.slane %v3199_v20, 4  ;;  %4342 = vmatpush2.bf16.msra.mxu1 %v4713_v62  ;;  %v3083_v1 = vrot.slane %v3078_v21, 4 }
 0x3ca   : > { %v3211_v34 = vsel %vm348_vm1, %v3204_v59, %v3205_v16  ;;  %v3213_v56 = vsel %vm348_vm1, %v3205_v16, %v3206_v49 }
 0x3cb   : > { %v3076_v50 = vpop.permute.xlu1 %3075  ;;  %v3212_v40 = vsel %vm7372_vm5, %v6723_v38, %v3211_v34  ;;  %v3214_v60 = vsel %vm7374_vm7, %v3199_v20, %v3213_v56  ;;  %v3119_v23 = vpop.permute.xlu0 %3118 }
 0x3cc   : > { %v3082_v12 = vrot.slane %v3076_v50, 4  ;;  %v4703_v18 = vcombine.low %v3171_v7, %v3212_v40  ;;  %v4704_v46 = vcombine.high %v3171_v7, %v3212_v40  ;;  %v4705_v30 = vcombine.low %v3173_v27, %v3214_v60 }
 0x3cd   : > { %v4706_v59 = vcombine.high %v3173_v27, %v3214_v60  ;;  %v3124_v45 = vrot.slane %v3119_v23, 4 }
 0x3ce   : > { %4302 = vmatprep.subr.bf16.mxu0 %v4704_v46  ;;  %v3088_v15 = vsel %vm348_vm1, %v3081_v39, %v3082_v12  ;;  %v3090_v38 = vsel %vm348_vm1, %v3082_v12, %v3083_v1 }
 0x3cf   : > { %4343 = vmatprep.subr.bf16.mxu1 %v4706_v59  ;;  %v3117_v51 = vpop.permute.xlu1 %3116  ;;  %4303 = vmatpush2.bf16.msra.mxu0 %v4703_v18  ;;  %v3089_v48 = vsel %vm988_vm14, %v6721_v58, %v3088_v15  ;;  %v3091_v32 = vsel %vm988_vm14, %v3076_v50, %v3090_v38  ;;  %v2279_v58 = vpop.f32.mrf.mxu1 }
 0x3d0   : > { %v3123_v63 = vrot.slane %v3117_v51, 4  ;;  %4344 = vmatpush2.bf16.msra.mxu1 %v4705_v30 }
 0x3d1   : > { %v2281_v31 = vpop.f32.mrf.mxu1 }
 0x3d2   : > { %v3129_v14 = vsel %vm348_vm1, %v7375_v37, %v3123_v63  ;;  %v3131_v35 = vsel %vm348_vm1, %v3123_v63, %v3124_v45 }
 0x3d3   : > { %v3130_v41 = vsel %vm1030_vm13, %v6741_v44, %v3129_v14  ;;  %v3132_v39 = vsel %vm1030_vm13, %v3117_v51, %v3131_v35  ;;  %v2238_v44 = vpop.f32.mrf.mxu0 }
 0x3d4   : > { %v4695_v4 = vcombine.low %v3089_v48, %v3130_v41  ;;  %v4696_v52 = vcombine.high %v3089_v48, %v3130_v41  ;;  %v4697_v33 = vcombine.low %v3091_v32, %v3132_v39  ;;  %v4698_v53 = vcombine.high %v3091_v32, %v3132_v39 }
 0x3d6   : > { %4304 = vmatprep.subr.bf16.mxu0 %v4696_v52  ;;  %4345 = vmatprep.subr.bf16.mxu1 %v4698_v53 }
 0x3d7   : > { %4305 = vmatpush2.bf16.msra.mxu0 %v4695_v4  ;;  %4346 = vmatpush2.bf16.msra.mxu1 %v4697_v33 }
 0x3d8   : > { %v4360_v8 = vpop.permute.xlu0 %4359 }
 0x3da   : > { %4307 = vmatmul.mubr.bf16.vlgmr.msra.gmra.mxu0 %v6482_v26  ;;  %4348 = vmatmul.mubr.bf16.vlgmr.msra.gmra.mxu1 %v6482_v26 }
 0x3dc   : > { %v2294_v29 = vpop.permute.xlu1 %2293  ;;  %v4374_v22 = vpop.permute.xlu0 %4373 }
 0x3dd   : > { %v2309_v17 = vmul.f32 %v2294_v29, %v2238_v44  ;;  %v2308_v9 = vmul.f32 %v2294_v29, %v2236_v61  ;;  %v2310_v57 = vmul.f32 %v2294_v29, %v2279_v58  ;;  %v2311_v25 = vmul.f32 %v2294_v29, %v2281_v31 }
 0x3de   : > { %v2304_v26 = vmul.f32 %v2294_v29, %v6052_v11  ;;  %v2305_v0 = vmul.f32 %v2294_v29, %v6054_v43  ;;  %v2306_v7 = vmul.f32 %v2294_v29, %v6093_v36  ;;  %v2307_v27 = vmul.f32 %v2294_v29, %v6097_v3 }
 0x3e0   : > { %v2322_v19 = vpop.permute.xlu1 %2321 }
 0x3e1   : > { %v2336_v55 = vadd.f32 %v2322_v19, %v2308_v9  ;;  %v2338_v54 = vadd.f32 %v2322_v19, %v2310_v57  ;;  %v6957_v13 = vadd.f32 %v2322_v19, %v2309_v17  ;;  %v6959_v24 = vadd.f32 %v2322_v19, %v2311_v25 }
 0x3e2   : > { %v2332_v28 = vadd.f32 %v2322_v19, %v2304_v26  ;;  %v2333_v20 = vadd.f32 %v2322_v19, %v2305_v0  ;;  %v2334_v1 = vadd.f32 %v2322_v19, %v2306_v7  ;;  %v2335_v18 = vadd.f32 %v2322_v19, %v2307_v27 }
 0x402   : > { %v4226_v2 = vpop.f32.mrf.mxu0 }
 0x403   : > { %v4362_v47 = vmul.f32 %v4360_v8, %v4226_v2 }
 0x404   : > { %v4228_v42 = vpop.f32.mrf.mxu0 }
 0x405   : > { %v4376_v62 = vadd.f32 %v4374_v22, %v4362_v47  ;;  %v4363_v49 = vmul.f32 %v4360_v8, %v4228_v42 }
 0x406   : > { %v4230_v10 = vpop.f32.mrf.mxu0 }
 0x407   : > { %v4384_v5 = vadd.f32 %v4376_v62, %v2332_v28  ;;  %v4377_v21 = vadd.f32 %v4374_v22, %v4363_v49 }
 0x408   : > { %v4231_v6 = vpop.f32.mrf.mxu0 }
 0x409   : > { %v4392_v16 = vmax.f32 %v4384_v5, 0.0  ;;  %v4385_v34 = vadd.f32 %v4377_v21, %v2333_v20 }
 0x40b   : > { %4400 = vst [vmem:[%s6964_s24] sm:$0xff] %v4392_v16  ;;  %v4393_v11 = vmax.f32 %v4385_v34, 0.0 }
 0x40d   : > { %4401 = vst [vmem:[%s6964_s24 + $0x8] sm:$0xff] %v4393_v11 }
 0x43a   : > { %v4267_v56 = vpop.f32.mrf.mxu1 }
 0x43b   : > { %v4364_v43 = vmul.f32 %v4360_v8, %v4267_v56 }
 0x43c   : > { %v4269_v50 = vpop.f32.mrf.mxu1 }
 0x43d   : > { %v4378_v40 = vadd.f32 %v4374_v22, %v4364_v43  ;;  %v4365_v60 = vmul.f32 %v4360_v8, %v4269_v50 }
 0x43e   : > { %v4271_v23 = vpop.f32.mrf.mxu1 }
 0x43f   : > { %v4386_v12 = vadd.f32 %v4378_v40, %v2334_v1  ;;  %v4379_v46 = vadd.f32 %v4374_v22, %v4365_v60 }
 0x440   : > { %v4272_v30 = vpop.f32.mrf.mxu1 }
 0x441   : > { %v4394_v59 = vmax.f32 %v4386_v12, 0.0  ;;  %v4387_v45 = vadd.f32 %v4379_v46, %v2335_v18 }
 0x443   : > { %4402 = vst [vmem:[%s6964_s24 + $0x10] sm:$0xff] %v4394_v59  ;;  %v4395_v51 = vmax.f32 %v4387_v45, 0.0 }
 0x445   : > { %4403 = vst [vmem:[%s6964_s24 + $0x18] sm:$0xff] %v4395_v51 }
 0x49a   : > { %v4308_v15 = vpop.f32.mrf.mxu0  ;;  %v4349_v36 = vpop.f32.mrf.mxu1 }
 0x49b   : > { %v4366_v38 = vmul.f32 %v4360_v8, %v4308_v15  ;;  %v4368_v63 = vmul.f32 %v4360_v8, %v4349_v36 }
 0x49c   : > { %v4310_v37 = vpop.f32.mrf.mxu0  ;;  %v4351_v14 = vpop.f32.mrf.mxu1 }
 0x49d   : > { %v4380_v3 = vadd.f32 %v4374_v22, %v4366_v38  ;;  %v4382_v35 = vadd.f32 %v4374_v22, %v4368_v63  ;;  %v4367_v48 = vmul.f32 %v4360_v8, %v4310_v37  ;;  %v4369_v41 = vmul.f32 %v4360_v8, %v4351_v14 }
 0x49e   : > { %v4312_v32 = vpop.f32.mrf.mxu0  ;;  %v4353_v39 = vpop.f32.mrf.mxu1 }
 0x49f   : > { %v4388_v4 = vadd.f32 %v4380_v3, %v2336_v55  ;;  %v4390_v52 = vadd.f32 %v4382_v35, %v2338_v54  ;;  %v4381_v33 = vadd.f32 %v4374_v22, %v4367_v48  ;;  %v4383_v53 = vadd.f32 %v4374_v22, %v4369_v41 }
 0x4a0   : > { %v4313_v61 = vpop.f32.mrf.mxu0  ;;  %v4354_v58 = vpop.f32.mrf.mxu1 }
 0x4a1   : > { %v4396_v29 = vmax.f32 %v4388_v4, 0.0  ;;  %v4398_v44 = vmax.f32 %v4390_v52, 0.0  ;;  %v4389_v17 = vadd.f32 %v4381_v33, %v6957_v13  ;;  %v4391_v31 = vadd.f32 %v4383_v53, %v6959_v24 }
 0x4a3   : > { %4404 = vst [vmem:[%s6964_s24 + $0x20] sm:$0xff] %v4396_v29  ;;  %4406 = vst [vmem:[%s6964_s24 + $0x30] sm:$0xff] %v4398_v44  ;;  %v4397_v19 = vmax.f32 %v4389_v17, 0.0  ;;  %v4399_v9 = vmax.f32 %v4391_v31, 0.0 }
 0x4a5   : > { %4405 = vst [vmem:[%s6964_s24 + $0x28] sm:$0xff] %v4397_v19  ;;  %4407 = vst [vmem:[%s6964_s24 + $0x38] sm:$0xff] %v4399_v9 }
 0x4a6   : > { %4883 = shalt.err (!%p4880_p10)
}
 0x4a7   : > { %s4884_s6 = scalar_lea.hbm %s6981_s25, 1024  ;;  %s4888_s0 = scalar_lea.hbm %s7379_s18, 2048 }
 0x4a8   : > { %p4885_p2 = scmp.ne.s32.totalorder %s6981_s25, %s4884_s6  ;;  %p4889_p7 = scmp.lt.s32.totalorder %s6981_s25, %s7379_s18 }
 0x4a9   : > { %p4890_p5 = scmp.lt.s32.totalorder %s4888_s0, %s4884_s6 }
 0x4aa   : > { %p4886_p4 = pnand %p4885_p2, %p7380_p12 }
 0x4ab   : > { %p4891_p6 = por %p4890_p5, %p4889_p7 }
 0x4ac   : > { %p4887_p9 = pneg %p4886_p4 }
 0x4ae   : > { %p4892_p11 = pnand %p4891_p6, %p4887_p9 }
 0x4b0   : > { %4895 = shalt.err (!%p4892_p11)
}
 0x4b1   : > { %4762 = dma.vmem_to_hbm [thread:$0]  (%p7380_p12), %s4424_s10, 1024, %s6981_s25, %s4409_s29  }
 0x4b2 PF: > { %s7381_s5 = sld [smem:[#allocation11_spill]] }
 0x4b3   : > { %s7382_s7 = sld [smem:[#allocation19_spill]] }
 0x4b4   : > { %s7383_s8 = sld [smem:[#allocation14_spill]] }
 0x4b8   : > { %s4435_s27 = sand.u32 1, %s7381_s5  }
 0x4b9   : > { %p7384_p13 = scmp.ne.s32.totalorder %s7382_s7, 0  ;;  %s4436_s30 = scalar_lea.sflag [#allocation7], %s4435_s27 }
 0x4ba   : > { %p7385_p0 = scmp.ge.s32.totalorder %s7383_s8, 2 }
 0x4bc   : > { %p4769_p1 = pnand %p7385_p0, %p7384_p13 }
 0x4be   : > { %p4770_p3 = pneg %p4769_p1 }
 0x4c0   : > { %4917 = dma.done.wait (%p4770_p3), %s4436_s30, 1024  }
 0x4c1   : > { %4919 = vsyncadd (%p4770_p3), %s4436_s30, 4294966272  ;;  %s7386_s30 = sld [smem:[#allocation16_spill]] }
 0x4c2   : > { %s7387_s27 = sld [smem:[#allocation12_spill]] }
 0x4c3   : > { %s7388_s28 = sld [smem:[#allocation13_spill]] }
 0x4c4   : > { %s7389_s29 = sld [smem:[#allocation17_spill]] }
 0x4c7   : > { %p21_p8 = scmp.ge.s32.totalorder %s7386_s30, 4  }
 0x4c9   :  { %23 = sbr.rel (!%p21_p8) target bundleno = 13 (0xd), region = 97 }
 0x4ce   :  { %4441 = vsyncpa [#allocation6], 1 }
 0x4cf   :  { %4443 = vsyncpa [#allocation6 + $0x1], 1 }
 0x4d0   :  { %4444 = vsyncpa [#allocation7], 1 }
 0x4d1   :  { %4446 = vsyncpa [#allocation7 + $0x1], 1 }

</bundles_post_ra>
